<compile_context>
chip_gen: v7x
topology: tpu7x:2x2x1
jax: 0.10.0
libtpu: 0.0.40
codegen_flags: <defaults>
</compile_context>

<pallas_src>
import functools

import jax
import jax.numpy as jnp
from jax import lax
from jax.experimental import pallas as pl
from jax.experimental.pallas import tpu as pltpu

_EPS = 1e-12  # matches torch.nn.functional.normalize default eps


def _routing_kernel(x_ref, z_ref, o_ref, *, max_iter, lane_chunk):
    # x_ref: (k, dd, nt)     normalized node features (capsule-split)
    # z_ref: (m, k, dd, nt)  normalized gathered neighbor features
    # o_ref: (k, dd, nt)     routed output
    m, k, dd, nt = z_ref.shape
    ch = lane_chunk
    num_chunks = nt // ch
    inv_k = 1.0 / k

    @pl.loop(0, num_chunks)
    def _chunk(c):
        start = c * ch
        if ch % 128 == 0:
            start = pl.multiple_of(start, 128)
        lanes = pl.ds(start, ch)

        def load_x():
            # Re-loaded at each use site on purpose: VMEM vld slots have
            # slack, vregs do not, so x is not pinned across the routing loop.
            return x_ref[:, :, lanes].astype(jnp.float32)

        def load_z(j):
            return z_ref[j, :, :, lanes].astype(jnp.float32)

        # ---- iteration 0: softmax of all-zero logits == 1/k exactly --------
        u = load_z(0)
        for j in range(1, m):
            u = u + load_z(j)
        u = u * inv_k + load_x()

        # ---- iterations 1 .. max_iter-1 -------------------------------------
        for _ in range(1, max_iter):
            # end-of-previous-iteration normalize (the reference skips it only
            # after the very last iteration, which we also skip here).
            ss = jnp.sum(u * u, axis=1, keepdims=True)
            u = u * lax.rsqrt(jnp.maximum(ss, _EPS * _EPS))
            u_new = load_x()
            for j in range(m):
                zj = load_z(j)
                # |z.u| <= 1 (both per-capsule unit norm; pad rows are zero),
                # so the softmax max-subtraction is safe to skip.
                logit = jnp.sum(zj * u, axis=1, keepdims=True)   # (k, 1, ch)
                e = jnp.exp(logit)                               # EUP
                den = jnp.sum(e, axis=0, keepdims=True)          # (1, 1, ch)
                pj = e * pl.reciprocal(den, approx=False)        # exact softmax
                u_new = u_new + zj * pj
            u = u_new

        o_ref[:, :, lanes] = u.astype(o_ref.dtype)


def _vmem_capacity_bytes():
    try:
        return int(pltpu.get_tpu_info().vmem_capacity_bytes)
    except Exception:
        return 64 << 20  # conservative fallback (v7x has 64 MiB per TensorCore)


@functools.partial(
    jax.jit,
    static_argnames=("max_iter", "dim", "num_caps", "node_block", "lane_chunk",
                     "z_dtype"),
)
def routing_layer(x, neighbors, max_iter, *, dim, num_caps,
                  node_block=None, lane_chunk=None, z_dtype=None):
    """JAX/Pallas equivalent of RoutingLayer.forward.

    x:         (n, dim) float32
    neighbors: (n*m,) int32 indices into [0, n]; index n selects the zero row.
    z_dtype:   optional narrower streaming dtype for the gathered neighbor
               tensor (e.g. jnp.bfloat16 on bandwidth-starved v5e/v6e);
               in-kernel compute stays float32.
    returns:   (n, dim) float32
    """
    assert dim % num_caps == 0
    n = x.shape[0]
    m = neighbors.shape[0] // n
    assert neighbors.shape[0] == n * m
    d, k = dim, num_caps
    dd = d // k
    zdt = jnp.dtype(z_dtype) if z_dtype is not None else jnp.dtype(jnp.float32)

    # ---- wrapper glue: layout plumbing only, no routing compute --------------
    # Normalize x ONCE, already in node-on-lanes layout, pad a zero node column,
    # then gather neighbors along the node (minor) axis with the neighbor table
    # reordered to (m, n).  The remaining permutation keeps n as the minor axis,
    # so the dominant z tensor never goes through a minor-axis-changing
    # transpose in HBM.
    x_t = x.astype(jnp.float32).T.reshape(k, dd, n)               # (k, dd, n)
    ss = jnp.sum(x_t * x_t, axis=1, keepdims=True)
    xn_t = x_t * lax.rsqrt(jnp.maximum(ss, _EPS * _EPS))          # per-capsule L2
    x_t_pad = jnp.pad(xn_t, ((0, 0), (0, 0), (0, 1)))             # zero col at n
    nbr_t = neighbors.reshape(n, m).T                             # (m, n)
    z_t = x_t_pad[:, :, nbr_t]                                    # (k, dd, m, n)
    z_t = jnp.transpose(z_t, (2, 0, 1, 3)).astype(zdt)            # (m, k, dd, n)

    # ---- node-tile / VMEM sizing (generation aware) ---------------------------
    cap = _vmem_capacity_bytes()
    bytes_per_node = m * d * zdt.itemsize + 2 * d * 4             # z + x + out
    if n % 128 == 0:
        if node_block is None:
            budget = int(cap * 0.45)                 # double-buffered block budget
            nt = min(1024, n, max(128, budget // (2 * bytes_per_node)))
            if n >= 256:
                nt = min(nt, n // 2)                 # >=2 grid steps (v7x dual-TC)
        else:
            nt = min(node_block, n)
        nt = max(128, (nt // 128) * 128)
        while n % nt != 0:
            nt -= 128
    else:
        # TODO(synk): node counts not divisible by 128 fall back to a single
        # whole-array block (still correct, just unblocked).
        nt = n
    assert n % nt == 0 and nt >= 1

    # Lane sub-chunk: bounds the per-chunk vreg working set (~3 * d * ch floats).
    ch = lane_chunk if lane_chunk is not None else (256 if d <= 32 else 128)
    ch = min(ch, nt)
    if nt % ch != 0:
        ch = 128 if nt % 128 == 0 else nt
    assert nt % ch == 0

    blk_bytes = nt * bytes_per_node
    vmem_limit = int(min(max(3 * blk_bytes, 8 << 20), (cap * 3) // 4))

    kernel = functools.partial(_routing_kernel, max_iter=max_iter, lane_chunk=ch)

    out = pl.pallas_call(
        kernel,
        out_shape=jax.ShapeDtypeStruct((k, dd, n), x.dtype),
        grid_spec=pltpu.PrefetchScalarGridSpec(
            num_scalar_prefetch=0,
            grid=(n // nt,),
            in_specs=[
                pl.BlockSpec((k, dd, nt), lambda i: (0, 0, i)),
                pl.BlockSpec((m, k, dd, nt), lambda i: (0, 0, 0, i)),
            ],
            out_specs=pl.BlockSpec((k, dd, nt), lambda i: (0, 0, i)),
        ),
        compiler_params=pltpu.CompilerParams(
            dimension_semantics=("parallel",),
            vmem_limit_bytes=vmem_limit,
        ),
    )(xn_t, z_t)

    return jnp.transpose(out, (2, 0, 1)).reshape(n, d)


def routing_layer_ref(x, neighbors, max_iter, *, dim, num_caps):
    """Pure-JAX reference mirroring the PyTorch forward exactly."""
    n = x.shape[0]
    m = neighbors.shape[0] // n
    d, k = dim, num_caps
    dd = d // k

    def _norm(v, axis):
        nrm = jnp.sqrt(jnp.sum(v * v, axis=axis, keepdims=True))
        return v / jnp.maximum(nrm, _EPS)

    x = _norm(x.reshape(n, k, dd), axis=2).reshape(n, d)
    z = jnp.concatenate([x, jnp.zeros((1, d), x.dtype)], axis=0)
    z = z[neighbors].reshape(n, m, k, dd)
    u = None
    for clus_iter in range(max_iter):
        if u is None:
            p = jnp.zeros((n, m, k), x.dtype)
        else:
            p = jnp.sum(z * u.reshape(n, 1, k, dd), axis=3)
        p = jax.nn.softmax(p, axis=2)
        u = jnp.sum(z * p.reshape(n, m, k, 1), axis=1)
        u = u + x.reshape(n, k, dd)
        if clus_iter < max_iter - 1:
            u = _norm(u, axis=2)
    return u.reshape(n, d)


if __name__ == "__main__":
    # Small but tiling-exercising shapes: n=1024 nodes -> node tile nt=512
    # (two grid steps, so both v7x TensorCores get work), lane chunk 256.
    n, m = 1024, 8          # nodes, neighbors per node
    dim, num_caps = 32, 4   # d, k -> delta_d = 8
    max_iter = 3

    key = jax.random.PRNGKey(0)
    kx, kn = jax.random.split(key)
    x = jax.random.normal(kx, (n, dim), dtype=jnp.float32)
    # Values in [0, n]; index n hits the cached zero row (padding neighbor).
    neighbors = jax.random.randint(kn, (n * m,), 0, n + 1, dtype=jnp.int32)

    out = routing_layer(x, neighbors, max_iter, dim=dim, num_caps=num_caps)
    out = jax.block_until_ready(out)

    ref = routing_layer_ref(x, neighbors, max_iter, dim=dim, num_caps=num_caps)
    assert out.shape == (n, dim)
    # f32 compute with exact softmax reciprocal; remaining drift is only from
    # summation order and EUP exp/rsqrt rounding.
    assert jnp.allclose(out, ref, rtol=1e-3, atol=1e-3), "mismatch vs reference"

    print("KERNEL_OK")
</pallas_src>

<mosaic_0001>
module attributes {stable_mosaic.version = 11 : i64} {
  func.func @_routing_kernel(%arg0: i32, %arg1: memref<4x8x512xf32, #tpu.memory_space<vmem>>, %arg2: memref<8x4x8x512xf32, #tpu.memory_space<vmem>>, %arg3: memref<4x8x512xf32, #tpu.memory_space<vmem>>) attributes {dimension_semantics = [#tpu.dimension_semantics<parallel>], iteration_bounds = array<i64: 2>, scalar_prefetch = 0 : i64, scratch_operands = 0 : i64, tpu.core_type = #tpu.core_type<tc>, window_params = [{transform_indices = @transform_0, window_bounds = array<i64: 4, 8, 512>}, {transform_indices = @transform_1, window_bounds = array<i64: 8, 4, 8, 512>}, {transform_indices = @transform_2, window_bounds = array<i64: 4, 8, 512>}]} {
    %c0_i32 = arith.constant 0 : i32
    %c2_i32 = arith.constant 2 : i32
    %0 = arith.addi %c0_i32, %c2_i32 : i32
    %c1_i32 = arith.constant 1 : i32
    scf.for %arg4 = %c0_i32 to %0 step %c1_i32  : i32 {
      %c1_i32_1 = arith.constant 1 : i32
      %1 = arith.muli %arg4, %c1_i32_1 : i32
      %c0_i32_2 = arith.constant 0 : i32
      %2 = arith.addi %c0_i32_2, %1 : i32
      %c256_i32 = arith.constant 256 : i32
      %3 = arith.muli %2, %c256_i32 : i32
      %4 = tpu.assume_multiple %3, 128 : i32
      %c0 = arith.constant 0 : index
      %c0_3 = arith.constant 0 : index
      %c0_4 = arith.constant 0 : index
      %5 = arith.index_cast %4 : i32 to index
      %6 = vector.load %arg2[%c0, %c0_3, %c0_4, %5] : memref<8x4x8x512xf32, #tpu.memory_space<vmem>>, vector<1x4x8x256xf32>
      %7 = vector.shape_cast %6 : vector<1x4x8x256xf32> to vector<4x8x256xf32>
      %c1 = arith.constant 1 : index
      %c0_5 = arith.constant 0 : index
      %c0_6 = arith.constant 0 : index
      %8 = arith.index_cast %4 : i32 to index
      %9 = vector.load %arg2[%c1, %c0_5, %c0_6, %8] : memref<8x4x8x512xf32, #tpu.memory_space<vmem>>, vector<1x4x8x256xf32>
      %10 = vector.shape_cast %9 : vector<1x4x8x256xf32> to vector<4x8x256xf32>
      %11 = arith.addf %7, %10 : vector<4x8x256xf32>
      %c2 = arith.constant 2 : index
      %c0_7 = arith.constant 0 : index
      %c0_8 = arith.constant 0 : index
      %12 = arith.index_cast %4 : i32 to index
      %13 = vector.load %arg2[%c2, %c0_7, %c0_8, %12] : memref<8x4x8x512xf32, #tpu.memory_space<vmem>>, vector<1x4x8x256xf32>
      %14 = vector.shape_cast %13 : vector<1x4x8x256xf32> to vector<4x8x256xf32>
      %15 = arith.addf %11, %14 : vector<4x8x256xf32>
      %c3 = arith.constant 3 : index
      %c0_9 = arith.constant 0 : index
      %c0_10 = arith.constant 0 : index
      %16 = arith.index_cast %4 : i32 to index
      %17 = vector.load %arg2[%c3, %c0_9, %c0_10, %16] : memref<8x4x8x512xf32, #tpu.memory_space<vmem>>, vector<1x4x8x256xf32>
      %18 = vector.shape_cast %17 : vector<1x4x8x256xf32> to vector<4x8x256xf32>
      %19 = arith.addf %15, %18 : vector<4x8x256xf32>
      %c4 = arith.constant 4 : index
      %c0_11 = arith.constant 0 : index
      %c0_12 = arith.constant 0 : index
      %20 = arith.index_cast %4 : i32 to index
      %21 = vector.load %arg2[%c4, %c0_11, %c0_12, %20] : memref<8x4x8x512xf32, #tpu.memory_space<vmem>>, vector<1x4x8x256xf32>
      %22 = vector.shape_cast %21 : vector<1x4x8x256xf32> to vector<4x8x256xf32>
      %23 = arith.addf %19, %22 : vector<4x8x256xf32>
      %c5 = arith.constant 5 : index
      %c0_13 = arith.constant 0 : index
      %c0_14 = arith.constant 0 : index
      %24 = arith.index_cast %4 : i32 to index
      %25 = vector.load %arg2[%c5, %c0_13, %c0_14, %24] : memref<8x4x8x512xf32, #tpu.memory_space<vmem>>, vector<1x4x8x256xf32>
      %26 = vector.shape_cast %25 : vector<1x4x8x256xf32> to vector<4x8x256xf32>
      %27 = arith.addf %23, %26 : vector<4x8x256xf32>
      %c6 = arith.constant 6 : index
      %c0_15 = arith.constant 0 : index
      %c0_16 = arith.constant 0 : index
      %28 = arith.index_cast %4 : i32 to index
      %29 = vector.load %arg2[%c6, %c0_15, %c0_16, %28] : memref<8x4x8x512xf32, #tpu.memory_space<vmem>>, vector<1x4x8x256xf32>
      %30 = vector.shape_cast %29 : vector<1x4x8x256xf32> to vector<4x8x256xf32>
      %31 = arith.addf %27, %30 : vector<4x8x256xf32>
      %c7 = arith.constant 7 : index
      %c0_17 = arith.constant 0 : index
      %c0_18 = arith.constant 0 : index
      %32 = arith.index_cast %4 : i32 to index
      %33 = vector.load %arg2[%c7, %c0_17, %c0_18, %32] : memref<8x4x8x512xf32, #tpu.memory_space<vmem>>, vector<1x4x8x256xf32>
      %34 = vector.shape_cast %33 : vector<1x4x8x256xf32> to vector<4x8x256xf32>
      %35 = arith.addf %31, %34 : vector<4x8x256xf32>
      %cst = arith.constant 2.500000e-01 : f32
      %36 = vector.broadcast %cst : f32 to vector<4x8x256xf32>
      %37 = arith.mulf %35, %36 : vector<4x8x256xf32>
      %c0_19 = arith.constant 0 : index
      %c0_20 = arith.constant 0 : index
      %38 = arith.index_cast %4 : i32 to index
      %39 = vector.load %arg1[%c0_19, %c0_20, %38] : memref<4x8x512xf32, #tpu.memory_space<vmem>>, vector<4x8x256xf32>
      %40 = arith.addf %37, %39 : vector<4x8x256xf32>
      %41 = arith.mulf %40, %40 : vector<4x8x256xf32>
      %cst_21 = arith.constant dense<0.000000e+00> : vector<4x256xf32>
      %42 = vector.multi_reduction <add>, %41, %cst_21 [1] : vector<4x8x256xf32> to vector<4x256xf32>
      %43 = vector.shape_cast %42 : vector<4x256xf32> to vector<4x1x256xf32>
      %cst_22 = arith.constant 1.000000e-24 : f32
      %44 = vector.broadcast %cst_22 : f32 to vector<4x1x256xf32>
      %45 = arith.maximumf %43, %44 : vector<4x1x256xf32>
      %46 = math.rsqrt %45 : vector<4x1x256xf32>
      %47 = vector.broadcast %46 : vector<4x1x256xf32> to vector<4x8x256xf32>
      %48 = arith.mulf %40, %47 : vector<4x8x256xf32>
      %c0_23 = arith.constant 0 : index
      %c0_24 = arith.constant 0 : index
      %49 = arith.index_cast %4 : i32 to index
      %50 = vector.load %arg1[%c0_23, %c0_24, %49] : memref<4x8x512xf32, #tpu.memory_space<vmem>>, vector<4x8x256xf32>
      %c0_25 = arith.constant 0 : index
      %c0_26 = arith.constant 0 : index
      %c0_27 = arith.constant 0 : index
      %51 = arith.index_cast %4 : i32 to index
      %52 = vector.load %arg2[%c0_25, %c0_26, %c0_27, %51] : memref<8x4x8x512xf32, #tpu.memory_space<vmem>>, vector<1x4x8x256xf32>
      %53 = vector.shape_cast %52 : vector<1x4x8x256xf32> to vector<4x8x256xf32>
      %54 = arith.mulf %53, %48 : vector<4x8x256xf32>
      %cst_28 = arith.constant dense<0.000000e+00> : vector<4x256xf32>
      %55 = vector.multi_reduction <add>, %54, %cst_28 [1] : vector<4x8x256xf32> to vector<4x256xf32>
      %56 = vector.shape_cast %55 : vector<4x256xf32> to vector<4x1x256xf32>
      %57 = math.exp %56 : vector<4x1x256xf32>
      %cst_29 = arith.constant dense<0.000000e+00> : vector<1x256xf32>
      %58 = vector.multi_reduction <add>, %57, %cst_29 [0] : vector<4x1x256xf32> to vector<1x256xf32>
      %59 = vector.shape_cast %58 : vector<1x256xf32> to vector<1x1x256xf32>
      %60 = tpu.reciprocal %59 : vector<1x1x256xf32> -> vector<1x1x256xf32>
      %61 = vector.broadcast %60 : vector<1x1x256xf32> to vector<4x1x256xf32>
      %62 = arith.mulf %57, %61 : vector<4x1x256xf32>
      %63 = vector.broadcast %62 : vector<4x1x256xf32> to vector<4x8x256xf32>
      %64 = arith.mulf %53, %63 : vector<4x8x256xf32>
      %65 = arith.addf %50, %64 : vector<4x8x256xf32>
      %c1_30 = arith.constant 1 : index
      %c0_31 = arith.constant 0 : index
      %c0_32 = arith.constant 0 : index
      %66 = arith.index_cast %4 : i32 to index
      %67 = vector.load %arg2[%c1_30, %c0_31, %c0_32, %66] : memref<8x4x8x512xf32, #tpu.memory_space<vmem>>, vector<1x4x8x256xf32>
      %68 = vector.shape_cast %67 : vector<1x4x8x256xf32> to vector<4x8x256xf32>
      %69 = arith.mulf %68, %48 : vector<4x8x256xf32>
      %cst_33 = arith.constant dense<0.000000e+00> : vector<4x256xf32>
      %70 = vector.multi_reduction <add>, %69, %cst_33 [1] : vector<4x8x256xf32> to vector<4x256xf32>
      %71 = vector.shape_cast %70 : vector<4x256xf32> to vector<4x1x256xf32>
      %72 = math.exp %71 : vector<4x1x256xf32>
      %cst_34 = arith.constant dense<0.000000e+00> : vector<1x256xf32>
      %73 = vector.multi_reduction <add>, %72, %cst_34 [0] : vector<4x1x256xf32> to vector<1x256xf32>
      %74 = vector.shape_cast %73 : vector<1x256xf32> to vector<1x1x256xf32>
      %75 = tpu.reciprocal %74 : vector<1x1x256xf32> -> vector<1x1x256xf32>
      %76 = vector.broadcast %75 : vector<1x1x256xf32> to vector<4x1x256xf32>
      %77 = arith.mulf %72, %76 : vector<4x1x256xf32>
      %78 = vector.broadcast %77 : vector<4x1x256xf32> to vector<4x8x256xf32>
      %79 = arith.mulf %68, %78 : vector<4x8x256xf32>
      %80 = arith.addf %65, %79 : vector<4x8x256xf32>
      %c2_35 = arith.constant 2 : index
      %c0_36 = arith.constant 0 : index
      %c0_37 = arith.constant 0 : index
      %81 = arith.index_cast %4 : i32 to index
      %82 = vector.load %arg2[%c2_35, %c0_36, %c0_37, %81] : memref<8x4x8x512xf32, #tpu.memory_space<vmem>>, vector<1x4x8x256xf32>
      %83 = vector.shape_cast %82 : vector<1x4x8x256xf32> to vector<4x8x256xf32>
      %84 = arith.mulf %83, %48 : vector<4x8x256xf32>
      %cst_38 = arith.constant dense<0.000000e+00> : vector<4x256xf32>
      %85 = vector.multi_reduction <add>, %84, %cst_38 [1] : vector<4x8x256xf32> to vector<4x256xf32>
      %86 = vector.shape_cast %85 : vector<4x256xf32> to vector<4x1x256xf32>
      %87 = math.exp %86 : vector<4x1x256xf32>
      %cst_39 = arith.constant dense<0.000000e+00> : vector<1x256xf32>
      %88 = vector.multi_reduction <add>, %87, %cst_39 [0] : vector<4x1x256xf32> to vector<1x256xf32>
      %89 = vector.shape_cast %88 : vector<1x256xf32> to vector<1x1x256xf32>
      %90 = tpu.reciprocal %89 : vector<1x1x256xf32> -> vector<1x1x256xf32>
      %91 = vector.broadcast %90 : vector<1x1x256xf32> to vector<4x1x256xf32>
      %92 = arith.mulf %87, %91 : vector<4x1x256xf32>
      %93 = vector.broadcast %92 : vector<4x1x256xf32> to vector<4x8x256xf32>
      %94 = arith.mulf %83, %93 : vector<4x8x256xf32>
      %95 = arith.addf %80, %94 : vector<4x8x256xf32>
      %c3_40 = arith.constant 3 : index
      %c0_41 = arith.constant 0 : index
      %c0_42 = arith.constant 0 : index
      %96 = arith.index_cast %4 : i32 to index
      %97 = vector.load %arg2[%c3_40, %c0_41, %c0_42, %96] : memref<8x4x8x512xf32, #tpu.memory_space<vmem>>, vector<1x4x8x256xf32>
      %98 = vector.shape_cast %97 : vector<1x4x8x256xf32> to vector<4x8x256xf32>
      %99 = arith.mulf %98, %48 : vector<4x8x256xf32>
      %cst_43 = arith.constant dense<0.000000e+00> : vector<4x256xf32>
      %100 = vector.multi_reduction <add>, %99, %cst_43 [1] : vector<4x8x256xf32> to vector<4x256xf32>
      %101 = vector.shape_cast %100 : vector<4x256xf32> to vector<4x1x256xf32>
      %102 = math.exp %101 : vector<4x1x256xf32>
      %cst_44 = arith.constant dense<0.000000e+00> : vector<1x256xf32>
      %103 = vector.multi_reduction <add>, %102, %cst_44 [0] : vector<4x1x256xf32> to vector<1x256xf32>
      %104 = vector.shape_cast %103 : vector<1x256xf32> to vector<1x1x256xf32>
      %105 = tpu.reciprocal %104 : vector<1x1x256xf32> -> vector<1x1x256xf32>
      %106 = vector.broadcast %105 : vector<1x1x256xf32> to vector<4x1x256xf32>
      %107 = arith.mulf %102, %106 : vector<4x1x256xf32>
      %108 = vector.broadcast %107 : vector<4x1x256xf32> to vector<4x8x256xf32>
      %109 = arith.mulf %98, %108 : vector<4x8x256xf32>
      %110 = arith.addf %95, %109 : vector<4x8x256xf32>
      %c4_45 = arith.constant 4 : index
      %c0_46 = arith.constant 0 : index
      %c0_47 = arith.constant 0 : index
      %111 = arith.index_cast %4 : i32 to index
      %112 = vector.load %arg2[%c4_45, %c0_46, %c0_47, %111] : memref<8x4x8x512xf32, #tpu.memory_space<vmem>>, vector<1x4x8x256xf32>
      %113 = vector.shape_cast %112 : vector<1x4x8x256xf32> to vector<4x8x256xf32>
      %114 = arith.mulf %113, %48 : vector<4x8x256xf32>
      %cst_48 = arith.constant dense<0.000000e+00> : vector<4x256xf32>
      %115 = vector.multi_reduction <add>, %114, %cst_48 [1] : vector<4x8x256xf32> to vector<4x256xf32>
      %116 = vector.shape_cast %115 : vector<4x256xf32> to vector<4x1x256xf32>
      %117 = math.exp %116 : vector<4x1x256xf32>
      %cst_49 = arith.constant dense<0.000000e+00> : vector<1x256xf32>
      %118 = vector.multi_reduction <add>, %117, %cst_49 [0] : vector<4x1x256xf32> to vector<1x256xf32>
      %119 = vector.shape_cast %118 : vector<1x256xf32> to vector<1x1x256xf32>
      %120 = tpu.reciprocal %119 : vector<1x1x256xf32> -> vector<1x1x256xf32>
      %121 = vector.broadcast %120 : vector<1x1x256xf32> to vector<4x1x256xf32>
      %122 = arith.mulf %117, %121 : vector<4x1x256xf32>
      %123 = vector.broadcast %122 : vector<4x1x256xf32> to vector<4x8x256xf32>
      %124 = arith.mulf %113, %123 : vector<4x8x256xf32>
      %125 = arith.addf %110, %124 : vector<4x8x256xf32>
      %c5_50 = arith.constant 5 : index
      %c0_51 = arith.constant 0 : index
      %c0_52 = arith.constant 0 : index
      %126 = arith.index_cast %4 : i32 to index
      %127 = vector.load %arg2[%c5_50, %c0_51, %c0_52, %126] : memref<8x4x8x512xf32, #tpu.memory_space<vmem>>, vector<1x4x8x256xf32>
      %128 = vector.shape_cast %127 : vector<1x4x8x256xf32> to vector<4x8x256xf32>
      %129 = arith.mulf %128, %48 : vector<4x8x256xf32>
      %cst_53 = arith.constant dense<0.000000e+00> : vector<4x256xf32>
      %130 = vector.multi_reduction <add>, %129, %cst_53 [1] : vector<4x8x256xf32> to vector<4x256xf32>
      %131 = vector.shape_cast %130 : vector<4x256xf32> to vector<4x1x256xf32>
      %132 = math.exp %131 : vector<4x1x256xf32>
      %cst_54 = arith.constant dense<0.000000e+00> : vector<1x256xf32>
      %133 = vector.multi_reduction <add>, %132, %cst_54 [0] : vector<4x1x256xf32> to vector<1x256xf32>
      %134 = vector.shape_cast %133 : vector<1x256xf32> to vector<1x1x256xf32>
      %135 = tpu.reciprocal %134 : vector<1x1x256xf32> -> vector<1x1x256xf32>
      %136 = vector.broadcast %135 : vector<1x1x256xf32> to vector<4x1x256xf32>
      %137 = arith.mulf %132, %136 : vector<4x1x256xf32>
      %138 = vector.broadcast %137 : vector<4x1x256xf32> to vector<4x8x256xf32>
      %139 = arith.mulf %128, %138 : vector<4x8x256xf32>
      %140 = arith.addf %125, %139 : vector<4x8x256xf32>
      %c6_55 = arith.constant 6 : index
      %c0_56 = arith.constant 0 : index
      %c0_57 = arith.constant 0 : index
      %141 = arith.index_cast %4 : i32 to index
      %142 = vector.load %arg2[%c6_55, %c0_56, %c0_57, %141] : memref<8x4x8x512xf32, #tpu.memory_space<vmem>>, vector<1x4x8x256xf32>
      %143 = vector.shape_cast %142 : vector<1x4x8x256xf32> to vector<4x8x256xf32>
      %144 = arith.mulf %143, %48 : vector<4x8x256xf32>
      %cst_58 = arith.constant dense<0.000000e+00> : vector<4x256xf32>
      %145 = vector.multi_reduction <add>, %144, %cst_58 [1] : vector<4x8x256xf32> to vector<4x256xf32>
      %146 = vector.shape_cast %145 : vector<4x256xf32> to vector<4x1x256xf32>
      %147 = math.exp %146 : vector<4x1x256xf32>
      %cst_59 = arith.constant dense<0.000000e+00> : vector<1x256xf32>
      %148 = vector.multi_reduction <add>, %147, %cst_59 [0] : vector<4x1x256xf32> to vector<1x256xf32>
      %149 = vector.shape_cast %148 : vector<1x256xf32> to vector<1x1x256xf32>
      %150 = tpu.reciprocal %149 : vector<1x1x256xf32> -> vector<1x1x256xf32>
      %151 = vector.broadcast %150 : vector<1x1x256xf32> to vector<4x1x256xf32>
      %152 = arith.mulf %147, %151 : vector<4x1x256xf32>
      %153 = vector.broadcast %152 : vector<4x1x256xf32> to vector<4x8x256xf32>
      %154 = arith.mulf %143, %153 : vector<4x8x256xf32>
      %155 = arith.addf %140, %154 : vector<4x8x256xf32>
      %c7_60 = arith.constant 7 : index
      %c0_61 = arith.constant 0 : index
      %c0_62 = arith.constant 0 : index
      %156 = arith.index_cast %4 : i32 to index
      %157 = vector.load %arg2[%c7_60, %c0_61, %c0_62, %156] : memref<8x4x8x512xf32, #tpu.memory_space<vmem>>, vector<1x4x8x256xf32>
      %158 = vector.shape_cast %157 : vector<1x4x8x256xf32> to vector<4x8x256xf32>
      %159 = arith.mulf %158, %48 : vector<4x8x256xf32>
      %cst_63 = arith.constant dense<0.000000e+00> : vector<4x256xf32>
      %160 = vector.multi_reduction <add>, %159, %cst_63 [1] : vector<4x8x256xf32> to vector<4x256xf32>
      %161 = vector.shape_cast %160 : vector<4x256xf32> to vector<4x1x256xf32>
      %162 = math.exp %161 : vector<4x1x256xf32>
      %cst_64 = arith.constant dense<0.000000e+00> : vector<1x256xf32>
      %163 = vector.multi_reduction <add>, %162, %cst_64 [0] : vector<4x1x256xf32> to vector<1x256xf32>
      %164 = vector.shape_cast %163 : vector<1x256xf32> to vector<1x1x256xf32>
      %165 = tpu.reciprocal %164 : vector<1x1x256xf32> -> vector<1x1x256xf32>
      %166 = vector.broadcast %165 : vector<1x1x256xf32> to vector<4x1x256xf32>
      %167 = arith.mulf %162, %166 : vector<4x1x256xf32>
      %168 = vector.broadcast %167 : vector<4x1x256xf32> to vector<4x8x256xf32>
      %169 = arith.mulf %158, %168 : vector<4x8x256xf32>
      %170 = arith.addf %155, %169 : vector<4x8x256xf32>
      %171 = arith.mulf %170, %170 : vector<4x8x256xf32>
      %cst_65 = arith.constant dense<0.000000e+00> : vector<4x256xf32>
      %172 = vector.multi_reduction <add>, %171, %cst_65 [1] : vector<4x8x256xf32> to vector<4x256xf32>
      %173 = vector.shape_cast %172 : vector<4x256xf32> to vector<4x1x256xf32>
      %cst_66 = arith.constant 1.000000e-24 : f32
      %174 = vector.broadcast %cst_66 : f32 to vector<4x1x256xf32>
      %175 = arith.maximumf %173, %174 : vector<4x1x256xf32>
      %176 = math.rsqrt %175 : vector<4x1x256xf32>
      %177 = vector.broadcast %176 : vector<4x1x256xf32> to vector<4x8x256xf32>
      %178 = arith.mulf %170, %177 : vector<4x8x256xf32>
      %c0_67 = arith.constant 0 : index
      %c0_68 = arith.constant 0 : index
      %179 = arith.index_cast %4 : i32 to index
      %180 = vector.load %arg1[%c0_67, %c0_68, %179] : memref<4x8x512xf32, #tpu.memory_space<vmem>>, vector<4x8x256xf32>
      %c0_69 = arith.constant 0 : index
      %c0_70 = arith.constant 0 : index
      %c0_71 = arith.constant 0 : index
      %181 = arith.index_cast %4 : i32 to index
      %182 = vector.load %arg2[%c0_69, %c0_70, %c0_71, %181] : memref<8x4x8x512xf32, #tpu.memory_space<vmem>>, vector<1x4x8x256xf32>
      %183 = vector.shape_cast %182 : vector<1x4x8x256xf32> to vector<4x8x256xf32>
      %184 = arith.mulf %183, %178 : vector<4x8x256xf32>
      %cst_72 = arith.constant dense<0.000000e+00> : vector<4x256xf32>
      %185 = vector.multi_reduction <add>, %184, %cst_72 [1] : vector<4x8x256xf32> to vector<4x256xf32>
      %186 = vector.shape_cast %185 : vector<4x256xf32> to vector<4x1x256xf32>
      %187 = math.exp %186 : vector<4x1x256xf32>
      %cst_73 = arith.constant dense<0.000000e+00> : vector<1x256xf32>
      %188 = vector.multi_reduction <add>, %187, %cst_73 [0] : vector<4x1x256xf32> to vector<1x256xf32>
      %189 = vector.shape_cast %188 : vector<1x256xf32> to vector<1x1x256xf32>
      %190 = tpu.reciprocal %189 : vector<1x1x256xf32> -> vector<1x1x256xf32>
      %191 = vector.broadcast %190 : vector<1x1x256xf32> to vector<4x1x256xf32>
      %192 = arith.mulf %187, %191 : vector<4x1x256xf32>
      %193 = vector.broadcast %192 : vector<4x1x256xf32> to vector<4x8x256xf32>
      %194 = arith.mulf %183, %193 : vector<4x8x256xf32>
      %195 = arith.addf %180, %194 : vector<4x8x256xf32>
      %c1_74 = arith.constant 1 : index
      %c0_75 = arith.constant 0 : index
      %c0_76 = arith.constant 0 : index
      %196 = arith.index_cast %4 : i32 to index
      %197 = vector.load %arg2[%c1_74, %c0_75, %c0_76, %196] : memref<8x4x8x512xf32, #tpu.memory_space<vmem>>, vector<1x4x8x256xf32>
      %198 = vector.shape_cast %197 : vector<1x4x8x256xf32> to vector<4x8x256xf32>
      %199 = arith.mulf %198, %178 : vector<4x8x256xf32>
      %cst_77 = arith.constant dense<0.000000e+00> : vector<4x256xf32>
      %200 = vector.multi_reduction <add>, %199, %cst_77 [1] : vector<4x8x256xf32> to vector<4x256xf32>
      %201 = vector.shape_cast %200 : vector<4x256xf32> to vector<4x1x256xf32>
      %202 = math.exp %201 : vector<4x1x256xf32>
      %cst_78 = arith.constant dense<0.000000e+00> : vector<1x256xf32>
      %203 = vector.multi_reduction <add>, %202, %cst_78 [0] : vector<4x1x256xf32> to vector<1x256xf32>
      %204 = vector.shape_cast %203 : vector<1x256xf32> to vector<1x1x256xf32>
      %205 = tpu.reciprocal %204 : vector<1x1x256xf32> -> vector<1x1x256xf32>
      %206 = vector.broadcast %205 : vector<1x1x256xf32> to vector<4x1x256xf32>
      %207 = arith.mulf %202, %206 : vector<4x1x256xf32>
      %208 = vector.broadcast %207 : vector<4x1x256xf32> to vector<4x8x256xf32>
      %209 = arith.mulf %198, %208 : vector<4x8x256xf32>
      %210 = arith.addf %195, %209 : vector<4x8x256xf32>
      %c2_79 = arith.constant 2 : index
      %c0_80 = arith.constant 0 : index
      %c0_81 = arith.constant 0 : index
      %211 = arith.index_cast %4 : i32 to index
      %212 = vector.load %arg2[%c2_79, %c0_80, %c0_81, %211] : memref<8x4x8x512xf32, #tpu.memory_space<vmem>>, vector<1x4x8x256xf32>
      %213 = vector.shape_cast %212 : vector<1x4x8x256xf32> to vector<4x8x256xf32>
      %214 = arith.mulf %213, %178 : vector<4x8x256xf32>
      %cst_82 = arith.constant dense<0.000000e+00> : vector<4x256xf32>
      %215 = vector.multi_reduction <add>, %214, %cst_82 [1] : vector<4x8x256xf32> to vector<4x256xf32>
      %216 = vector.shape_cast %215 : vector<4x256xf32> to vector<4x1x256xf32>
      %217 = math.exp %216 : vector<4x1x256xf32>
      %cst_83 = arith.constant dense<0.000000e+00> : vector<1x256xf32>
      %218 = vector.multi_reduction <add>, %217, %cst_83 [0] : vector<4x1x256xf32> to vector<1x256xf32>
      %219 = vector.shape_cast %218 : vector<1x256xf32> to vector<1x1x256xf32>
      %220 = tpu.reciprocal %219 : vector<1x1x256xf32> -> vector<1x1x256xf32>
      %221 = vector.broadcast %220 : vector<1x1x256xf32> to vector<4x1x256xf32>
      %222 = arith.mulf %217, %221 : vector<4x1x256xf32>
      %223 = vector.broadcast %222 : vector<4x1x256xf32> to vector<4x8x256xf32>
      %224 = arith.mulf %213, %223 : vector<4x8x256xf32>
      %225 = arith.addf %210, %224 : vector<4x8x256xf32>
      %c3_84 = arith.constant 3 : index
      %c0_85 = arith.constant 0 : index
      %c0_86 = arith.constant 0 : index
      %226 = arith.index_cast %4 : i32 to index
      %227 = vector.load %arg2[%c3_84, %c0_85, %c0_86, %226] : memref<8x4x8x512xf32, #tpu.memory_space<vmem>>, vector<1x4x8x256xf32>
      %228 = vector.shape_cast %227 : vector<1x4x8x256xf32> to vector<4x8x256xf32>
      %229 = arith.mulf %228, %178 : vector<4x8x256xf32>
      %cst_87 = arith.constant dense<0.000000e+00> : vector<4x256xf32>
      %230 = vector.multi_reduction <add>, %229, %cst_87 [1] : vector<4x8x256xf32> to vector<4x256xf32>
      %231 = vector.shape_cast %230 : vector<4x256xf32> to vector<4x1x256xf32>
      %232 = math.exp %231 : vector<4x1x256xf32>
      %cst_88 = arith.constant dense<0.000000e+00> : vector<1x256xf32>
      %233 = vector.multi_reduction <add>, %232, %cst_88 [0] : vector<4x1x256xf32> to vector<1x256xf32>
      %234 = vector.shape_cast %233 : vector<1x256xf32> to vector<1x1x256xf32>
      %235 = tpu.reciprocal %234 : vector<1x1x256xf32> -> vector<1x1x256xf32>
      %236 = vector.broadcast %235 : vector<1x1x256xf32> to vector<4x1x256xf32>
      %237 = arith.mulf %232, %236 : vector<4x1x256xf32>
      %238 = vector.broadcast %237 : vector<4x1x256xf32> to vector<4x8x256xf32>
      %239 = arith.mulf %228, %238 : vector<4x8x256xf32>
      %240 = arith.addf %225, %239 : vector<4x8x256xf32>
      %c4_89 = arith.constant 4 : index
      %c0_90 = arith.constant 0 : index
      %c0_91 = arith.constant 0 : index
      %241 = arith.index_cast %4 : i32 to index
      %242 = vector.load %arg2[%c4_89, %c0_90, %c0_91, %241] : memref<8x4x8x512xf32, #tpu.memory_space<vmem>>, vector<1x4x8x256xf32>
      %243 = vector.shape_cast %242 : vector<1x4x8x256xf32> to vector<4x8x256xf32>
      %244 = arith.mulf %243, %178 : vector<4x8x256xf32>
      %cst_92 = arith.constant dense<0.000000e+00> : vector<4x256xf32>
      %245 = vector.multi_reduction <add>, %244, %cst_92 [1] : vector<4x8x256xf32> to vector<4x256xf32>
      %246 = vector.shape_cast %245 : vector<4x256xf32> to vector<4x1x256xf32>
      %247 = math.exp %246 : vector<4x1x256xf32>
      %cst_93 = arith.constant dense<0.000000e+00> : vector<1x256xf32>
      %248 = vector.multi_reduction <add>, %247, %cst_93 [0] : vector<4x1x256xf32> to vector<1x256xf32>
      %249 = vector.shape_cast %248 : vector<1x256xf32> to vector<1x1x256xf32>
      %250 = tpu.reciprocal %249 : vector<1x1x256xf32> -> vector<1x1x256xf32>
      %251 = vector.broadcast %250 : vector<1x1x256xf32> to vector<4x1x256xf32>
      %252 = arith.mulf %247, %251 : vector<4x1x256xf32>
      %253 = vector.broadcast %252 : vector<4x1x256xf32> to vector<4x8x256xf32>
      %254 = arith.mulf %243, %253 : vector<4x8x256xf32>
      %255 = arith.addf %240, %254 : vector<4x8x256xf32>
      %c5_94 = arith.constant 5 : index
      %c0_95 = arith.constant 0 : index
      %c0_96 = arith.constant 0 : index
      %256 = arith.index_cast %4 : i32 to index
      %257 = vector.load %arg2[%c5_94, %c0_95, %c0_96, %256] : memref<8x4x8x512xf32, #tpu.memory_space<vmem>>, vector<1x4x8x256xf32>
      %258 = vector.shape_cast %257 : vector<1x4x8x256xf32> to vector<4x8x256xf32>
      %259 = arith.mulf %258, %178 : vector<4x8x256xf32>
      %cst_97 = arith.constant dense<0.000000e+00> : vector<4x256xf32>
      %260 = vector.multi_reduction <add>, %259, %cst_97 [1] : vector<4x8x256xf32> to vector<4x256xf32>
      %261 = vector.shape_cast %260 : vector<4x256xf32> to vector<4x1x256xf32>
      %262 = math.exp %261 : vector<4x1x256xf32>
      %cst_98 = arith.constant dense<0.000000e+00> : vector<1x256xf32>
      %263 = vector.multi_reduction <add>, %262, %cst_98 [0] : vector<4x1x256xf32> to vector<1x256xf32>
      %264 = vector.shape_cast %263 : vector<1x256xf32> to vector<1x1x256xf32>
      %265 = tpu.reciprocal %264 : vector<1x1x256xf32> -> vector<1x1x256xf32>
      %266 = vector.broadcast %265 : vector<1x1x256xf32> to vector<4x1x256xf32>
      %267 = arith.mulf %262, %266 : vector<4x1x256xf32>
      %268 = vector.broadcast %267 : vector<4x1x256xf32> to vector<4x8x256xf32>
      %269 = arith.mulf %258, %268 : vector<4x8x256xf32>
      %270 = arith.addf %255, %269 : vector<4x8x256xf32>
      %c6_99 = arith.constant 6 : index
      %c0_100 = arith.constant 0 : index
      %c0_101 = arith.constant 0 : index
      %271 = arith.index_cast %4 : i32 to index
      %272 = vector.load %arg2[%c6_99, %c0_100, %c0_101, %271] : memref<8x4x8x512xf32, #tpu.memory_space<vmem>>, vector<1x4x8x256xf32>
      %273 = vector.shape_cast %272 : vector<1x4x8x256xf32> to vector<4x8x256xf32>
      %274 = arith.mulf %273, %178 : vector<4x8x256xf32>
      %cst_102 = arith.constant dense<0.000000e+00> : vector<4x256xf32>
      %275 = vector.multi_reduction <add>, %274, %cst_102 [1] : vector<4x8x256xf32> to vector<4x256xf32>
      %276 = vector.shape_cast %275 : vector<4x256xf32> to vector<4x1x256xf32>
      %277 = math.exp %276 : vector<4x1x256xf32>
      %cst_103 = arith.constant dense<0.000000e+00> : vector<1x256xf32>
      %278 = vector.multi_reduction <add>, %277, %cst_103 [0] : vector<4x1x256xf32> to vector<1x256xf32>
      %279 = vector.shape_cast %278 : vector<1x256xf32> to vector<1x1x256xf32>
      %280 = tpu.reciprocal %279 : vector<1x1x256xf32> -> vector<1x1x256xf32>
      %281 = vector.broadcast %280 : vector<1x1x256xf32> to vector<4x1x256xf32>
      %282 = arith.mulf %277, %281 : vector<4x1x256xf32>
      %283 = vector.broadcast %282 : vector<4x1x256xf32> to vector<4x8x256xf32>
      %284 = arith.mulf %273, %283 : vector<4x8x256xf32>
      %285 = arith.addf %270, %284 : vector<4x8x256xf32>
      %c7_104 = arith.constant 7 : index
      %c0_105 = arith.constant 0 : index
      %c0_106 = arith.constant 0 : index
      %286 = arith.index_cast %4 : i32 to index
      %287 = vector.load %arg2[%c7_104, %c0_105, %c0_106, %286] : memref<8x4x8x512xf32, #tpu.memory_space<vmem>>, vector<1x4x8x256xf32>
      %288 = vector.shape_cast %287 : vector<1x4x8x256xf32> to vector<4x8x256xf32>
      %289 = arith.mulf %288, %178 : vector<4x8x256xf32>
      %cst_107 = arith.constant dense<0.000000e+00> : vector<4x256xf32>
      %290 = vector.multi_reduction <add>, %289, %cst_107 [1] : vector<4x8x256xf32> to vector<4x256xf32>
      %291 = vector.shape_cast %290 : vector<4x256xf32> to vector<4x1x256xf32>
      %292 = math.exp %291 : vector<4x1x256xf32>
      %cst_108 = arith.constant dense<0.000000e+00> : vector<1x256xf32>
      %293 = vector.multi_reduction <add>, %292, %cst_108 [0] : vector<4x1x256xf32> to vector<1x256xf32>
      %294 = vector.shape_cast %293 : vector<1x256xf32> to vector<1x1x256xf32>
      %295 = tpu.reciprocal %294 : vector<1x1x256xf32> -> vector<1x1x256xf32>
      %296 = vector.broadcast %295 : vector<1x1x256xf32> to vector<4x1x256xf32>
      %297 = arith.mulf %292, %296 : vector<4x1x256xf32>
      %298 = vector.broadcast %297 : vector<4x1x256xf32> to vector<4x8x256xf32>
      %299 = arith.mulf %288, %298 : vector<4x8x256xf32>
      %300 = arith.addf %285, %299 : vector<4x8x256xf32>
      %c0_109 = arith.constant 0 : index
      %c0_110 = arith.constant 0 : index
      %301 = arith.index_cast %4 : i32 to index
      %302 = vector.load %arg3[%c0_109, %c0_110, %301] : memref<4x8x512xf32, #tpu.memory_space<vmem>>, vector<4x8x256xf32>
      tpu.vector_store %arg3[%c0_109, %c0_110, %301], %300 {strides = array<i32>} : memref<4x8x512xf32, #tpu.memory_space<vmem>>, vector<4x8x256xf32>,
    }
    %c2_i32_0 = arith.constant 2 : i32
    return
  }
  func.func @transform_0(%arg0: i32) -> (i32, i32, i32) {
    %c0_i32 = arith.constant 0 : i32
    %c0_i32_0 = arith.constant 0 : i32
    %c0_i32_1 = arith.constant 0 : i32
    return %c0_i32, %c0_i32_0, %arg0 : i32, i32, i32
  }
  func.func @transform_1(%arg0: i32) -> (i32, i32, i32, i32) {
    %c0_i32 = arith.constant 0 : i32
    %c0_i32_0 = arith.constant 0 : i32
    %c0_i32_1 = arith.constant 0 : i32
    %c0_i32_2 = arith.constant 0 : i32
    return %c0_i32, %c0_i32_0, %c0_i32_1, %arg0 : i32, i32, i32, i32
  }
  func.func @transform_2(%arg0: i32) -> (i32, i32, i32) {
    %c0_i32 = arith.constant 0 : i32
    %c0_i32_0 = arith.constant 0 : i32
    %c0_i32_1 = arith.constant 0 : i32
    return %c0_i32, %c0_i32_0, %arg0 : i32, i32, i32
  }
}

</mosaic_0001>

<bundles_post_ra>
// kernel: routing_layer.1
= control target key start
LH: loop header
LB: loop body
LE: loop exit
PB: predicated region body
PF: predicated region fallthrough
CT: control target
= control target key end

     0   :  { %7 = vsyncpa [#allocation5], 0  ;;  %s5542_s0 = inlined_call_operand.vmem [shape: f32[4,8,1024], index: 0, kind: input, shape index: {}]   ;;  %s5543_s1 = inlined_call_operand.vmem [shape: f32[8,4,8,1024], index: 1, kind: input, shape index: {}]   ;;  %s5544_s2 = inlined_call_operand.hbm [shape: f32[4,8,1024], index: 2, kind: output, shape index: {}]  }
   0x1   :  { %9 = vsyncpa [#allocation5 + $0x1], 0  ;;  %s3343_s9 = smov 0   ;;  %s3345_s10 = smov 0  }
   0x2   :  { %s3347_s11 = smov 0   ;;  %s3349_s12 = smov 0  }
   0x3 LB: > { %s2632_s13 = sadd.s32 4294967295, %s3318_s12   ;;  %s2633_s14 = sadd.s32 4294967294, %s3318_s12   ;;  %s3318_s12 = sphi %s3349_s12, %s5931_s12   ;;  %s3314_s11 = sphi %s3347_s11, %s5930_s11   ;;  %s3310_s10 = sphi %s3345_s10, %s5929_s10   ;;  %s3306_s9 = sphi %s3343_s9, %s5928_s9  }
   0x4   : > { %s3366_s15 = sadd.s32 1, %s3318_s12   ;;  %s22_s16 = sadd.s32 1, %s3314_s11 }
   0x5   : > { %s19_s17 = ssub.s32 %s3318_s12, %s3366_s15  ;;  %p29_p0 = scmp.ne.s32.totalorder %s3314_s11, %s3310_s10 }
   0x6   : > { %p20_p1 = scmp.eq.s32.totalorder %s19_s17, 0  ;;  %p30_p2 = scmp.eq.s32.totalorder %s3318_s12, 0 }
   0x7   : > { %p85_p3 = scmp.eq.s32.totalorder %s2632_s13, 1  ;;  %p90_p4 = scmp.ne.s32.totalorder %s3310_s10, %s3306_s9 }
   0x8   : > { %s3379_s18 = scalar_select %p20_p1, %s3314_s11, %s22_s16  }
   0x9   : > { %p3381_p5 = por %p30_p2, %p29_p0  ;;  %p3385_p6 = por %p85_p3, %p29_p0 }
   0xa   : > { %p91_p7 = scmp.eq.s32.totalorder %s2633_s14, 1  ;;  %p2635_p9 = scmp.ge.s32.totalorder %s3318_s12, 2 }
   0xc   : > { %p3389_p8 = por %p91_p7, %p90_p4  ;;  %107 = sbr.rel (%p2635_p9) target bundleno = 99 (0x63), region = 16 }
  0x13   : > { %110 = sbr.rel (!%p3381_p5) target bundleno = 31 (0x1f), region = 20  ;;  %s112_s22 = sand.u32 (%p3381_p5), 1, %s3314_s11  }
  0x14   : > { %s2718_s23 = sshll.u32 (%p3381_p5), %s3318_s12, 5  ;;  %s2636_s24 = sshll.u32 (%p3381_p5), %s112_s22, 7 }
  0x15   : > { %s3403_s27 = scalar_lea.vmem (%p3381_p5), %s5542_s0, %s2718_s23  ;;  %s114_s28 = scalar_lea.vmem (%p3381_p5), [#allocation2], %s2636_s24 }
  0x16   : > { %v130_v0 = vld [vmem:[%s3403_s27] sm:$0xff] (%p3381_p5)  ;;  %v132_v1 = vld [vmem:[%s3403_s27 + $0x8] sm:$0xff] (%p3381_p5)  ;;  %v134_v2 = vld [vmem:[%s3403_s27 + $0x10] sm:$0xff] (%p3381_p5) }
  0x17   : > { %131 = vst [vmem:[%s114_s28] sm:$0xff] (%p3381_p5), %v130_v0  ;;  %133 = vst [vmem:[%s114_s28 + $0x8] sm:$0xff] (%p3381_p5), %v132_v1  ;;  %v136_v3 = vld [vmem:[%s3403_s27 + $0x18] sm:$0xff] (%p3381_p5)  ;;  %v138_v4 = vld [vmem:[%s3403_s27 + $0x40] sm:$0xff] (%p3381_p5) }
  0x18   : > { %135 = vst [vmem:[%s114_s28 + $0x10] sm:$0xff] (%p3381_p5), %v134_v2  ;;  %v140_v5 = vld [vmem:[%s3403_s27 + $0x48] sm:$0xff] (%p3381_p5)  ;;  %137 = vst [vmem:[%s114_s28 + $0x18] sm:$0xff] (%p3381_p5), %v136_v3  ;;  %v142_v6 = vld [vmem:[%s3403_s27 + $0x50] sm:$0xff] (%p3381_p5) }
  0x19   : > { %139 = vst [vmem:[%s114_s28 + $0x20] sm:$0xff] (%p3381_p5), %v138_v4  ;;  %141 = vst [vmem:[%s114_s28 + $0x28] sm:$0xff] (%p3381_p5), %v140_v5  ;;  %v144_v7 = vld [vmem:[%s3403_s27 + $0x58] sm:$0xff] (%p3381_p5)  ;;  %v146_v8 = vld [vmem:[%s3403_s27 + $0x80] sm:$0xff] (%p3381_p5) }
  0x1a   : > { %143 = vst [vmem:[%s114_s28 + $0x30] sm:$0xff] %v142_v6  ;;  %145 = vst [vmem:[%s114_s28 + $0x38] sm:$0xff] %v144_v7  ;;  %v148_v9 = vld [vmem:[%s3403_s27 + $0x88] sm:$0xff]  ;;  %v150_v10 = vld [vmem:[%s3403_s27 + $0x90] sm:$0xff] }
  0x1b   : > { %147 = vst [vmem:[%s114_s28 + $0x40] sm:$0xff] %v146_v8  ;;  %v152_v11 = vld [vmem:[%s3403_s27 + $0x98] sm:$0xff]  ;;  %149 = vst [vmem:[%s114_s28 + $0x48] sm:$0xff] %v148_v9  ;;  %v154_v12 = vld [vmem:[%s3403_s27 + $0xc0] sm:$0xff] }
  0x1c   : > { %151 = vst [vmem:[%s114_s28 + $0x50] sm:$0xff] %v150_v10  ;;  %153 = vst [vmem:[%s114_s28 + $0x58] sm:$0xff] %v152_v11  ;;  %v156_v13 = vld [vmem:[%s3403_s27 + $0xc8] sm:$0xff]  ;;  %v158_v14 = vld [vmem:[%s3403_s27 + $0xd0] sm:$0xff] }
  0x1d   : > { %155 = vst [vmem:[%s114_s28 + $0x60] sm:$0xff] %v154_v12  ;;  %157 = vst [vmem:[%s114_s28 + $0x68] sm:$0xff] %v156_v13  ;;  %v160_v15 = vld [vmem:[%s3403_s27 + $0xd8] sm:$0xff] }
  0x1e   : > { %159 = vst [vmem:[%s114_s28 + $0x70] sm:$0xff] %v158_v14  ;;  %161 = vst [vmem:[%s114_s28 + $0x78] sm:$0xff] %v160_v15 }
  0x1f PF: > { %167 = sbr.rel (!%p3381_p5) target bundleno = 99 (0x63), region = 43  ;;  %s169_s29 = sand.u32 (%p3381_p5), 1, %s3314_s11  }
  0x20   : > { %s2719_s30 = sshll.u32 (%p3381_p5), %s3318_s12, 5  ;;  %s2639_s3 = sshll.u32 (%p3381_p5), %s169_s29, 10 }
  0x21   : > { %s3428_s6 = scalar_lea.vmem (%p3381_p5), %s5543_s1, %s2719_s30  ;;  %s3433_s7 = scalar_lea.vmem (%p3381_p5), [#allocation3], %s2639_s3 }
  0x22   : > { %v187_v16 = vld [vmem:[%s3428_s6] sm:$0xff] (%p3381_p5)  ;;  %v189_v17 = vld [vmem:[%s3428_s6 + $0x8] sm:$0xff] (%p3381_p5)  ;;  %v191_v18 = vld [vmem:[%s3428_s6 + $0x10] sm:$0xff] (%p3381_p5) }
  0x23   : > { %188 = vst [vmem:[%s3433_s7] sm:$0xff] (%p3381_p5), %v187_v16  ;;  %190 = vst [vmem:[%s3433_s7 + $0x8] sm:$0xff] (%p3381_p5), %v189_v17  ;;  %v193_v19 = vld [vmem:[%s3428_s6 + $0x18] sm:$0xff] (%p3381_p5)  ;;  %v195_v20 = vld [vmem:[%s3428_s6 + $0x40] sm:$0xff] (%p3381_p5) }
  0x24   : > { %192 = vst [vmem:[%s3433_s7 + $0x10] sm:$0xff] (%p3381_p5), %v191_v18  ;;  %v197_v21 = vld [vmem:[%s3428_s6 + $0x48] sm:$0xff] (%p3381_p5)  ;;  %194 = vst [vmem:[%s3433_s7 + $0x18] sm:$0xff] (%p3381_p5), %v193_v19  ;;  %v199_v22 = vld [vmem:[%s3428_s6 + $0x50] sm:$0xff] (%p3381_p5) }
  0x25   : > { %196 = vst [vmem:[%s3433_s7 + $0x20] sm:$0xff] (%p3381_p5), %v195_v20  ;;  %198 = vst [vmem:[%s3433_s7 + $0x28] sm:$0xff] (%p3381_p5), %v197_v21  ;;  %v201_v23 = vld [vmem:[%s3428_s6 + $0x58] sm:$0xff] (%p3381_p5)  ;;  %v203_v24 = vld [vmem:[%s3428_s6 + $0x80] sm:$0xff] (%p3381_p5) }
  0x26   : > { %200 = vst [vmem:[%s3433_s7 + $0x30] sm:$0xff] %v199_v22  ;;  %202 = vst [vmem:[%s3433_s7 + $0x38] sm:$0xff] %v201_v23  ;;  %v205_v25 = vld [vmem:[%s3428_s6 + $0x88] sm:$0xff]  ;;  %v207_v26 = vld [vmem:[%s3428_s6 + $0x90] sm:$0xff] }
  0x27   : > { %204 = vst [vmem:[%s3433_s7 + $0x40] sm:$0xff] %v203_v24  ;;  %v209_v27 = vld [vmem:[%s3428_s6 + $0x98] sm:$0xff]  ;;  %206 = vst [vmem:[%s3433_s7 + $0x48] sm:$0xff] %v205_v25  ;;  %v211_v28 = vld [vmem:[%s3428_s6 + $0xc0] sm:$0xff] }
  0x28   : > { %208 = vst [vmem:[%s3433_s7 + $0x50] sm:$0xff] %v207_v26  ;;  %210 = vst [vmem:[%s3433_s7 + $0x58] sm:$0xff] %v209_v27  ;;  %v213_v29 = vld [vmem:[%s3428_s6 + $0xc8] sm:$0xff]  ;;  %v215_v30 = vld [vmem:[%s3428_s6 + $0xd0] sm:$0xff] }
  0x29   : > { %212 = vst [vmem:[%s3433_s7 + $0x60] sm:$0xff] %v211_v28  ;;  %214 = vst [vmem:[%s3433_s7 + $0x68] sm:$0xff] %v213_v29  ;;  %v217_v31 = vld [vmem:[%s3428_s6 + $0xd8] sm:$0xff]  ;;  %v219_v32 = vld [vmem:[%s3428_s6 + $0x100] sm:$0xff] }
  0x2a   : > { %216 = vst [vmem:[%s3433_s7 + $0x70] sm:$0xff] %v215_v30  ;;  %v221_v33 = vld [vmem:[%s3428_s6 + $0x108] sm:$0xff]  ;;  %218 = vst [vmem:[%s3433_s7 + $0x78] sm:$0xff] %v217_v31  ;;  %v223_v34 = vld [vmem:[%s3428_s6 + $0x110] sm:$0xff] }
  0x2b   : > { %220 = vst [vmem:[%s3433_s7 + $0x80] sm:$0xff] %v219_v32  ;;  %222 = vst [vmem:[%s3433_s7 + $0x88] sm:$0xff] %v221_v33  ;;  %v225_v35 = vld [vmem:[%s3428_s6 + $0x118] sm:$0xff]  ;;  %v227_v36 = vld [vmem:[%s3428_s6 + $0x140] sm:$0xff] }
  0x2c   : > { %224 = vst [vmem:[%s3433_s7 + $0x90] sm:$0xff] %v223_v34  ;;  %226 = vst [vmem:[%s3433_s7 + $0x98] sm:$0xff] %v225_v35  ;;  %v229_v37 = vld [vmem:[%s3428_s6 + $0x148] sm:$0xff]  ;;  %v231_v38 = vld [vmem:[%s3428_s6 + $0x150] sm:$0xff] }
  0x2d   : > { %228 = vst [vmem:[%s3433_s7 + $0xa0] sm:$0xff] %v227_v36  ;;  %v233_v39 = vld [vmem:[%s3428_s6 + $0x158] sm:$0xff]  ;;  %230 = vst [vmem:[%s3433_s7 + $0xa8] sm:$0xff] %v229_v37  ;;  %v235_v40 = vld [vmem:[%s3428_s6 + $0x180] sm:$0xff] }
  0x2e   : > { %232 = vst [vmem:[%s3433_s7 + $0xb0] sm:$0xff] %v231_v38  ;;  %234 = vst [vmem:[%s3433_s7 + $0xb8] sm:$0xff] %v233_v39  ;;  %v237_v41 = vld [vmem:[%s3428_s6 + $0x188] sm:$0xff]  ;;  %v239_v42 = vld [vmem:[%s3428_s6 + $0x190] sm:$0xff] }
  0x2f   : > { %236 = vst [vmem:[%s3433_s7 + $0xc0] sm:$0xff] %v235_v40  ;;  %238 = vst [vmem:[%s3433_s7 + $0xc8] sm:$0xff] %v237_v41  ;;  %v241_v43 = vld [vmem:[%s3428_s6 + $0x198] sm:$0xff]  ;;  %v243_v44 = vld [vmem:[%s3428_s6 + $0x1c0] sm:$0xff] }
  0x30   : > { %240 = vst [vmem:[%s3433_s7 + $0xd0] sm:$0xff] %v239_v42  ;;  %v245_v45 = vld [vmem:[%s3428_s6 + $0x1c8] sm:$0xff]  ;;  %242 = vst [vmem:[%s3433_s7 + $0xd8] sm:$0xff] %v241_v43  ;;  %v247_v46 = vld [vmem:[%s3428_s6 + $0x1d0] sm:$0xff] }
  0x31   : > { %244 = vst [vmem:[%s3433_s7 + $0xe0] sm:$0xff] %v243_v44  ;;  %246 = vst [vmem:[%s3433_s7 + $0xe8] sm:$0xff] %v245_v45  ;;  %v249_v47 = vld [vmem:[%s3428_s6 + $0x1d8] sm:$0xff]  ;;  %v251_v48 = vld [vmem:[%s3428_s6 + $0x200] sm:$0xff] }
  0x32   : > { %248 = vst [vmem:[%s3433_s7 + $0xf0] sm:$0xff] %v247_v46  ;;  %250 = vst [vmem:[%s3433_s7 + $0xf8] sm:$0xff] %v249_v47  ;;  %v253_v49 = vld [vmem:[%s3428_s6 + $0x208] sm:$0xff]  ;;  %v255_v50 = vld [vmem:[%s3428_s6 + $0x210] sm:$0xff] }
  0x33   : > { %252 = vst [vmem:[%s3433_s7 + $0x100] sm:$0xff] %v251_v48  ;;  %v257_v51 = vld [vmem:[%s3428_s6 + $0x218] sm:$0xff]  ;;  %254 = vst [vmem:[%s3433_s7 + $0x108] sm:$0xff] %v253_v49  ;;  %v259_v52 = vld [vmem:[%s3428_s6 + $0x240] sm:$0xff] }
  0x34   : > { %256 = vst [vmem:[%s3433_s7 + $0x110] sm:$0xff] %v255_v50  ;;  %258 = vst [vmem:[%s3433_s7 + $0x118] sm:$0xff] %v257_v51  ;;  %v261_v53 = vld [vmem:[%s3428_s6 + $0x248] sm:$0xff]  ;;  %v263_v54 = vld [vmem:[%s3428_s6 + $0x250] sm:$0xff] }
  0x35   : > { %260 = vst [vmem:[%s3433_s7 + $0x120] sm:$0xff] %v259_v52  ;;  %262 = vst [vmem:[%s3433_s7 + $0x128] sm:$0xff] %v261_v53  ;;  %v265_v55 = vld [vmem:[%s3428_s6 + $0x258] sm:$0xff]  ;;  %v267_v56 = vld [vmem:[%s3428_s6 + $0x280] sm:$0xff] }
  0x36   : > { %264 = vst [vmem:[%s3433_s7 + $0x130] sm:$0xff] %v263_v54  ;;  %v269_v57 = vld [vmem:[%s3428_s6 + $0x288] sm:$0xff]  ;;  %266 = vst [vmem:[%s3433_s7 + $0x138] sm:$0xff] %v265_v55  ;;  %v271_v58 = vld [vmem:[%s3428_s6 + $0x290] sm:$0xff] }
  0x37   : > { %268 = vst [vmem:[%s3433_s7 + $0x140] sm:$0xff] %v267_v56  ;;  %270 = vst [vmem:[%s3433_s7 + $0x148] sm:$0xff] %v269_v57  ;;  %v273_v59 = vld [vmem:[%s3428_s6 + $0x298] sm:$0xff]  ;;  %v275_v60 = vld [vmem:[%s3428_s6 + $0x2c0] sm:$0xff] }
  0x38   : > { %272 = vst [vmem:[%s3433_s7 + $0x150] sm:$0xff] %v271_v58  ;;  %274 = vst [vmem:[%s3433_s7 + $0x158] sm:$0xff] %v273_v59  ;;  %v277_v61 = vld [vmem:[%s3428_s6 + $0x2c8] sm:$0xff]  ;;  %v279_v62 = vld [vmem:[%s3428_s6 + $0x2d0] sm:$0xff] }
  0x39   : > { %276 = vst [vmem:[%s3433_s7 + $0x160] sm:$0xff] %v275_v60  ;;  %v281_v63 = vld [vmem:[%s3428_s6 + $0x2d8] sm:$0xff]  ;;  %278 = vst [vmem:[%s3433_s7 + $0x168] sm:$0xff] %v277_v61  ;;  %v283_v0 = vld [vmem:[%s3428_s6 + $0x300] sm:$0xff] }
  0x3a   : > { %280 = vst [vmem:[%s3433_s7 + $0x170] sm:$0xff] %v279_v62  ;;  %282 = vst [vmem:[%s3433_s7 + $0x178] sm:$0xff] %v281_v63  ;;  %v285_v1 = vld [vmem:[%s3428_s6 + $0x308] sm:$0xff]  ;;  %v287_v2 = vld [vmem:[%s3428_s6 + $0x310] sm:$0xff] }
  0x3b   : > { %284 = vst [vmem:[%s3433_s7 + $0x180] sm:$0xff] %v283_v0  ;;  %286 = vst [vmem:[%s3433_s7 + $0x188] sm:$0xff] %v285_v1  ;;  %v289_v3 = vld [vmem:[%s3428_s6 + $0x318] sm:$0xff]  ;;  %v291_v4 = vld [vmem:[%s3428_s6 + $0x340] sm:$0xff] }
  0x3c   : > { %288 = vst [vmem:[%s3433_s7 + $0x190] sm:$0xff] %v287_v2  ;;  %v293_v5 = vld [vmem:[%s3428_s6 + $0x348] sm:$0xff]  ;;  %290 = vst [vmem:[%s3433_s7 + $0x198] sm:$0xff] %v289_v3  ;;  %v295_v6 = vld [vmem:[%s3428_s6 + $0x350] sm:$0xff] }
  0x3d   : > { %292 = vst [vmem:[%s3433_s7 + $0x1a0] sm:$0xff] %v291_v4  ;;  %294 = vst [vmem:[%s3433_s7 + $0x1a8] sm:$0xff] %v293_v5  ;;  %v297_v7 = vld [vmem:[%s3428_s6 + $0x358] sm:$0xff]  ;;  %v299_v8 = vld [vmem:[%s3428_s6 + $0x380] sm:$0xff] }
  0x3e   : > { %296 = vst [vmem:[%s3433_s7 + $0x1b0] sm:$0xff] %v295_v6  ;;  %298 = vst [vmem:[%s3433_s7 + $0x1b8] sm:$0xff] %v297_v7  ;;  %v301_v9 = vld [vmem:[%s3428_s6 + $0x388] sm:$0xff]  ;;  %v303_v10 = vld [vmem:[%s3428_s6 + $0x390] sm:$0xff] }
  0x3f   : > { %300 = vst [vmem:[%s3433_s7 + $0x1c0] sm:$0xff] %v299_v8  ;;  %v305_v11 = vld [vmem:[%s3428_s6 + $0x398] sm:$0xff]  ;;  %302 = vst [vmem:[%s3433_s7 + $0x1c8] sm:$0xff] %v301_v9  ;;  %v307_v12 = vld [vmem:[%s3428_s6 + $0x3c0] sm:$0xff] }
  0x40   : > { %304 = vst [vmem:[%s3433_s7 + $0x1d0] sm:$0xff] %v303_v10  ;;  %306 = vst [vmem:[%s3433_s7 + $0x1d8] sm:$0xff] %v305_v11  ;;  %v309_v13 = vld [vmem:[%s3428_s6 + $0x3c8] sm:$0xff]  ;;  %v311_v14 = vld [vmem:[%s3428_s6 + $0x3d0] sm:$0xff] }
  0x41   : > { %308 = vst [vmem:[%s3433_s7 + $0x1e0] sm:$0xff] %v307_v12  ;;  %310 = vst [vmem:[%s3433_s7 + $0x1e8] sm:$0xff] %v309_v13  ;;  %v313_v15 = vld [vmem:[%s3428_s6 + $0x3d8] sm:$0xff]  ;;  %v315_v16 = vld [vmem:[%s3428_s6 + $0x400] sm:$0xff] }
  0x42   : > { %312 = vst [vmem:[%s3433_s7 + $0x1f0] sm:$0xff] %v311_v14  ;;  %v317_v17 = vld [vmem:[%s3428_s6 + $0x408] sm:$0xff]  ;;  %314 = vst [vmem:[%s3433_s7 + $0x1f8] sm:$0xff] %v313_v15  ;;  %v319_v18 = vld [vmem:[%s3428_s6 + $0x410] sm:$0xff] }
  0x43   : > { %316 = vst [vmem:[%s3433_s7 + $0x200] sm:$0xff] %v315_v16  ;;  %318 = vst [vmem:[%s3433_s7 + $0x208] sm:$0xff] %v317_v17  ;;  %v321_v19 = vld [vmem:[%s3428_s6 + $0x418] sm:$0xff]  ;;  %v323_v20 = vld [vmem:[%s3428_s6 + $0x440] sm:$0xff] }
  0x44   : > { %320 = vst [vmem:[%s3433_s7 + $0x210] sm:$0xff] %v319_v18  ;;  %322 = vst [vmem:[%s3433_s7 + $0x218] sm:$0xff] %v321_v19  ;;  %v325_v21 = vld [vmem:[%s3428_s6 + $0x448] sm:$0xff]  ;;  %v327_v22 = vld [vmem:[%s3428_s6 + $0x450] sm:$0xff] }
  0x45   : > { %324 = vst [vmem:[%s3433_s7 + $0x220] sm:$0xff] %v323_v20  ;;  %v329_v23 = vld [vmem:[%s3428_s6 + $0x458] sm:$0xff]  ;;  %326 = vst [vmem:[%s3433_s7 + $0x228] sm:$0xff] %v325_v21  ;;  %v331_v24 = vld [vmem:[%s3428_s6 + $0x480] sm:$0xff] }
  0x46   : > { %328 = vst [vmem:[%s3433_s7 + $0x230] sm:$0xff] %v327_v22  ;;  %330 = vst [vmem:[%s3433_s7 + $0x238] sm:$0xff] %v329_v23  ;;  %v333_v25 = vld [vmem:[%s3428_s6 + $0x488] sm:$0xff]  ;;  %v335_v26 = vld [vmem:[%s3428_s6 + $0x490] sm:$0xff] }
  0x47   : > { %332 = vst [vmem:[%s3433_s7 + $0x240] sm:$0xff] %v331_v24  ;;  %334 = vst [vmem:[%s3433_s7 + $0x248] sm:$0xff] %v333_v25  ;;  %v337_v27 = vld [vmem:[%s3428_s6 + $0x498] sm:$0xff]  ;;  %v339_v28 = vld [vmem:[%s3428_s6 + $0x4c0] sm:$0xff] }
  0x48   : > { %336 = vst [vmem:[%s3433_s7 + $0x250] sm:$0xff] %v335_v26  ;;  %v341_v29 = vld [vmem:[%s3428_s6 + $0x4c8] sm:$0xff]  ;;  %338 = vst [vmem:[%s3433_s7 + $0x258] sm:$0xff] %v337_v27  ;;  %v343_v30 = vld [vmem:[%s3428_s6 + $0x4d0] sm:$0xff] }
  0x49   : > { %340 = vst [vmem:[%s3433_s7 + $0x260] sm:$0xff] %v339_v28  ;;  %342 = vst [vmem:[%s3433_s7 + $0x268] sm:$0xff] %v341_v29  ;;  %v345_v31 = vld [vmem:[%s3428_s6 + $0x4d8] sm:$0xff]  ;;  %v347_v32 = vld [vmem:[%s3428_s6 + $0x500] sm:$0xff] }
  0x4a   : > { %344 = vst [vmem:[%s3433_s7 + $0x270] sm:$0xff] %v343_v30  ;;  %346 = vst [vmem:[%s3433_s7 + $0x278] sm:$0xff] %v345_v31  ;;  %v349_v33 = vld [vmem:[%s3428_s6 + $0x508] sm:$0xff]  ;;  %v351_v34 = vld [vmem:[%s3428_s6 + $0x510] sm:$0xff] }
  0x4b   : > { %348 = vst [vmem:[%s3433_s7 + $0x280] sm:$0xff] %v347_v32  ;;  %v353_v35 = vld [vmem:[%s3428_s6 + $0x518] sm:$0xff]  ;;  %350 = vst [vmem:[%s3433_s7 + $0x288] sm:$0xff] %v349_v33  ;;  %v355_v36 = vld [vmem:[%s3428_s6 + $0x540] sm:$0xff] }
  0x4c   : > { %352 = vst [vmem:[%s3433_s7 + $0x290] sm:$0xff] %v351_v34  ;;  %354 = vst [vmem:[%s3433_s7 + $0x298] sm:$0xff] %v353_v35  ;;  %v357_v37 = vld [vmem:[%s3428_s6 + $0x548] sm:$0xff]  ;;  %v359_v38 = vld [vmem:[%s3428_s6 + $0x550] sm:$0xff] }
  0x4d   : > { %356 = vst [vmem:[%s3433_s7 + $0x2a0] sm:$0xff] %v355_v36  ;;  %358 = vst [vmem:[%s3433_s7 + $0x2a8] sm:$0xff] %v357_v37  ;;  %v361_v39 = vld [vmem:[%s3428_s6 + $0x558] sm:$0xff]  ;;  %v363_v40 = vld [vmem:[%s3428_s6 + $0x580] sm:$0xff] }
  0x4e   : > { %360 = vst [vmem:[%s3433_s7 + $0x2b0] sm:$0xff] %v359_v38  ;;  %v365_v41 = vld [vmem:[%s3428_s6 + $0x588] sm:$0xff]  ;;  %362 = vst [vmem:[%s3433_s7 + $0x2b8] sm:$0xff] %v361_v39  ;;  %v367_v42 = vld [vmem:[%s3428_s6 + $0x590] sm:$0xff] }
  0x4f   : > { %364 = vst [vmem:[%s3433_s7 + $0x2c0] sm:$0xff] %v363_v40  ;;  %366 = vst [vmem:[%s3433_s7 + $0x2c8] sm:$0xff] %v365_v41  ;;  %v369_v43 = vld [vmem:[%s3428_s6 + $0x598] sm:$0xff]  ;;  %v371_v44 = vld [vmem:[%s3428_s6 + $0x5c0] sm:$0xff] }
  0x50   : > { %368 = vst [vmem:[%s3433_s7 + $0x2d0] sm:$0xff] %v367_v42  ;;  %370 = vst [vmem:[%s3433_s7 + $0x2d8] sm:$0xff] %v369_v43  ;;  %v373_v45 = vld [vmem:[%s3428_s6 + $0x5c8] sm:$0xff]  ;;  %v375_v46 = vld [vmem:[%s3428_s6 + $0x5d0] sm:$0xff] }
  0x51   : > { %372 = vst [vmem:[%s3433_s7 + $0x2e0] sm:$0xff] %v371_v44  ;;  %v377_v47 = vld [vmem:[%s3428_s6 + $0x5d8] sm:$0xff]  ;;  %374 = vst [vmem:[%s3433_s7 + $0x2e8] sm:$0xff] %v373_v45  ;;  %v379_v48 = vld [vmem:[%s3428_s6 + $0x600] sm:$0xff] }
  0x52   : > { %376 = vst [vmem:[%s3433_s7 + $0x2f0] sm:$0xff] %v375_v46  ;;  %378 = vst [vmem:[%s3433_s7 + $0x2f8] sm:$0xff] %v377_v47  ;;  %v381_v49 = vld [vmem:[%s3428_s6 + $0x608] sm:$0xff]  ;;  %v383_v50 = vld [vmem:[%s3428_s6 + $0x610] sm:$0xff] }
  0x53   : > { %380 = vst [vmem:[%s3433_s7 + $0x300] sm:$0xff] %v379_v48  ;;  %382 = vst [vmem:[%s3433_s7 + $0x308] sm:$0xff] %v381_v49  ;;  %v385_v51 = vld [vmem:[%s3428_s6 + $0x618] sm:$0xff]  ;;  %v387_v52 = vld [vmem:[%s3428_s6 + $0x640] sm:$0xff] }
  0x54   : > { %384 = vst [vmem:[%s3433_s7 + $0x310] sm:$0xff] %v383_v50  ;;  %v389_v53 = vld [vmem:[%s3428_s6 + $0x648] sm:$0xff]  ;;  %386 = vst [vmem:[%s3433_s7 + $0x318] sm:$0xff] %v385_v51  ;;  %v391_v54 = vld [vmem:[%s3428_s6 + $0x650] sm:$0xff] }
  0x55   : > { %388 = vst [vmem:[%s3433_s7 + $0x320] sm:$0xff] %v387_v52  ;;  %390 = vst [vmem:[%s3433_s7 + $0x328] sm:$0xff] %v389_v53  ;;  %v393_v55 = vld [vmem:[%s3428_s6 + $0x658] sm:$0xff]  ;;  %v395_v56 = vld [vmem:[%s3428_s6 + $0x680] sm:$0xff] }
  0x56   : > { %392 = vst [vmem:[%s3433_s7 + $0x330] sm:$0xff] %v391_v54  ;;  %394 = vst [vmem:[%s3433_s7 + $0x338] sm:$0xff] %v393_v55  ;;  %v397_v57 = vld [vmem:[%s3428_s6 + $0x688] sm:$0xff]  ;;  %v399_v58 = vld [vmem:[%s3428_s6 + $0x690] sm:$0xff] }
  0x57   : > { %396 = vst [vmem:[%s3433_s7 + $0x340] sm:$0xff] %v395_v56  ;;  %v401_v59 = vld [vmem:[%s3428_s6 + $0x698] sm:$0xff]  ;;  %398 = vst [vmem:[%s3433_s7 + $0x348] sm:$0xff] %v397_v57  ;;  %v403_v60 = vld [vmem:[%s3428_s6 + $0x6c0] sm:$0xff] }
  0x58   : > { %400 = vst [vmem:[%s3433_s7 + $0x350] sm:$0xff] %v399_v58  ;;  %402 = vst [vmem:[%s3433_s7 + $0x358] sm:$0xff] %v401_v59  ;;  %v405_v61 = vld [vmem:[%s3428_s6 + $0x6c8] sm:$0xff]  ;;  %v407_v62 = vld [vmem:[%s3428_s6 + $0x6d0] sm:$0xff] }
  0x59   : > { %404 = vst [vmem:[%s3433_s7 + $0x360] sm:$0xff] %v403_v60  ;;  %406 = vst [vmem:[%s3433_s7 + $0x368] sm:$0xff] %v405_v61  ;;  %v409_v63 = vld [vmem:[%s3428_s6 + $0x6d8] sm:$0xff]  ;;  %v411_v0 = vld [vmem:[%s3428_s6 + $0x700] sm:$0xff] }
  0x5a   : > { %408 = vst [vmem:[%s3433_s7 + $0x370] sm:$0xff] %v407_v62  ;;  %v413_v1 = vld [vmem:[%s3428_s6 + $0x708] sm:$0xff]  ;;  %410 = vst [vmem:[%s3433_s7 + $0x378] sm:$0xff] %v409_v63  ;;  %v415_v2 = vld [vmem:[%s3428_s6 + $0x710] sm:$0xff] }
  0x5b   : > { %412 = vst [vmem:[%s3433_s7 + $0x380] sm:$0xff] %v411_v0  ;;  %414 = vst [vmem:[%s3433_s7 + $0x388] sm:$0xff] %v413_v1  ;;  %v417_v3 = vld [vmem:[%s3428_s6 + $0x718] sm:$0xff]  ;;  %v419_v4 = vld [vmem:[%s3428_s6 + $0x740] sm:$0xff] }
  0x5c   : > { %416 = vst [vmem:[%s3433_s7 + $0x390] sm:$0xff] %v415_v2  ;;  %418 = vst [vmem:[%s3433_s7 + $0x398] sm:$0xff] %v417_v3  ;;  %v421_v5 = vld [vmem:[%s3428_s6 + $0x748] sm:$0xff]  ;;  %v423_v6 = vld [vmem:[%s3428_s6 + $0x750] sm:$0xff] }
  0x5d   : > { %420 = vst [vmem:[%s3433_s7 + $0x3a0] sm:$0xff] %v419_v4  ;;  %v425_v7 = vld [vmem:[%s3428_s6 + $0x758] sm:$0xff]  ;;  %422 = vst [vmem:[%s3433_s7 + $0x3a8] sm:$0xff] %v421_v5  ;;  %v427_v8 = vld [vmem:[%s3428_s6 + $0x780] sm:$0xff] }
  0x5e   : > { %424 = vst [vmem:[%s3433_s7 + $0x3b0] sm:$0xff] %v423_v6  ;;  %426 = vst [vmem:[%s3433_s7 + $0x3b8] sm:$0xff] %v425_v7  ;;  %v429_v9 = vld [vmem:[%s3428_s6 + $0x788] sm:$0xff]  ;;  %v431_v10 = vld [vmem:[%s3428_s6 + $0x790] sm:$0xff] }
  0x5f   : > { %428 = vst [vmem:[%s3433_s7 + $0x3c0] sm:$0xff] %v427_v8  ;;  %430 = vst [vmem:[%s3433_s7 + $0x3c8] sm:$0xff] %v429_v9  ;;  %v433_v11 = vld [vmem:[%s3428_s6 + $0x798] sm:$0xff]  ;;  %v435_v12 = vld [vmem:[%s3428_s6 + $0x7c0] sm:$0xff] }
  0x60   : > { %432 = vst [vmem:[%s3433_s7 + $0x3d0] sm:$0xff] %v431_v10  ;;  %v437_v13 = vld [vmem:[%s3428_s6 + $0x7c8] sm:$0xff]  ;;  %434 = vst [vmem:[%s3433_s7 + $0x3d8] sm:$0xff] %v433_v11  ;;  %v439_v14 = vld [vmem:[%s3428_s6 + $0x7d0] sm:$0xff] }
  0x61   : > { %436 = vst [vmem:[%s3433_s7 + $0x3e0] sm:$0xff] %v435_v12  ;;  %438 = vst [vmem:[%s3433_s7 + $0x3e8] sm:$0xff] %v437_v13  ;;  %v441_v15 = vld [vmem:[%s3428_s6 + $0x7d8] sm:$0xff] }
  0x62   : > { %440 = vst [vmem:[%s3433_s7 + $0x3f0] sm:$0xff] %v439_v14  ;;  %442 = vst [vmem:[%s3433_s7 + $0x3f8] sm:$0xff] %v441_v15 }
  0x63 PF: > { %p2642_p10 = scmp.ge.s32.totalorder %s3318_s12, 1  ;;  %p447_p11 = scmp.lt.s32.totalorder %s3318_s12, 3 }
  0x65   : > { %p448_p12 = pnand %p2642_p10, %p447_p11 }
  0x66   : > { %s3691_s8 = sand.u32 (!%p448_p12), 1, %s3310_s10   ;;  %s3701_s23 = smov (!%p448_p12), 0  }
  0x67   : > { %451 = sbr.rel (%p448_p12) target bundleno = 651 (0x28b), region = 66  ;;  %s2643_s14 = sshll.u32 (!%p448_p12), %s3691_s8, 7 }
  0x68   : > { %s2644_s16 = sshll.u32 (!%p448_p12), %s3691_s8, 10  ;;  %s3695_s17 = scalar_lea.vmem (!%p448_p12), [#allocation2], %s2643_s14 }
  0x69   : > { %s3697_s19 = scalar_lea.vmem (!%p448_p12), [#allocation3], %s2644_s16  ;;  %s3699_s22 = scalar_lea.vmem (!%p448_p12), [#allocation4], %s2643_s14 }
  0x6e LB: >> { %s2646_s24 = sshll.u32 %s3322_s23, 8  ;;  %s494_s23 = sadd.s32 1, %s3322_s23   ;;  %s3322_s23 = sphi %s3701_s23, %s494_s23  }
  0x6f   : >> { %s496_s25 = sshra.s32 %s2646_s24, 7  ;;  %p491_p13 = scmp.ge.s32.totalorder %s494_s23, 2  }
  0x70   : >> { %s3707_s26 = sshll.u32 %s496_s25, 3  ;;  %s2720_s30 = sshll.u32 (%p491_p13), %s2632_s13, 9 }
  0x71   : >> { %s3711_s27 = scalar_lea.vmem %s3697_s19, %s3707_s26 [#allocation3]  ;;  %s3877_s28 = scalar_lea.vmem %s3695_s17, %s3707_s26 [#allocation2] }
  0x72   : >> { %v3714_v16 = vld [vmem:[%s3711_s27] sm:$0xff]  ;;  %v3717_v17 = vld [vmem:[%s3711_s27 + $0x8] sm:$0xff]  ;;  %s2492_s29 = scalar_lea.vmem %s3699_s22, %s3707_s26 [#allocation4]  ;;  %s5495_s5 = scalar_lea.hbm (%p491_p13), %s5544_s2, %s2720_s30 }
  0x73   : >> { %v3720_v18 = vld [vmem:[%s3711_s27 + $0x20] sm:$0xff]  ;;  %v3723_v19 = vld [vmem:[%s3711_s27 + $0x28] sm:$0xff]  ;;  %s2515_s6 = sshll.u32 (%p491_p13), %s3699_s22, 4  ;;  %s2502_s7 = scalar_lea.sflag (%p491_p13), [#allocation5], %s3691_s8  ;;  %s5498_s6 = int_to_ptr.vmem [resolvable:$true] %s2515_s6 }
  0x74   : >> { %v3726_v20 = vld [vmem:[%s3711_s27 + $0x40] sm:$0xff]  ;;  %v3729_v21 = vld [vmem:[%s3711_s27 + $0x48] sm:$0xff]  ;;  %s3252_s14 = scalar_lea.vmem (%p491_p13), %s5498_s6, 2048  ;;  %s3324_s16 = smov (%p491_p13), [#allocation4]  }
  0x75   : >> { %v3732_v22 = vld [vmem:[%s3711_s27 + $0x60] sm:$0xff]  ;;  %v3735_v23 = vld [vmem:[%s3711_s27 + $0x68] sm:$0xff]  ;;  %p3253_p0 = scmp.ne.s32.totalorder (%p491_p13), %s5498_s6, %s3252_s14  ;;  %s3256_s17 = sshll.u32 (%p491_p13), %s3324_s16, 4  ;;  %s3257_s17 = int_to_ptr.vmem [resolvable:$false] %s3256_s17 }
  0x76   : >> { %v3738_v24 = vld [vmem:[%s3711_s27 + $0x80] sm:$0xff]  ;;  %v3741_v25 = vld [vmem:[%s3711_s27 + $0x88] sm:$0xff]  ;;  %s3258_s13 = scalar_lea.vmem (%p491_p13), %s3257_s17, 4096  ;;  %p3259_p3 = scmp.lt.s32.totalorder (%p491_p13), %s5498_s6, %s3257_s17 }
  0x77   : >> { %v3744_v26 = vld [vmem:[%s3711_s27 + $0xa0] sm:$0xff]  ;;  %v3747_v27 = vld [vmem:[%s3711_s27 + $0xa8] sm:$0xff]  ;;  %v519_v28 = vadd.f32 %v3738_v24, %v3714_v16  ;;  %v520_v32 = vadd.f32 %v3741_v25, %v3717_v17  ;;  %p3254_p1 = pnand (%p491_p13), %p3253_p0, %p3385_p6  ;;  %p3260_p4 = scmp.lt.s32.totalorder (%p491_p13), %s3258_s13, %s3252_s14 }
  0x78   : >> { %v3752_v29 = vld [vmem:[%s3711_s27 + $0xc0] sm:$0xff]  ;;  %v3755_v30 = vld [vmem:[%s3711_s27 + $0xc8] sm:$0xff]  ;;  %v521_v33 = vadd.f32 %v3744_v26, %v3720_v18  ;;  %v522_v34 = vadd.f32 %v3747_v27, %v3723_v19 }
  0x79   : >> { %v3758_v31 = vld [vmem:[%s3711_s27 + $0xe0] sm:$0xff]  ;;  %v3767_v35 = vld [vmem:[%s3711_s27 + $0xe8] sm:$0xff]  ;;  %v523_v36 = vadd.f32 %v3752_v29, %v3726_v20  ;;  %v524_v37 = vadd.f32 %v3755_v30, %v3729_v21  ;;  %p3255_p2 = pneg (%p491_p13), %p3254_p1  ;;  %p3261_p5 = por (%p491_p13), %p3260_p4, %p3259_p3 }
  0x7a   : >> { %v525_v38 = vadd.f32 %v3758_v31, %v3732_v22  ;;  %v3776_v39 = vld [vmem:[%s3711_s27 + $0x100] sm:$0xff]  ;;  %v3779_v40 = vld [vmem:[%s3711_s27 + $0x108] sm:$0xff]  ;;  %v526_v41 = vadd.f32 %v3767_v35, %v3735_v23 }
  0x7b   : >> { %v3784_v42 = vld [vmem:[%s3711_s27 + $0x120] sm:$0xff]  ;;  %v3787_v43 = vld [vmem:[%s3711_s27 + $0x128] sm:$0xff]  ;;  %v538_v45 = vadd.f32 %v3776_v39, %v519_v28  ;;  %v539_v46 = vadd.f32 %v3779_v40, %v520_v32  ;;  %p3262_p7 = pnand (%p491_p13), %p3261_p5, %p3255_p2 }
  0x7c   : >> { %v3790_v44 = vld [vmem:[%s3711_s27 + $0x140] sm:$0xff]  ;;  %v3795_v47 = vld [vmem:[%s3711_s27 + $0x148] sm:$0xff]  ;;  %v540_v50 = vadd.f32 %v3784_v42, %v521_v33  ;;  %v541_v51 = vadd.f32 %v3787_v43, %v522_v34 }
  0x7d   : >> { %v3798_v48 = vld [vmem:[%s3711_s27 + $0x160] sm:$0xff]  ;;  %v3801_v49 = vld [vmem:[%s3711_s27 + $0x168] sm:$0xff]  ;;  %v542_v52 = vadd.f32 %v3790_v44, %v523_v36  ;;  %v543_v53 = vadd.f32 %v3795_v47, %v524_v37 }
  0x7e   : >> { %5668 = vst [vmem:[#allocation7_spill] sm:$0xff] %v3798_v48  ;;  %5669 = vst [vmem:[#allocation8_spill] sm:$0xff] %v3801_v49  ;;  %v544_v54 = vadd.f32 %v3798_v48, %v525_v38  ;;  %v545_v55 = vadd.f32 %v3801_v49, %v526_v41  ;;  %v3810_v56 = vld [vmem:[%s3711_s27 + $0x180] sm:$0xff]  ;;  %v3813_v57 = vld [vmem:[%s3711_s27 + $0x188] sm:$0xff] }
  0x7f   : >> { %5670 = vst [vmem:[#allocation9_spill] sm:$0xff] %v3810_v56  ;;  %5671 = vst [vmem:[#allocation10_spill] sm:$0xff] %v3813_v57  ;;  %v3816_v58 = vld [vmem:[%s3711_s27 + $0x1a0] sm:$0xff]  ;;  %v3819_v59 = vld [vmem:[%s3711_s27 + $0x1a8] sm:$0xff]  ;;  %v557_v62 = vadd.f32 %v3810_v56, %v538_v45  ;;  %v558_v63 = vadd.f32 %v3813_v57, %v539_v46 }
  0x80   : >> { %5672 = vst [vmem:[#allocation11_spill] sm:$0xff] %v3816_v58  ;;  %5673 = vst [vmem:[#allocation12_spill] sm:$0xff] %v3819_v59  ;;  %v3822_v60 = vld [vmem:[%s3711_s27 + $0x1c0] sm:$0xff]  ;;  %v3825_v61 = vld [vmem:[%s3711_s27 + $0x1c8] sm:$0xff]  ;;  %v559_v0 = vadd.f32 %v3816_v58, %v540_v50  ;;  %v560_v3 = vadd.f32 %v3819_v59, %v541_v51 }
  0x81   : >> { %5674 = vst [vmem:[#allocation13_spill] sm:$0xff] %v3822_v60  ;;  %5675 = vst [vmem:[#allocation14_spill] sm:$0xff] %v3825_v61  ;;  %v3831_v1 = vld [vmem:[%s3711_s27 + $0x1e0] sm:$0xff]  ;;  %v3834_v2 = vld [vmem:[%s3711_s27 + $0x1e8] sm:$0xff]  ;;  %v561_v4 = vadd.f32 %v3822_v60, %v542_v52  ;;  %v562_v5 = vadd.f32 %v3825_v61, %v543_v53 }
  0x82   : >> { %5676 = vst [vmem:[#allocation15_spill] sm:$0xff] %v3831_v1  ;;  %5677 = vst [vmem:[#allocation16_spill] sm:$0xff] %v3834_v2  ;;  %v3840_v6 = vld [vmem:[%s3711_s27 + $0x200] sm:$0xff]  ;;  %v563_v7 = vadd.f32 %v3831_v1, %v544_v54  ;;  %v564_v8 = vadd.f32 %v3834_v2, %v545_v55  ;;  %v3845_v9 = vld [vmem:[%s3711_s27 + $0x208] sm:$0xff] }
  0x83   : >> { %5678 = vst [vmem:[#allocation17_spill] sm:$0xff] %v3840_v6  ;;  %5679 = vst [vmem:[#allocation18_spill] sm:$0xff] %v3845_v9  ;;  %v3848_v10 = vld [vmem:[%s3711_s27 + $0x220] sm:$0xff]  ;;  %v2679_v11 = vld [vmem:[%s3711_s27 + $0x228] sm:$0xff]  ;;  %v576_v12 = vadd.f32 %v3840_v6, %v557_v62  ;;  %v577_v28 = vadd.f32 %v3845_v9, %v558_v63 }
  0x84   : >> { %5680 = vst [vmem:[#allocation19_spill] sm:$0xff] %v3848_v10  ;;  %v2680_v13 = vld [vmem:[%s3711_s27 + $0x240] sm:$0xff]  ;;  %v2681_v14 = vld [vmem:[%s3711_s27 + $0x248] sm:$0xff]  ;;  %v578_v32 = vadd.f32 %v3848_v10, %v559_v0  ;;  %v579_v33 = vadd.f32 %v2679_v11, %v560_v3 }
  0x85   : >> { %v2682_v15 = vld [vmem:[%s3711_s27 + $0x260] sm:$0xff]  ;;  %v2683_v34 = vld [vmem:[%s3711_s27 + $0x268] sm:$0xff]  ;;  %v580_v36 = vadd.f32 %v2680_v13, %v561_v4  ;;  %v581_v37 = vadd.f32 %v2681_v14, %v562_v5 }
  0x86   : >> { %v582_v38 = vadd.f32 %v2682_v15, %v563_v7  ;;  %v2685_v41 = vld [vmem:[%s3711_s27 + $0x280] sm:$0xff]  ;;  %v2686_v45 = vld [vmem:[%s3711_s27 + $0x288] sm:$0xff]  ;;  %v583_v46 = vadd.f32 %v2683_v34, %v564_v8 }
  0x87   : >> { %v2687_v50 = vld [vmem:[%s3711_s27 + $0x2a0] sm:$0xff]  ;;  %v2688_v51 = vld [vmem:[%s3711_s27 + $0x2a8] sm:$0xff]  ;;  %v595_v53 = vadd.f32 %v2685_v41, %v576_v12  ;;  %v596_v54 = vadd.f32 %v2686_v45, %v577_v28 }
  0x88   : >> { %v2689_v52 = vld [vmem:[%s3711_s27 + $0x2c0] sm:$0xff]  ;;  %v2690_v55 = vld [vmem:[%s3711_s27 + $0x2c8] sm:$0xff]  ;;  %v597_v0 = vadd.f32 %v2687_v50, %v578_v32  ;;  %v598_v3 = vadd.f32 %v2688_v51, %v579_v33 }
  0x89   : >> { %v2691_v62 = vld [vmem:[%s3711_s27 + $0x2e0] sm:$0xff]  ;;  %v2692_v63 = vld [vmem:[%s3711_s27 + $0x2e8] sm:$0xff]  ;;  %v599_v4 = vadd.f32 %v2689_v52, %v580_v36  ;;  %v600_v5 = vadd.f32 %v2690_v55, %v581_v37 }
  0x8a   : >> { %v601_v7 = vadd.f32 %v2691_v62, %v582_v38  ;;  %v602_v8 = vadd.f32 %v2692_v63, %v583_v46  ;;  %v2694_v11 = vld [vmem:[%s3711_s27 + $0x300] sm:$0xff]  ;;  %v2695_v13 = vld [vmem:[%s3711_s27 + $0x308] sm:$0xff] }
  0x8b   : >> { %v2696_v14 = vld [vmem:[%s3711_s27 + $0x320] sm:$0xff]  ;;  %v2697_v12 = vld [vmem:[%s3711_s27 + $0x328] sm:$0xff]  ;;  %v614_v34 = vadd.f32 %v2694_v11, %v595_v53  ;;  %v615_v32 = vadd.f32 %v2695_v13, %v596_v54 }
  0x8c   : >> { %v2698_v15 = vld [vmem:[%s3711_s27 + $0x340] sm:$0xff]  ;;  %v2699_v28 = vld [vmem:[%s3711_s27 + $0x348] sm:$0xff]  ;;  %v616_v33 = vadd.f32 %v2696_v14, %v597_v0  ;;  %v617_v38 = vadd.f32 %v2697_v12, %v598_v3 }
  0x8d   : >> { %v2700_v36 = vld [vmem:[%s3711_s27 + $0x360] sm:$0xff]  ;;  %v2701_v37 = vld [vmem:[%s3711_s27 + $0x368] sm:$0xff]  ;;  %v618_v41 = vadd.f32 %v2698_v15, %v599_v4  ;;  %v619_v45 = vadd.f32 %v2699_v28, %v600_v5 }
  0x8e   : >> { %v2703_v46 = vld [vmem:[%s3711_s27 + $0x380] sm:$0xff]  ;;  %v620_v50 = vadd.f32 %v2700_v36, %v601_v7  ;;  %v621_v51 = vadd.f32 %v2701_v37, %v602_v8  ;;  %v2704_v52 = vld [vmem:[%s3711_s27 + $0x388] sm:$0xff] }
  0x8f   : >> { %v2705_v53 = vld [vmem:[%s3711_s27 + $0x3a0] sm:$0xff]  ;;  %v2706_v55 = vld [vmem:[%s3711_s27 + $0x3a8] sm:$0xff]  ;;  %v633_v54 = vadd.f32 %v2703_v46, %v614_v34  ;;  %v634_v3 = vadd.f32 %v2704_v52, %v615_v32 }
  0x90   : >> { %v2707_v62 = vld [vmem:[%s3711_s27 + $0x3c0] sm:$0xff]  ;;  %v2708_v63 = vld [vmem:[%s3711_s27 + $0x3c8] sm:$0xff]  ;;  %v635_v4 = vadd.f32 %v2705_v53, %v616_v33  ;;  %v636_v5 = vadd.f32 %v2706_v55, %v617_v38 }
  0x91   : >> { %v2709_v0 = vld [vmem:[%s3711_s27 + $0x3e0] sm:$0xff]  ;;  %v2710_v11 = vld [vmem:[%s3711_s27 + $0x3e8] sm:$0xff]  ;;  %v637_v13 = vadd.f32 %v2707_v62, %v618_v41  ;;  %v638_v7 = vadd.f32 %v2708_v63, %v619_v45  ;;  %v641_v14 = vmul.f32 0.25, %v633_v54  ;;  %v642_v34 = vmul.f32 0.25, %v634_v3 }
  0x92   : >> { %v639_v8 = vadd.f32 %v2709_v0, %v620_v50  ;;  %v3887_v12 = vld [vmem:[%s3877_s28] sm:$0xff]  ;;  %v3890_v15 = vld [vmem:[%s3877_s28 + $0x8] sm:$0xff]  ;;  %v640_v28 = vadd.f32 %v2710_v11, %v621_v51  ;;  %v643_v36 = vmul.f32 0.25, %v635_v4  ;;  %v644_v37 = vmul.f32 0.25, %v636_v5 }
  0x93   : >> { %5681 = vst [vmem:[#allocation20_spill] sm:$0xff] %v3887_v12  ;;  %5682 = vst [vmem:[#allocation21_spill] sm:$0xff] %v3890_v15  ;;  %v3893_v32 = vld [vmem:[%s3877_s28 + $0x20] sm:$0xff]  ;;  %v3896_v33 = vld [vmem:[%s3877_s28 + $0x28] sm:$0xff]  ;;  %v645_v41 = vmul.f32 0.25, %v637_v13  ;;  %v646_v45 = vmul.f32 0.25, %v638_v7  ;;  %v3911_v51 = vadd.f32 %v3887_v12, %v641_v14  ;;  %v3914_v54 = vadd.f32 %v3890_v15, %v642_v34 }
  0x94   : >> { %5683 = vst [vmem:[#allocation22_spill] sm:$0xff] %v3893_v32  ;;  %5684 = vst [vmem:[#allocation23_spill] sm:$0xff] %v3896_v33  ;;  %v3899_v38 = vld [vmem:[%s3877_s28 + $0x40] sm:$0xff]  ;;  %v647_v46 = vmul.f32 0.25, %v639_v8  ;;  %v3902_v50 = vld [vmem:[%s3877_s28 + $0x48] sm:$0xff]  ;;  %v648_v55 = vmul.f32 0.25, %v640_v28  ;;  %v3917_v62 = vadd.f32 %v3893_v32, %v643_v36  ;;  %v3920_v63 = vadd.f32 %v3896_v33, %v644_v37 }
  0x95   : >> { %5685 = vst [vmem:[#allocation24_spill] sm:$0xff] %v3899_v38  ;;  %5686 = vst [vmem:[#allocation25_spill] sm:$0xff] %v3902_v50  ;;  %v3905_v52 = vld [vmem:[%s3877_s28 + $0x60] sm:$0xff]  ;;  %v3908_v53 = vld [vmem:[%s3877_s28 + $0x68] sm:$0xff]  ;;  %v3923_v0 = vadd.f32 %v3899_v38, %v645_v41  ;;  %v3926_v3 = vadd.f32 %v3902_v50, %v646_v45  ;;  %v667_v5 = vmul.f32 %v3911_v51, %v3911_v51 }
  0x96   : >> { %5687 = vst [vmem:[#allocation26_spill] sm:$0xff] %v3905_v52  ;;  %5688 = vst [vmem:[#allocation27_spill] sm:$0xff] %v3908_v53  ;;  %v3929_v4 = vadd.f32 %v3905_v52, %v647_v46  ;;  %v3934_v11 = vadd.f32 %v3908_v53, %v648_v55  ;;  %v668_v13 = vmul.f32 %v3914_v54, %v3914_v54 }
  0x97   : >> { %v669_v7 = vmul.f32 %v3917_v62, %v3917_v62  ;;  %v670_v8 = vmul.f32 %v3920_v63, %v3920_v63  ;;  %v671_v14 = vmul.f32 %v3923_v0, %v3923_v0  ;;  %v672_v28 = vmul.f32 %v3926_v3, %v3926_v3 }
  0x98   : >> { %v673_v34 = vmul.f32 %v3929_v4, %v3929_v4  ;;  %v675_v36 = vrot.slane %v667_v5, 4  ;;  %v674_v37 = vmul.f32 %v3934_v11, %v3934_v11  ;;  %v681_v41 = vrot.slane %v668_v13, 4 }
  0x99   : >> { %v687_v45 = vrot.slane %v669_v7, 4  ;;  %v693_v46 = vrot.slane %v670_v8, 4  ;;  %v699_v9 = vrot.slane %v671_v14, 4  ;;  %v705_v10 = vrot.slane %v672_v28, 4 }
  0x9a   : >> { %v676_v55 = vadd.f32 %v675_v36, %v667_v5  ;;  %v711_v6 = vrot.slane %v673_v34, 4  ;;  %v682_v53 = vadd.f32 %v681_v41, %v668_v13  ;;  %v717_v15 = vrot.slane %v674_v37, 4 }
  0x9b   : >> { %v688_v50 = vadd.f32 %v687_v45, %v669_v7  ;;  %v694_v33 = vadd.f32 %v693_v46, %v670_v8  ;;  %v700_v38 = vadd.f32 %v699_v9, %v671_v14  ;;  %v706_v32 = vadd.f32 %v705_v10, %v672_v28 }
  0x9c   : >> { %v677_v52 = vrot.slane %v676_v55, 2  ;;  %v712_v12 = vadd.f32 %v711_v6, %v673_v34  ;;  %v683_v2 = vrot.slane %v682_v53, 2  ;;  %v718_v60 = vadd.f32 %v717_v15, %v674_v37 }
  0x9d   : >> { %v689_v1 = vrot.slane %v688_v50, 2  ;;  %v695_v61 = vrot.slane %v694_v33, 2  ;;  %v701_v57 = vrot.slane %v700_v38, 2  ;;  %v707_v58 = vrot.slane %v706_v32, 2 }
  0x9e   : >> { %v678_v59 = vadd.f32 %v677_v52, %v676_v55  ;;  %v713_v56 = vrot.slane %v712_v12, 2  ;;  %v684_v5 = vadd.f32 %v683_v2, %v682_v53  ;;  %v719_v48 = vrot.slane %v718_v60, 2 }
  0x9f   : >> { %v690_v36 = vadd.f32 %v689_v1, %v688_v50  ;;  %v696_v49 = vadd.f32 %v695_v61, %v694_v33  ;;  %v702_v7 = vadd.f32 %v701_v57, %v700_v38  ;;  %v708_v8 = vadd.f32 %v707_v58, %v706_v32 }
  0xa0   : >> { %v679_v13 = vrot.slane %v678_v59, 1  ;;  %v714_v41 = vadd.f32 %v713_v56, %v712_v12  ;;  %v685_v45 = vrot.slane %v684_v5, 1  ;;  %v720_v6 = vadd.f32 %v719_v48, %v718_v60 }
  0xa1   : >> { %v691_v9 = vrot.slane %v690_v36, 1  ;;  %v697_v10 = vrot.slane %v696_v49, 1  ;;  %v703_v28 = vrot.slane %v702_v7, 1  ;;  %v709_v34 = vrot.slane %v708_v8, 1 }
  0xa2   : >> { %v680_v14 = vadd.f32 %v679_v13, %v678_v59  ;;  %v715_v15 = vrot.slane %v714_v41, 1  ;;  %v686_v52 = vadd.f32 %v685_v45, %v684_v5  ;;  %v721_v55 = vrot.slane %v720_v6, 1 }
  0xa3   : >> { %v692_v37 = vadd.f32 %v691_v9, %v690_v36  ;;  %v698_v46 = vadd.f32 %v697_v10, %v696_v49  ;;  %v704_v2 = vadd.f32 %v703_v28, %v702_v7  ;;  %v710_v1 = vadd.f32 %v709_v34, %v708_v8 }
  0xa4   : >> { %v716_v61 = vadd.f32 %v715_v15, %v714_v41  ;;  %v723_v33 = vmax.f32 %v680_v14, 1e-24  ;;  %v722_v50 = vadd.f32 %v721_v55, %v720_v6  ;;  %v724_v57 = vmax.f32 %v686_v52, 1e-24 }
  0xa5   : >> { %v725_v58 = vmax.f32 %v692_v37, 1e-24  ;;  %v726_v56 = vmax.f32 %v698_v46, 1e-24  ;;  %v727_v12 = vmax.f32 %v704_v2, 1e-24 }
  0xa6   : >> { %2771 = vrsqrt.f32 %v723_v33  ;;  %v728_v32 = vmax.f32 %v710_v1, 1e-24  ;;  %v729_v48 = vmax.f32 %v716_v61, 1e-24  ;;  %v730_v59 = vmax.f32 %v722_v50, 1e-24 }
  0xa7   : >> { %2773 = vrsqrt.f32 %v724_v57 }
  0xa8   : >> { %2775 = vrsqrt.f32 %v725_v58 }
  0xa9   : >> { %2777 = vrsqrt.f32 %v726_v56 }
  0xaa   : >> { %2779 = vrsqrt.f32 %v727_v12 }
  0xab   : >> { %2781 = vrsqrt.f32 %v728_v32 }
  0xac   : >> { %2783 = vrsqrt.f32 %v729_v48 }
  0xad   : >> { %2785 = vrsqrt.f32 %v730_v59 }
  0xb0   : >> { %v2772_v49 = vpop.eup %2771 }
  0xb1   : >> { %v2774_v60 = vpop.eup %2773  ;;  %v3951_v38 = vmul.f32 %v2772_v49, %v3911_v51 }
  0xb2   : >> { %v2776_v53 = vpop.eup %2775  ;;  %v3954_v5 = vmul.f32 %v2774_v60, %v3914_v54 }
  0xb3   : >> { %v2778_v36 = vpop.eup %2777  ;;  %v3957_v13 = vmul.f32 %v2776_v53, %v3917_v62  ;;  %v747_v7 = vmul.f32 %v3951_v38, %v3714_v16 }
  0xb4   : >> { %v2780_v8 = vpop.eup %2779  ;;  %v3962_v41 = vmul.f32 %v2778_v36, %v3920_v63  ;;  %v748_v45 = vmul.f32 %v3954_v5, %v3717_v17 }
  0xb5   : >> { %v2782_v51 = vpop.eup %2781  ;;  %v3967_v9 = vmul.f32 %v2780_v8, %v3923_v0  ;;  %v749_v54 = vmul.f32 %v3957_v13, %v3720_v18  ;;  %v755_v10 = vrot.slane %v747_v7, 4 }
  0xb6   : >> { %v2784_v62 = vpop.eup %2783  ;;  %v3972_v6 = vmul.f32 %v2782_v51, %v3926_v3  ;;  %v750_v14 = vmul.f32 %v3962_v41, %v3723_v19  ;;  %v761_v63 = vrot.slane %v748_v45, 4 }
  0xb7   : >> { %v2786_v28 = vpop.eup %2785  ;;  %v3977_v34 = vmul.f32 %v2784_v62, %v3929_v4  ;;  %v751_v0 = vmul.f32 %v3967_v9, %v3726_v20  ;;  %v756_v15 = vadd.f32 %v755_v10, %v747_v7  ;;  %v767_v52 = vrot.slane %v749_v54, 4 }
  0xb8   : >> { %v3982_v37 = vmul.f32 %v2786_v28, %v3934_v11  ;;  %v752_v3 = vmul.f32 %v3972_v6, %v3729_v21  ;;  %v762_v46 = vadd.f32 %v761_v63, %v748_v45  ;;  %v773_v55 = vrot.slane %v750_v14, 4 }
  0xb9   : >> { %5689 = vst [vmem:[#allocation28_spill] sm:$0xff] %v3977_v34  ;;  %v753_v2 = vmul.f32 %v3977_v34, %v3732_v22  ;;  %v757_v1 = vrot.slane %v756_v15, 2  ;;  %v768_v61 = vadd.f32 %v767_v52, %v749_v54  ;;  %v779_v4 = vrot.slane %v751_v0, 4 }
  0xba   : >> { %v754_v33 = vmul.f32 %v3982_v37, %v3735_v23  ;;  %v763_v50 = vrot.slane %v762_v46, 2  ;;  %v774_v57 = vadd.f32 %v773_v55, %v750_v14  ;;  %v785_v58 = vrot.slane %v752_v3, 4 }
  0xbb   : >> { %v769_v56 = vrot.slane %v768_v61, 2  ;;  %v780_v11 = vadd.f32 %v779_v4, %v751_v0  ;;  %v791_v12 = vrot.slane %v753_v2, 4  ;;  %v758_v32 = vadd.f32 %v757_v1, %v756_v15 }
  0xbc   : >> { %v775_v48 = vrot.slane %v774_v57, 2  ;;  %v786_v59 = vadd.f32 %v785_v58, %v752_v3  ;;  %v797_v49 = vrot.slane %v754_v33, 4  ;;  %v764_v7 = vadd.f32 %v763_v50, %v762_v46 }
  0xbd   : >> { %v770_v60 = vadd.f32 %v769_v56, %v768_v61  ;;  %v781_v53 = vrot.slane %v780_v11, 2  ;;  %v792_v36 = vadd.f32 %v791_v12, %v753_v2  ;;  %v759_v54 = vrot.slane %v758_v32, 1 }
  0xbe   : >> { %v787_v8 = vrot.slane %v786_v59, 2  ;;  %v776_v45 = vadd.f32 %v775_v48, %v774_v57  ;;  %v798_v51 = vadd.f32 %v797_v49, %v754_v33  ;;  %v765_v14 = vrot.slane %v764_v7, 1 }
  0xbf   : >> { %v771_v10 = vrot.slane %v770_v60, 1  ;;  %v782_v62 = vadd.f32 %v781_v53, %v780_v11  ;;  %v793_v63 = vrot.slane %v792_v36, 2  ;;  %v760_v55 = vadd.f32 %v759_v54, %v758_v32 }
  0xc0   : >> { %v788_v28 = vadd.f32 %v787_v8, %v786_v59  ;;  %v777_v52 = vrot.slane %v776_v45, 1  ;;  %v799_v0 = vrot.slane %v798_v51, 2  ;;  %v766_v4 = vadd.f32 %v765_v14, %v764_v7 }
  0xc1   : >> { %v772_v15 = vadd.f32 %v771_v10, %v770_v60  ;;  %v783_v1 = vrot.slane %v782_v62, 1  ;;  %v794_v3 = vadd.f32 %v793_v63, %v792_v36  ;;  %v803_v46 = vmul.f32 1.442695, %v760_v55 }
  0xc2   : >> { %v789_v61 = vrot.slane %v788_v28, 1  ;;  %v778_v58 = vadd.f32 %v777_v52, %v776_v45  ;;  %v800_v2 = vadd.f32 %v799_v0, %v798_v51  ;;  %v805_v12 = vmul.f32 1.442695, %v766_v4 }
  0xc3   : >> { %v784_v50 = vadd.f32 %v783_v1, %v782_v62  ;;  %v795_v57 = vrot.slane %v794_v3, 1  ;;  %v807_v33 = vmul.f32 1.442695, %v772_v15  ;;  %v851_v59 = vmul.f32 %v3738_v24, %v3951_v38 }
  0xc4   : >> { %v790_v56 = vadd.f32 %v789_v61, %v788_v28  ;;  %v801_v11 = vrot.slane %v800_v2, 1  ;;  %v809_v48 = vmul.f32 1.442695, %v778_v58  ;;  %2787 = vpow2.f32 %v803_v46 }
  0xc5   : >> { %v853_v32 = vmul.f32 %v3744_v26, %v3957_v13  ;;  %v796_v49 = vadd.f32 %v795_v57, %v794_v3  ;;  %2789 = vpow2.f32 %v807_v33  ;;  %v811_v60 = vmul.f32 1.442695, %v784_v50 }
  0xc6   : >> { %2791 = vpow2.f32 %v805_v12  ;;  %v813_v53 = vmul.f32 1.442695, %v790_v56  ;;  %v852_v36 = vmul.f32 %v3741_v25, %v3954_v5  ;;  %v854_v7 = vmul.f32 %v3747_v27, %v3962_v41 }
  0xc7   : >> { %v802_v8 = vadd.f32 %v801_v11, %v800_v2  ;;  %2793 = vpow2.f32 %v809_v48  ;;  %v855_v24 = vmul.f32 %v3752_v29, %v3967_v9  ;;  %v859_v45 = vrot.slane %v851_v59, 4 }
  0xc8   : >> { %v871_v51 = vrot.slane %v853_v32, 4  ;;  %2795 = vpow2.f32 %v811_v60  ;;  %v815_v26 = vmul.f32 1.442695, %v796_v49  ;;  %v856_v54 = vmul.f32 %v3755_v30, %v3972_v6 }
  0xc9   : >> { %2797 = vpow2.f32 %v813_v53  ;;  %v857_v10 = vmul.f32 %v3758_v31, %v3977_v34  ;;  %v865_v25 = vrot.slane %v852_v36, 4  ;;  %v817_v62 = vmul.f32 1.442695, %v802_v8 }
  0xca   : >> { %v860_v63 = vadd.f32 %v859_v45, %v851_v59  ;;  %v877_v27 = vrot.slane %v854_v7, 4  ;;  %v883_v14 = vrot.slane %v855_v24, 4  ;;  %v858_v28 = vmul.f32 %v3767_v35, %v3982_v37 }
  0xcb   : >> { %v872_v29 = vadd.f32 %v871_v51, %v853_v32  ;;  %2799 = vpow2.f32 %v815_v26  ;;  %v889_v52 = vrot.slane %v856_v54, 4  ;;  %v866_v55 = vadd.f32 %v865_v25, %v852_v36 }
  0xcc   : >> { %v895_v15 = vrot.slane %v857_v10, 4  ;;  %2801 = vpow2.f32 %v817_v62  ;;  %v861_v1 = vrot.slane %v860_v63, 2  ;;  %v878_v31 = vadd.f32 %v877_v27, %v854_v7 }
  0xcd   : >> { %v884_v3 = vadd.f32 %v883_v14, %v855_v24  ;;  %v873_v61 = vrot.slane %v872_v29, 2  ;;  %v901_v58 = vrot.slane %v858_v28, 4  ;;  %v890_v35 = vadd.f32 %v889_v52, %v856_v54 }
  0xce   : >> { %v4006_v0 = vpop.eup %2787  ;;  %v867_v50 = vrot.slane %v866_v55, 2  ;;  %v896_v57 = vadd.f32 %v895_v15, %v857_v10  ;;  %v862_v56 = vadd.f32 %v861_v1, %v860_v63  ;;  %v879_v12 = vrot.slane %v878_v31, 2 }
  0xcf   : >> { %v4008_v30 = vpop.eup %2789  ;;  %v885_v11 = vrot.slane %v884_v3, 2  ;;  %v874_v32 = vadd.f32 %v873_v61, %v872_v29  ;;  %v902_v49 = vadd.f32 %v901_v58, %v858_v28  ;;  %v891_v60 = vrot.slane %v890_v35, 2 }
  0xd0   : >> { %v4010_v4 = vpop.eup %2791  ;;  %v819_v46 = vadd.f32 %v4008_v30, %v4006_v0  ;;  %v868_v36 = vadd.f32 %v867_v50, %v866_v55  ;;  %v897_v7 = vrot.slane %v896_v57, 2  ;;  %v863_v24 = vrot.slane %v862_v56, 1 }
  0xd1   : >> { %v4012_v2 = vpop.eup %2793  ;;  %v880_v45 = vadd.f32 %v879_v12, %v878_v31  ;;  %v886_v51 = vadd.f32 %v885_v11, %v884_v3  ;;  %v875_v54 = vrot.slane %v874_v32, 1  ;;  %v903_v10 = vrot.slane %v902_v49, 2 }
  0xd2   : >> { %v4016_v33 = vpop.eup %2795  ;;  %v822_v59 = vadd.f32 %v4012_v2, %v4010_v4  ;;  %v892_v62 = vadd.f32 %v891_v60, %v890_v35  ;;  %v869_v27 = vrot.slane %v868_v36, 1  ;;  %v898_v14 = vadd.f32 %v897_v7, %v896_v57 }
  0xd3   : >> { %v4018_v48 = vpop.eup %2797  ;;  %v820_v53 = vadd.f32 %v4016_v33, %v819_v46  ;;  %v864_v28 = vadd.f32 %v863_v24, %v862_v56  ;;  %v881_v29 = vrot.slane %v880_v45, 1  ;;  %v887_v52 = vrot.slane %v886_v51, 1 }
  0xd4   : >> { %v823_v26 = vadd.f32 %v4018_v48, %v822_v59  ;;  %v876_v15 = vadd.f32 %v875_v54, %v874_v32  ;;  %v904_v1 = vadd.f32 %v903_v10, %v902_v49  ;;  %v893_v31 = vrot.slane %v892_v62, 1 }
  0xd5   : >> { %v4023_v8 = vpop.eup %2799  ;;  %v955_v3 = vmul.f32 %v3776_v39, %v3951_v38  ;;  %v870_v61 = vadd.f32 %v869_v27, %v868_v36  ;;  %v899_v58 = vrot.slane %v898_v14, 1  ;;  %v957_v35 = vmul.f32 %v3784_v42, %v3957_v13 }
  0xd6   : >> { %v4026_v25 = vpop.eup %2801  ;;  %v821_v63 = vadd.f32 %v4023_v8, %v820_v53  ;;  %v882_v46 = vadd.f32 %v881_v29, %v880_v45  ;;  %v888_v50 = vadd.f32 %v887_v52, %v886_v51  ;;  %v907_v57 = vmul.f32 1.442695, %v864_v28 }
  0xd7   : >> { %v824_v55 = vadd.f32 %v4026_v25, %v823_v26  ;;  %v956_v56 = vmul.f32 %v3779_v40, %v3954_v5  ;;  %v905_v12 = vrot.slane %v904_v1, 1  ;;  %v911_v11 = vmul.f32 1.442695, %v876_v15 }
  0xd8   : >> { %2803 = vrcp.f32 %v821_v63  ;;  %v958_v59 = vmul.f32 %v3787_v43, %v3962_v41  ;;  %v894_v32 = vadd.f32 %v893_v31, %v892_v62  ;;  %v959_v39 = vmul.f32 %v3790_v44, %v3967_v9  ;;  %v5690_v62 = vld [vmem:[#allocation7_spill] sm:$0xff] }
  0xd9   : >> { %2805 = vrcp.f32 %v824_v55  ;;  %v963_v49 = vrot.slane %v955_v3, 4  ;;  %v900_v60 = vadd.f32 %v899_v58, %v898_v14  ;;  %v909_v53 = vmul.f32 1.442695, %v870_v61 }
  0xda   : >> { %v975_v42 = vrot.slane %v957_v35, 4  ;;  %2807 = vpow2.f32 %v907_v57  ;;  %v913_v36 = vmul.f32 1.442695, %v882_v46  ;;  %v969_v7 = vrot.slane %v956_v56, 4 }
  0xdb   : >> { %v906_v24 = vadd.f32 %v905_v12, %v904_v1  ;;  %2809 = vpow2.f32 %v911_v11  ;;  %v915_v40 = vmul.f32 1.442695, %v888_v50  ;;  %v981_v45 = vrot.slane %v958_v59, 4  ;;  %v5691_v1 = vld [vmem:[#allocation8_spill] sm:$0xff] }
  0xdc   : >> { %v917_v51 = vmul.f32 1.442695, %v894_v32  ;;  %v964_v26 = vadd.f32 %v963_v49, %v955_v3  ;;  %v987_v54 = vrot.slane %v959_v39, 4  ;;  %2811 = vpow2.f32 %v909_v53 }
  0xdd   : >> { %v919_v43 = vmul.f32 1.442695, %v900_v60  ;;  %v960_v10 = vmul.f32 %v3795_v47, %v3972_v6  ;;  %v976_v44 = vadd.f32 %v975_v42, %v957_v35  ;;  %2813 = vpow2.f32 %v913_v36 }
  0xde   : >> { %v961_v63 = vmul.f32 %v5690_v62, %v3977_v34  ;;  %v970_v27 = vadd.f32 %v969_v7, %v956_v56  ;;  %2815 = vpow2.f32 %v915_v40  ;;  %v921_v28 = vmul.f32 1.442695, %v906_v24 }
  0xdf   : >> { %v982_v29 = vadd.f32 %v981_v45, %v958_v59  ;;  %2817 = vpow2.f32 %v917_v51  ;;  %v965_v52 = vrot.slane %v964_v26, 2  ;;  %v988_v55 = vadd.f32 %v987_v54, %v959_v39 }
  0xe0   : >> { %2819 = vpow2.f32 %v919_v43  ;;  %v962_v31 = vmul.f32 %v5691_v1, %v3982_v37  ;;  %v977_v3 = vrot.slane %v976_v44, 2  ;;  %v993_v47 = vrot.slane %v960_v10, 4 }
  0xe1   : >> { %v971_v35 = vrot.slane %v970_v27, 2  ;;  %v999_v46 = vrot.slane %v961_v63, 4  ;;  %2821 = vpow2.f32 %v921_v28  ;;  %v983_v56 = vrot.slane %v982_v29, 2  ;;  %v5694_v28 = vld [vmem:[#allocation10_spill] sm:$0xff] }
  0xe2   : >> { %v2804_v14 = vpop.eup %2803  ;;  %v966_v32 = vadd.f32 %v965_v52, %v964_v26  ;;  %v989_v39 = vrot.slane %v988_v55, 2  ;;  %v978_v60 = vadd.f32 %v977_v3, %v976_v44  ;;  %v1060_v52 = vmul.f32 %v5694_v28, %v3954_v5 }
  0xe3   : >> { %v2806_v15 = vpop.eup %2805  ;;  %v827_v61 = vmul.f32 %v2804_v14, %v4006_v0  ;;  %v829_v58 = vmul.f32 %v2804_v14, %v4008_v30  ;;  %v831_v50 = vmul.f32 %v2804_v14, %v4016_v33  ;;  %v833_v57 = vmul.f32 %v2804_v14, %v4023_v8 }
  0xe4   : >> { %v4050_v12 = vpop.eup %2807  ;;  %v828_v11 = vmul.f32 %v2806_v15, %v4010_v4  ;;  %v830_v59 = vmul.f32 %v2806_v15, %v4012_v2  ;;  %v832_v0 = vmul.f32 %v2806_v15, %v4018_v48  ;;  %v834_v30 = vmul.f32 %v2806_v15, %v4026_v25  ;;  %v5692_v25 = vld [vmem:[#allocation9_spill] sm:$0xff] }
  0xe5   : >> { %v4054_v49 = vpop.eup %2809  ;;  %v994_v33 = vadd.f32 %v993_v47, %v960_v10  ;;  %v4059_v8 = vmul.f32 %v827_v61, %v3714_v16  ;;  %v4062_v53 = vmul.f32 %v829_v58, %v3720_v18  ;;  %v972_v42 = vadd.f32 %v971_v35, %v970_v27  ;;  %v5696_v47 = vld [vmem:[#allocation13_spill] sm:$0xff] }
  0xe6   : >> { %v1000_v4 = vadd.f32 %v999_v46, %v961_v63  ;;  %v4064_v36 = vpop.eup %2811  ;;  %v4067_v2 = vmul.f32 %v831_v50, %v3726_v20  ;;  %v4070_v7 = vmul.f32 %v833_v57, %v3732_v22  ;;  %v1005_v48 = vrot.slane %v962_v31, 4 }
  0xe7   : >> { %v1059_v24 = vmul.f32 %v5692_v25, %v3951_v38  ;;  %v4074_v40 = vpop.eup %2813  ;;  %v4077_v16 = vmul.f32 %v828_v11, %v3717_v17  ;;  %v4080_v18 = vmul.f32 %v830_v59, %v3723_v19  ;;  %v923_v45 = vadd.f32 %v4054_v49, %v4050_v12  ;;  %v5693_v19 = vld [vmem:[#allocation11_spill] sm:$0xff]  ;;  %v5697_v25 = vld [vmem:[#allocation14_spill] sm:$0xff] }
  0xe8   : >> { %v967_v20 = vrot.slane %v966_v32, 1  ;;  %v4084_v51 = vpop.eup %2815  ;;  %v4087_v22 = vmul.f32 %v832_v0, %v3729_v21  ;;  %v979_v26 = vrot.slane %v978_v60, 1  ;;  %v984_v54 = vadd.f32 %v983_v56, %v982_v29  ;;  %v5695_v21 = vld [vmem:[#allocation12_spill] sm:$0xff] }
  0xe9   : >> { %v995_v43 = vrot.slane %v994_v33, 2  ;;  %v4089_v10 = vpop.eup %2817  ;;  %v973_v44 = vrot.slane %v972_v42, 1  ;;  %v990_v17 = vadd.f32 %v989_v39, %v988_v55  ;;  %v1001_v62 = vrot.slane %v1000_v4, 2 }
  0xea   : >> { %v1061_v63 = vmul.f32 %v5693_v19, %v3957_v13  ;;  %v4093_v27 = vpop.eup %2819  ;;  %v1006_v14 = vadd.f32 %v1005_v48, %v962_v31  ;;  %v1062_v15 = vmul.f32 %v5695_v21, %v3962_v41  ;;  %v1067_v1 = vrot.slane %v1059_v24, 4 }
  0xeb   : >> { %v4100_v29 = vmul.f32 %v834_v30, %v3735_v23  ;;  %v924_v3 = vadd.f32 %v4084_v51, %v923_v45  ;;  %v968_v55 = vadd.f32 %v967_v20, %v966_v32  ;;  %v1063_v61 = vmul.f32 %v5696_v47, %v3967_v9  ;;  %v4105_v58 = vpop.eup %2821 }
  0xec   : >> { %v926_v31 = vadd.f32 %v4074_v40, %v4064_v36  ;;  %v980_v35 = vadd.f32 %v979_v26, %v978_v60  ;;  %v985_v46 = vrot.slane %v984_v54, 1  ;;  %v996_v50 = vadd.f32 %v995_v43, %v994_v33  ;;  %v5698_v33 = vld [vmem:[#allocation15_spill] sm:$0xff] }
  0xed   : >> { %v974_v57 = vadd.f32 %v973_v44, %v972_v42  ;;  %v991_v56 = vrot.slane %v990_v17, 1  ;;  %v1002_v11 = vadd.f32 %v1001_v62, %v1000_v4  ;;  %v1079_v59 = vrot.slane %v1061_v63, 4 }
  0xee   : >> { %v1007_v23 = vrot.slane %v1006_v14, 2  ;;  %v1068_v39 = vadd.f32 %v1067_v1, %v1059_v24  ;;  %v1073_v0 = vrot.slane %v1060_v52, 4  ;;  %v1085_v30 = vrot.slane %v1062_v15, 4 }
  0xef   : >> { %v925_v32 = vadd.f32 %v4093_v27, %v924_v3  ;;  %v1011_v48 = vmul.f32 1.442695, %v968_v55  ;;  %v1064_v45 = vmul.f32 %v5697_v25, %v3972_v6  ;;  %v1091_v20 = vrot.slane %v1063_v61, 4  ;;  %v5699_v3 = vld [vmem:[#allocation16_spill] sm:$0xff] }
  0xf0   : >> { %v986_v19 = vadd.f32 %v985_v46, %v984_v54  ;;  %v997_v28 = vrot.slane %v996_v50, 1  ;;  %v1015_v60 = vmul.f32 1.442695, %v980_v35  ;;  %v1065_v42 = vmul.f32 %v5698_v33, %v3977_v34 }
  0xf1   : >> { %v992_v26 = vadd.f32 %v991_v56, %v990_v17  ;;  %v1003_v4 = vrot.slane %v1002_v11, 1  ;;  %v1013_v43 = vmul.f32 1.442695, %v974_v57  ;;  %v1080_v44 = vadd.f32 %v1079_v59, %v1061_v63 }
  0xf2   : >> { %v1008_v24 = vadd.f32 %v1007_v23, %v1006_v14  ;;  %v1069_v62 = vrot.slane %v1068_v39, 2  ;;  %v1074_v21 = vadd.f32 %v1073_v0, %v1060_v52  ;;  %v1086_v1 = vadd.f32 %v1085_v30, %v1062_v15  ;;  %v5700_v0 = vld [vmem:[#allocation20_spill] sm:$0xff] }
  0xf3   : >> { %2823 = vpow2.f32 %v1011_v48  ;;  %v1066_v55 = vmul.f32 %v5699_v3, %v3982_v37  ;;  %v1092_v47 = vadd.f32 %v1091_v20, %v1063_v61  ;;  %v1097_v25 = vrot.slane %v1064_v45, 4 }
  0xf4   : >> { %v998_v54 = vadd.f32 %v997_v28, %v996_v50  ;;  %2825 = vpow2.f32 %v1015_v60  ;;  %v1017_v35 = vmul.f32 1.442695, %v986_v19  ;;  %v1103_v46 = vrot.slane %v1065_v42, 4  ;;  %v5701_v60 = vld [vmem:[#allocation22_spill] sm:$0xff] }
  0xf5   : >> { %2827 = vrcp.f32 %v925_v32  ;;  %v1004_v33 = vadd.f32 %v1003_v4, %v1002_v11  ;;  %v1019_v17 = vmul.f32 1.442695, %v992_v26  ;;  %v1081_v56 = vrot.slane %v1080_v44, 2 }
  0xf6   : >> { %v1009_v57 = vrot.slane %v1008_v24, 1  ;;  %v1070_v63 = vadd.f32 %v1069_v62, %v1068_v39  ;;  %v1075_v14 = vrot.slane %v1074_v21, 2  ;;  %v1087_v59 = vrot.slane %v1086_v1, 2 }
  0xf7   : >> { %2829 = vpow2.f32 %v1013_v43  ;;  %v1093_v52 = vrot.slane %v1092_v47, 2  ;;  %v1098_v15 = vadd.f32 %v1097_v25, %v1064_v45  ;;  %v1109_v23 = vrot.slane %v1066_v55, 4  ;;  %v5702_v43 = vld [vmem:[#allocation24_spill] sm:$0xff] }
  0xf8   : >> { %v4118_v61 = vadd.f32 %v4059_v8, %v5700_v0  ;;  %2831 = vpow2.f32 %v1017_v35  ;;  %v1021_v50 = vmul.f32 1.442695, %v998_v54  ;;  %v1104_v30 = vadd.f32 %v1103_v46, %v1065_v42  ;;  %v5703_v42 = vld [vmem:[#allocation26_spill] sm:$0xff]  ;;  %v5705_v35 = vld [vmem:[#allocation23_spill] sm:$0xff] }
  0xf9   : >> { %v927_v32 = vadd.f32 %v4089_v10, %v926_v31  ;;  %2833 = vpow2.f32 %v1019_v17  ;;  %v1023_v11 = vmul.f32 1.442695, %v1004_v33  ;;  %v1082_v48 = vadd.f32 %v1081_v56, %v1080_v44  ;;  %v5706_v56 = vld [vmem:[#allocation25_spill] sm:$0xff] }
  0xfa   : >> { %v1010_v20 = vadd.f32 %v1009_v57, %v1008_v24  ;;  %v1071_v39 = vrot.slane %v1070_v63, 1  ;;  %v1076_v19 = vadd.f32 %v1075_v14, %v1074_v21  ;;  %v1088_v28 = vadd.f32 %v1087_v59, %v1086_v1  ;;  %v5704_v21 = vld [vmem:[#allocation21_spill] sm:$0xff]  ;;  %v5707_v14 = vld [vmem:[#allocation27_spill] sm:$0xff] }
  0xfb   : >> { %v4123_v45 = vadd.f32 %v4062_v53, %v5701_v60  ;;  %v1094_v26 = vadd.f32 %v1093_v52, %v1092_v47  ;;  %v1099_v4 = vrot.slane %v1098_v15, 2  ;;  %v1110_v8 = vadd.f32 %v1109_v23, %v1066_v55  ;;  %v5708_v52 = vld [vmem:[#allocation17_spill] sm:$0xff] }
  0xfc   : >> { %v4127_v62 = vadd.f32 %v4067_v2, %v5702_v43  ;;  %v4131_v31 = vadd.f32 %v4070_v7, %v5703_v42  ;;  %2835 = vpow2.f32 %v1021_v50  ;;  %v1105_v44 = vrot.slane %v1104_v30, 2  ;;  %v5709_v50 = vld [vmem:[#allocation19_spill] sm:$0xff]  ;;  %v5710_v43 = vld [vmem:[#allocation18_spill] sm:$0xff] }
  0xfd   : >> { %v4133_v24 = vpop.eup %2823  ;;  %v4137_v1 = vadd.f32 %v4077_v16, %v5704_v21  ;;  %v928_v53 = vadd.f32 %v4105_v58, %v927_v32  ;;  %2837 = vpow2.f32 %v1023_v11  ;;  %v1083_v3 = vrot.slane %v1082_v48, 1  ;;  %v4175_v21 = vld [vmem:[%s3711_s27 + $0x228] sm:$0xff] }
  0xfe   : >> { %v4140_v55 = vpop.eup %2825  ;;  %v1025_v2 = vmul.f32 1.442695, %v1010_v20  ;;  %v1072_v47 = vadd.f32 %v1071_v39, %v1070_v63  ;;  %v1077_v25 = vrot.slane %v1076_v19, 1  ;;  %v1089_v54 = vrot.slane %v1088_v28, 1  ;;  %5711 = vst [vmem:[#allocation7_spill] sm:$0xff] %v4175_v21 }
  0xff   : >> { %v4142_v7 = vpop.eup %2827  ;;  %v4146_v46 = vadd.f32 %v4080_v18, %v5705_v35  ;;  %v1095_v33 = vrot.slane %v1094_v26, 1  ;;  %v1100_v17 = vadd.f32 %v1099_v4, %v1098_v15  ;;  %v1111_v16 = vrot.slane %v1110_v8, 2 }
 0x100   : >> { %v4150_v57 = vadd.f32 %v4087_v22, %v5706_v56  ;;  %v4154_v59 = vadd.f32 %v4100_v29, %v5707_v14  ;;  %v1106_v63 = vadd.f32 %v1105_v44, %v1104_v30  ;;  %v1163_v23 = vmul.f32 %v5708_v52, %v3951_v38 }
 0x101   : >> { %v4158_v0 = vpop.eup %2829  ;;  %2839 = vrcp.f32 %v928_v53  ;;  %v1027_v18 = vadd.f32 %v4140_v55, %v4133_v24  ;;  %v1084_v15 = vadd.f32 %v1083_v3, %v1082_v48  ;;  %v1165_v22 = vmul.f32 %v5709_v50, %v3957_v13 }
 0x102   : >> { %v4164_v32 = vpop.eup %2831  ;;  %2841 = vpow2.f32 %v1025_v2  ;;  %v1078_v29 = vadd.f32 %v1077_v25, %v1076_v19  ;;  %v1090_v30 = vadd.f32 %v1089_v54, %v1088_v28  ;;  %v1115_v11 = vmul.f32 1.442695, %v1072_v47 }
 0x103   : >> { %v4166_v20 = vpop.eup %2833  ;;  %v1096_v39 = vadd.f32 %v1095_v33, %v1094_v26  ;;  %v1101_v60 = vrot.slane %v1100_v17, 1  ;;  %v1112_v4 = vadd.f32 %v1111_v16, %v1110_v8  ;;  %v1164_v42 = vmul.f32 %v5710_v43, %v3954_v5  ;;  %v4182_v8 = vld [vmem:[%s3711_s27 + $0x240] sm:$0xff] }
 0x104   : >> { %v4172_v48 = vmul.f32 %v4142_v7, %v4050_v12  ;;  %v1107_v44 = vrot.slane %v1106_v63, 1  ;;  %v1166_v19 = vmul.f32 %v4175_v21, %v3962_v41  ;;  %v1171_v28 = vrot.slane %v1163_v23, 4  ;;  %5712 = vst [vmem:[#allocation8_spill] sm:$0xff] %v4182_v8 }
 0x105   : >> { %v1030_v53 = vadd.f32 %v4164_v32, %v4158_v0  ;;  %v1119_v26 = vmul.f32 1.442695, %v1084_v15  ;;  %v1167_v3 = vmul.f32 %v4182_v8, %v3967_v9  ;;  %v1183_v2 = vrot.slane %v1165_v22, 4  ;;  %v4192_v15 = vld [vmem:[%s3711_s27 + $0x248] sm:$0xff]  ;;  %v4197_v8 = vld [vmem:[%s3711_s27 + $0x260] sm:$0xff] }
 0x106   : >> { %v4186_v12 = vpop.eup %2835  ;;  %v1028_v47 = vadd.f32 %v4166_v20, %v1027_v18  ;;  %2843 = vpow2.f32 %v1115_v11  ;;  %v1117_v25 = vmul.f32 1.442695, %v1078_v29  ;;  %v1121_v54 = vmul.f32 1.442695, %v1090_v30  ;;  %5713 = vst [vmem:[#allocation9_spill] sm:$0xff] %v4192_v15  ;;  %5714 = vst [vmem:[#allocation11_spill] sm:$0xff] %v4197_v8 }
 0x107   : >> { %v4189_v35 = vpop.eup %2837  ;;  %v1102_v33 = vadd.f32 %v1101_v60, %v1100_v17  ;;  %v1113_v16 = vrot.slane %v1112_v4, 1  ;;  %v1123_v56 = vmul.f32 1.442695, %v1096_v39  ;;  %v1177_v14 = vrot.slane %v1164_v42, 4 }
 0x108   : >> { %v1108_v52 = vadd.f32 %v1107_v44, %v1106_v63  ;;  %v1168_v50 = vmul.f32 %v4192_v15, %v3972_v6  ;;  %v1172_v43 = vadd.f32 %v1171_v28, %v1163_v23  ;;  %v1189_v21 = vrot.slane %v1166_v19, 4 }
 0x109   : >> { %2845 = vpow2.f32 %v1119_v26  ;;  %v1169_v18 = vmul.f32 %v4197_v8, %v3977_v34  ;;  %v1184_v29 = vadd.f32 %v1183_v2, %v1165_v22  ;;  %v1195_v30 = vrot.slane %v1167_v3, 4 }
 0x10a   : >> { %v933_v17 = vmul.f32 %v4142_v7, %v4054_v49  ;;  %v1029_v63 = vadd.f32 %v4189_v35, %v1028_v47  ;;  %v1031_v11 = vadd.f32 %v4186_v12, %v1030_v53  ;;  %2847 = vpow2.f32 %v1117_v25 }
 0x10b   : >> { %v2840_v39 = vpop.eup %2839  ;;  %v1114_v60 = vadd.f32 %v1113_v16, %v1112_v4  ;;  %2849 = vpow2.f32 %v1121_v54  ;;  %v1125_v23 = vmul.f32 1.442695, %v1102_v33  ;;  %v1178_v44 = vadd.f32 %v1177_v14, %v1164_v42 }
 0x10c   : >> { %v4205_v28 = vpop.eup %2841  ;;  %v1127_v26 = vmul.f32 1.442695, %v1108_v52  ;;  %v1173_v15 = vrot.slane %v1172_v43, 2  ;;  %v1190_v8 = vadd.f32 %v1189_v21, %v1166_v19  ;;  %v1201_v22 = vrot.slane %v1168_v50, 4  ;;  %v4221_v52 = vld [vmem:[%s3711_s27 + $0x268] sm:$0xff] }
 0x10d   : >> { %2851 = vpow2.f32 %v1123_v56  ;;  %v1185_v2 = vrot.slane %v1184_v29, 2  ;;  %v1196_v34 = vadd.f32 %v1195_v30, %v1167_v3  ;;  %v1207_v49 = vrot.slane %v1169_v18, 4  ;;  %v3127_v56 = vld [vmem:[%s3711_s27 + $0x80] sm:$0xff]  ;;  %5715 = vst [vmem:[#allocation10_spill] sm:$0xff] %v4221_v52 }
 0x10e   : >> { %v932_v47 = vmul.f32 %v2840_v39, %v4064_v36  ;;  %v934_v53 = vmul.f32 %v2840_v39, %v4074_v40  ;;  %v935_v4 = vmul.f32 %v4142_v7, %v4084_v51  ;;  %v937_v42 = vmul.f32 %v4142_v7, %v4093_v27 }
 0x10f   : >> { %v1032_v25 = vadd.f32 %v4205_v28, %v1031_v11  ;;  %2853 = vrcp.f32 %v1029_v63  ;;  %v1129_v21 = vmul.f32 1.442695, %v1114_v60  ;;  %v1179_v19 = vrot.slane %v1178_v44, 2 }
 0x110   : >> { %v4214_v54 = vpop.eup %2843  ;;  %2855 = vpow2.f32 %v1125_v23  ;;  %v1174_v36 = vadd.f32 %v1173_v15, %v1172_v43  ;;  %v1191_v40 = vrot.slane %v1190_v8, 2  ;;  %v1202_v3 = vadd.f32 %v1201_v22, %v1168_v50  ;;  %v3129_v50 = vld [vmem:[%s3711_s27 + $0xa0] sm:$0xff] }
 0x111   : >> { %2857 = vpow2.f32 %v1127_v26  ;;  %v1186_v51 = vadd.f32 %v1185_v2, %v1184_v29  ;;  %v1197_v33 = vrot.slane %v1196_v34, 2  ;;  %v1208_v27 = vadd.f32 %v1207_v49, %v1169_v18  ;;  %v3130_v29 = vld [vmem:[%s3711_s27 + $0xc0] sm:$0xff]  ;;  %v3132_v2 = vld [vmem:[%s3711_s27 + $0x88] sm:$0xff] }
 0x112   : >> { %v936_v7 = vmul.f32 %v2840_v39, %v4089_v10  ;;  %v938_v16 = vmul.f32 %v2840_v39, %v4105_v58  ;;  %v939_v14 = vmul.f32 %v3127_v56, %v4172_v48  ;;  %v1170_v15 = vmul.f32 %v4221_v52, %v3982_v37  ;;  %v3131_v18 = vld [vmem:[%s3711_s27 + $0xe0] sm:$0xff] }
 0x113   : >> { %v4225_v43 = vpop.eup %2845  ;;  %v941_v30 = vmul.f32 %v3129_v50, %v933_v17  ;;  %v943_v63 = vmul.f32 %v3130_v29, %v935_v4  ;;  %v945_v10 = vmul.f32 %v3131_v18, %v937_v42  ;;  %v1180_v11 = vadd.f32 %v1179_v19, %v1178_v44  ;;  %v3133_v4 = vld [vmem:[%s3711_s27 + $0xa8] sm:$0xff] }
 0x114   : >> { %5716 = vst [vmem:[#allocation12_spill] sm:$0xff] %v4225_v43  ;;  %v4230_v58 = vpop.eup %2847  ;;  %2859 = vrcp.f32 %v1032_v25  ;;  %v1175_v48 = vrot.slane %v1174_v36, 1  ;;  %v1192_v39 = vadd.f32 %v1191_v40, %v1190_v8  ;;  %v1203_v60 = vrot.slane %v1202_v3, 2  ;;  %v3134_v19 = vld [vmem:[%s3711_s27 + $0xc8] sm:$0xff] }
 0x115   : >> { %v4232_v23 = vpop.eup %2849  ;;  %2861 = vpow2.f32 %v1129_v21  ;;  %v1187_v26 = vrot.slane %v1186_v51, 1  ;;  %v1198_v17 = vadd.f32 %v1197_v33, %v1196_v34  ;;  %v1209_v22 = vrot.slane %v1208_v27, 2  ;;  %v3135_v40 = vld [vmem:[%s3711_s27 + $0xe8] sm:$0xff] }
 0x116   : >> { %v940_v49 = vmul.f32 %v3132_v2, %v932_v47  ;;  %v942_v56 = vmul.f32 %v3133_v4, %v934_v53  ;;  %v1131_v44 = vadd.f32 %v4225_v43, %v4214_v54  ;;  %v1213_v42 = vrot.slane %v1170_v15, 4 }
 0x117   : >> { %v4238_v25 = vpop.eup %2851  ;;  %v944_v8 = vmul.f32 %v3134_v19, %v936_v7  ;;  %v946_v50 = vmul.f32 %v3135_v40, %v938_v16  ;;  %v4243_v29 = vadd.f32 %v939_v14, %v4118_v61  ;;  %v1181_v21 = vrot.slane %v1180_v11, 1 }
 0x118   : >> { %v4246_v34 = vadd.f32 %v941_v30, %v4123_v45  ;;  %v1176_v47 = vadd.f32 %v1175_v48, %v1174_v36  ;;  %v1193_v33 = vrot.slane %v1192_v39, 1  ;;  %v1204_v53 = vadd.f32 %v1203_v60, %v1202_v3 }
 0x119   : >> { %v2854_v18 = vpop.eup %2853  ;;  %v4249_v2 = vadd.f32 %v943_v63, %v4127_v62  ;;  %v1188_v4 = vadd.f32 %v1187_v26, %v1186_v51  ;;  %v1199_v52 = vrot.slane %v1198_v17, 1  ;;  %v1210_v43 = vadd.f32 %v1209_v22, %v1208_v27 }
 0x11a   : >> { %v4251_v7 = vpop.eup %2855  ;;  %v4254_v16 = vadd.f32 %v945_v10, %v4131_v31  ;;  %v1132_v61 = vadd.f32 %v4238_v25, %v1131_v44  ;;  %v1134_v45 = vadd.f32 %v4232_v23, %v4230_v58  ;;  %v1214_v36 = vadd.f32 %v1213_v42, %v1170_v15  ;;  %v4291_v42 = vld [vmem:[%s3711_s27 + $0x2a0] sm:$0xff] }
 0x11b   : >> { %v4259_v14 = vpop.eup %2857  ;;  %v4262_v3 = vadd.f32 %v940_v49, %v4137_v1  ;;  %v4265_v62 = vadd.f32 %v942_v56, %v4146_v46  ;;  %v4268_v51 = vadd.f32 %v944_v8, %v4150_v57  ;;  %v1182_v27 = vadd.f32 %v1181_v21, %v1180_v11  ;;  %v4281_v56 = vld [vmem:[%s3711_s27 + $0x280] sm:$0xff]  ;;  %5719 = vst [vmem:[#allocation15_spill] sm:$0xff] %v4291_v42 }
 0x11c   : >> { %v4271_v31 = vadd.f32 %v946_v50, %v4154_v59  ;;  %v1194_v30 = vadd.f32 %v1193_v33, %v1192_v39  ;;  %v1205_v63 = vrot.slane %v1204_v53, 1  ;;  %v1219_v15 = vmul.f32 1.442695, %v1176_v47  ;;  %5717 = vst [vmem:[#allocation13_spill] sm:$0xff] %v4281_v56 }
 0x11d   : >> { %v1035_v10 = vmul.f32 %v2854_v18, %v4133_v24  ;;  %v1200_v48 = vadd.f32 %v1199_v52, %v1198_v17  ;;  %v1211_v1 = vrot.slane %v1210_v43, 1  ;;  %v1223_v60 = vmul.f32 1.442695, %v1188_v4  ;;  %v4286_v52 = vld [vmem:[%s3711_s27 + $0x288] sm:$0xff] }
 0x11e   : >> { %v2860_v46 = vpop.eup %2859  ;;  %v1037_v26 = vmul.f32 %v2854_v18, %v4140_v55  ;;  %v1133_v57 = vadd.f32 %v4259_v14, %v1132_v61  ;;  %v1135_v11 = vadd.f32 %v4251_v7, %v1134_v45  ;;  %v1215_v59 = vrot.slane %v1214_v36, 2  ;;  %5718 = vst [vmem:[#allocation14_spill] sm:$0xff] %v4286_v52 }
 0x11f   : >> { %v4277_v22 = vpop.eup %2861  ;;  %v1039_v39 = vmul.f32 %v2854_v18, %v4166_v20  ;;  %v1221_v49 = vmul.f32 1.442695, %v1182_v27  ;;  %v1267_v24 = vmul.f32 %v4281_v56, %v3951_v38  ;;  %v1268_v55 = vmul.f32 %v4286_v52, %v3954_v5  ;;  %v4412_v52 = vld [vmem:[%s3711_s27 + $0x328] sm:$0xff] }
 0x120   : >> { %v1206_v17 = vadd.f32 %v1205_v63, %v1204_v53  ;;  %2863 = vpow2.f32 %v1219_v15  ;;  %v1225_v44 = vmul.f32 1.442695, %v1194_v30  ;;  %v1269_v20 = vmul.f32 %v4291_v42, %v3957_v13  ;;  %v3141_v30 = vld [vmem:[%s3711_s27 + $0x120] sm:$0xff]  ;;  %5747 = vst [vmem:[#allocation40_spill] sm:$0xff] %v4412_v52 }
 0x121   : >> { %v1041_v19 = vmul.f32 %v2854_v18, %v4189_v35  ;;  %v1212_v8 = vadd.f32 %v1211_v1, %v1210_v43  ;;  %2865 = vpow2.f32 %v1223_v60  ;;  %v1227_v40 = vmul.f32 1.442695, %v1200_v48  ;;  %v4300_v35 = vld [vmem:[%s3711_s27 + $0x2a8] sm:$0xff]  ;;  %v4309_v48 = vld [vmem:[%s3711_s27 + $0x2c0] sm:$0xff] }
 0x122   : >> { %v1036_v50 = vmul.f32 %v2860_v46, %v4158_v0  ;;  %v1136_v21 = vadd.f32 %v4277_v22, %v1135_v11  ;;  %2867 = vrcp.f32 %v1133_v57  ;;  %v1216_v47 = vadd.f32 %v1215_v59, %v1214_v36  ;;  %5720 = vst [vmem:[#allocation16_spill] sm:$0xff] %v4300_v35  ;;  %v3140_v36 = vld [vmem:[%s3711_s27 + $0x100] sm:$0xff]  ;;  %5721 = vst [vmem:[#allocation20_spill] sm:$0xff] %v4309_v48  ;;  %v3145_v59 = vld [vmem:[%s3711_s27 + $0x108] sm:$0xff] }
 0x123   : >> { %v1038_v33 = vmul.f32 %v2860_v46, %v4164_v32  ;;  %2869 = vpow2.f32 %v1221_v49  ;;  %v1275_v53 = vrot.slane %v1267_v24, 4  ;;  %v1281_v4 = vrot.slane %v1268_v55, 4 }
 0x124   : >> { %2871 = vpow2.f32 %v1225_v44  ;;  %v1229_v61 = vmul.f32 1.442695, %v1206_v17  ;;  %v1270_v0 = vmul.f32 %v4300_v35, %v3962_v41  ;;  %v1287_v43 = vrot.slane %v1269_v20, 4  ;;  %v3146_v17 = vld [vmem:[%s3711_s27 + $0x160] sm:$0xff] }
 0x125   : >> { %v1040_v18 = vmul.f32 %v2860_v46, %v4186_v12  ;;  %v1042_v45 = vmul.f32 %v2860_v46, %v4205_v28  ;;  %2873 = vpow2.f32 %v1227_v40  ;;  %v1231_v32 = vmul.f32 1.442695, %v1212_v8  ;;  %v4314_v12 = vld [vmem:[%s3711_s27 + $0x2c8] sm:$0xff]  ;;  %v3144_v46 = vld [vmem:[%s3711_s27 + $0x140] sm:$0xff] }
 0x126   : >> { %v1043_v27 = vmul.f32 %v3140_v36, %v1035_v10  ;;  %v1045_v63 = vmul.f32 %v3141_v30, %v1037_v26  ;;  %2875 = vrcp.f32 %v1136_v21  ;;  %v1217_v15 = vrot.slane %v1216_v47, 1  ;;  %5722 = vst [vmem:[#allocation22_spill] sm:$0xff] %v4314_v12  ;;  %v4322_v8 = vld [vmem:[%s3711_s27 + $0x2e0] sm:$0xff]  ;;  %v5724_v40 = vld [vmem:[#allocation28_spill] sm:$0xff] }
 0x127   : >> { %v1271_v1 = vmul.f32 %v4309_v48, %v3967_v9  ;;  %v1272_v28 = vmul.f32 %v4314_v12, %v3972_v6  ;;  %v1276_v60 = vadd.f32 %v1275_v53, %v1267_v24  ;;  %v1282_v10 = vadd.f32 %v1281_v4, %v1268_v55  ;;  %5723 = vst [vmem:[#allocation24_spill] sm:$0xff] %v4322_v8  ;;  %v3148_v24 = vld [vmem:[%s3711_s27 + $0x128] sm:$0xff] }
 0x128   : >> { %v1047_v26 = vmul.f32 %v3144_v46, %v1039_v39  ;;  %2877 = vpow2.f32 %v1229_v61  ;;  %v1288_v57 = vadd.f32 %v1287_v43, %v1269_v20  ;;  %v1293_v11 = vrot.slane %v1270_v0, 4  ;;  %v3149_v53 = vld [vmem:[%s3711_s27 + $0x148] sm:$0xff] }
 0x129   : >> { %v1044_v49 = vmul.f32 %v3145_v59, %v1036_v50  ;;  %v1049_v44 = vmul.f32 %v3146_v17, %v1041_v19  ;;  %2879 = vpow2.f32 %v1231_v32  ;;  %v1273_v21 = vmul.f32 %v4322_v8, %v5724_v40  ;;  %v3150_v4 = vld [vmem:[%s3711_s27 + $0x168] sm:$0xff] }
 0x12a   : >> { %v4326_v36 = vpop.eup %2863  ;;  %v1046_v55 = vmul.f32 %v3148_v24, %v1038_v33  ;;  %v4330_v39 = vmul.f32 %v3149_v53, %v1040_v18  ;;  %v4333_v20 = vmul.f32 %v3150_v4, %v1042_v45  ;;  %v1218_v61 = vadd.f32 %v1217_v15, %v1216_v47 }
 0x12b   : >> { %5725 = vst [vmem:[#allocation26_spill] sm:$0xff] %v4326_v36  ;;  %v4335_v50 = vpop.eup %2865  ;;  %v1277_v19 = vrot.slane %v1276_v60, 2  ;;  %v1283_v43 = vrot.slane %v1282_v10, 2  ;;  %v1299_v32 = vrot.slane %v1271_v1, 4  ;;  %v1305_v30 = vrot.slane %v1272_v28, 4 }
 0x12c   : >> { %5726 = vst [vmem:[#allocation21_spill] sm:$0xff] %v4335_v50  ;;  %v2868_v46 = vpop.eup %2867  ;;  %v4338_v59 = vadd.f32 %v1043_v27, %v4243_v29  ;;  %v4341_v33 = vadd.f32 %v1045_v63, %v4246_v34  ;;  %v1289_v18 = vrot.slane %v1288_v57, 2  ;;  %v1294_v17 = vadd.f32 %v1293_v11, %v1270_v0  ;;  %v4362_v63 = vld [vmem:[%s3711_s27 + $0x2e8] sm:$0xff] }
 0x12d   : >> { %v4343_v24 = vpop.eup %2869  ;;  %v4346_v47 = vadd.f32 %v1044_v49, %v4262_v3  ;;  %v4349_v45 = vadd.f32 %v1047_v26, %v4249_v2  ;;  %v4352_v15 = vadd.f32 %v1049_v44, %v4254_v16  ;;  %v1311_v53 = vrot.slane %v1273_v21, 4  ;;  %5735 = vst [vmem:[#allocation30_spill] sm:$0xff] %v4362_v63 }
 0x12e   : >> { %5727 = vst [vmem:[#allocation23_spill] sm:$0xff] %v4338_v59  ;;  %5728 = vst [vmem:[#allocation25_spill] sm:$0xff] %v4341_v33  ;;  %v4354_v29 = vpop.eup %2871  ;;  %v4357_v34 = vadd.f32 %v1046_v55, %v4265_v62  ;;  %v1233_v27 = vmul.f32 1.442695, %v1218_v61  ;;  %v1235_v0 = vadd.f32 %v4335_v50, %v4326_v36  ;;  %v1274_v2 = vmul.f32 %v4362_v63, %v3982_v37  ;;  %v4374_v61 = vld [vmem:[%s3711_s27 + $0x300] sm:$0xff]  ;;  %v5738_v63 = vld [vmem:[#allocation12_spill] sm:$0xff] }
 0x12f   : >> { %5729 = vst [vmem:[#allocation27_spill] sm:$0xff] %v4343_v24  ;;  %5730 = vst [vmem:[#allocation17_spill] sm:$0xff] %v4346_v47  ;;  %v4366_v3 = vpop.eup %2873  ;;  %v1278_v16 = vadd.f32 %v1277_v19, %v1276_v60  ;;  %v1284_v26 = vadd.f32 %v1283_v43, %v1282_v10  ;;  %v1300_v11 = vadd.f32 %v1299_v32, %v1271_v1  ;;  %v1295_v4 = vrot.slane %v1294_v17, 2  ;;  %v4393_v19 = vld [vmem:[%s3711_s27 + $0x308] sm:$0xff]  ;;  %v4430_v47 = vld [vmem:[%s3711_s27 + $0x360] sm:$0xff] }
 0x130   : >> { %5731 = vst [vmem:[#allocation19_spill] sm:$0xff] %v4349_v45  ;;  %5732 = vst [vmem:[#allocation18_spill] sm:$0xff] %v4352_v15  ;;  %v1306_v49 = vadd.f32 %v1305_v30, %v1272_v28  ;;  %v4368_v44 = vpop.eup %2875  ;;  %v4371_v62 = vmul.f32 %v2868_v46, %v4214_v54  ;;  %v1290_v55 = vadd.f32 %v1289_v18, %v1288_v57  ;;  %2881 = vpow2.f32 %v1233_v27  ;;  %v4425_v15 = vld [vmem:[%s3711_s27 + $0x348] sm:$0xff] }
 0x131   : >> { %5733 = vst [vmem:[#allocation28_spill] sm:$0xff] %v4354_v29  ;;  %5734 = vst [vmem:[#allocation29_spill] sm:$0xff] %v4357_v34  ;;  %v1371_v12 = vmul.f32 %v4374_v61, %v3951_v38  ;;  %v4379_v35 = vmul.f32 %v2868_v46, %v5738_v63  ;;  %v4382_v60 = vmul.f32 %v2868_v46, %v4238_v25  ;;  %v1279_v32 = vrot.slane %v1278_v16, 1 }
 0x132   : >> { %5736 = vst [vmem:[#allocation31_spill] sm:$0xff] %v4366_v3  ;;  %5737 = vst [vmem:[#allocation32_spill] sm:$0xff] %v4374_v61  ;;  %v1238_v1 = vadd.f32 %v4354_v29, %v4343_v24  ;;  %v1312_v28 = vadd.f32 %v1311_v53, %v1273_v21  ;;  %v4386_v10 = vpop.eup %2877  ;;  %v4389_v54 = vmul.f32 %v2868_v46, %v4259_v14  ;;  %v1285_v21 = vrot.slane %v1284_v26, 1 }
 0x133   : >> { %5739 = vst [vmem:[#allocation12_spill] sm:$0xff] %v4379_v35  ;;  %5740 = vst [vmem:[#allocation33_spill] sm:$0xff] %v4382_v60  ;;  %v1236_v57 = vadd.f32 %v4366_v3, %v1235_v0  ;;  %v1372_v25 = vmul.f32 %v4393_v19, %v3954_v5  ;;  %v4397_v43 = vpop.eup %2879  ;;  %v1301_v30 = vrot.slane %v1300_v11, 2  ;;  %v1307_v18 = vrot.slane %v1306_v49, 2 }
 0x134   : >> { %5741 = vst [vmem:[#allocation34_spill] sm:$0xff] %v4386_v10  ;;  %5742 = vst [vmem:[#allocation35_spill] sm:$0xff] %v4389_v54  ;;  %v4401_v14 = vmul.f32 %v4368_v44, %v4230_v58  ;;  %v1291_v46 = vrot.slane %v1290_v55, 1  ;;  %v1296_v53 = vadd.f32 %v1295_v4, %v1294_v17  ;;  %v1379_v27 = vrot.slane %v1371_v12, 4  ;;  %v4420_v4 = vld [vmem:[%s3711_s27 + $0x340] sm:$0xff] }
 0x135   : >> { %5743 = vst [vmem:[#allocation36_spill] sm:$0xff] %v4393_v19  ;;  %5744 = vst [vmem:[#allocation37_spill] sm:$0xff] %v4397_v43  ;;  %v4404_v0 = vadd.f32 %v4386_v10, %v1238_v1  ;;  %v1313_v63 = vrot.slane %v1312_v28, 2  ;;  %v4407_v19 = vld [vmem:[%s3711_s27 + $0x320] sm:$0xff]  ;;  %v1374_v8 = vmul.f32 %v4412_v52, %v3962_v41  ;;  %v4417_v58 = vadd.f32 %v4397_v43, %v1236_v57 }
 0x136   : >> { %5745 = vst [vmem:[#allocation38_spill] sm:$0xff] %v4401_v14  ;;  %5746 = vst [vmem:[#allocation39_spill] sm:$0xff] %v4407_v19  ;;  %v1373_v61 = vmul.f32 %v4407_v19, %v3957_v13  ;;  %v1317_v17 = vrot.slane %v1274_v2, 4  ;;  %v1375_v1 = vmul.f32 %v4420_v4, %v3967_v9  ;;  %v1385_v48 = vrot.slane %v1372_v25, 4 }
 0x137   : >> { %5748 = vst [vmem:[#allocation41_spill] sm:$0xff] %v4420_v4  ;;  %v1280_v42 = vadd.f32 %v1279_v32, %v1278_v16  ;;  %v1286_v56 = vadd.f32 %v1285_v21, %v1284_v26  ;;  %v1302_v10 = vadd.f32 %v1301_v30, %v1300_v11  ;;  %v1308_v19 = vadd.f32 %v1307_v18, %v1306_v49 }
 0x138   : >> { %v1292_v29 = vadd.f32 %v1291_v46, %v1290_v55  ;;  %v1297_v34 = vrot.slane %v1296_v53, 1  ;;  %5749 = vst [vmem:[#allocation42_spill] sm:$0xff] %v4425_v15  ;;  %v1376_v52 = vmul.f32 %v4425_v15, %v3972_v6  ;;  %v1380_v57 = vadd.f32 %v1379_v27, %v1371_v12  ;;  %5750 = vst [vmem:[#allocation43_spill] sm:$0xff] %v4430_v47  ;;  %v4437_v15 = vld [vmem:[%s3711_s27 + $0x368] sm:$0xff] }
 0x139   : >> { %v1314_v45 = vadd.f32 %v1313_v63, %v1312_v28  ;;  %v1377_v4 = vmul.f32 %v4430_v47, %v5724_v40  ;;  %v1391_v43 = vrot.slane %v1373_v61, 4  ;;  %v1397_v16 = vrot.slane %v1374_v8, 4  ;;  %5751 = vst [vmem:[#allocation44_spill] sm:$0xff] %v4437_v15 }
 0x13a   : >> { %v1318_v26 = vadd.f32 %v1317_v17, %v1274_v2  ;;  %v1381_v11 = vrot.slane %v1380_v57, 2  ;;  %v1386_v49 = vadd.f32 %v1385_v48, %v1372_v25  ;;  %v1403_v55 = vrot.slane %v1375_v1, 4  ;;  %v4434_v46 = vpop.eup %2881 }
 0x13b   : >> { %v1303_v32 = vrot.slane %v1302_v10, 1  ;;  %v1309_v21 = vrot.slane %v1308_v19, 1  ;;  %v1392_v30 = vadd.f32 %v1391_v43, %v1373_v61  ;;  %v1398_v18 = vadd.f32 %v1397_v16, %v1374_v8 }
 0x13c   : >> { %v1378_v12 = vmul.f32 %v4437_v15, %v3982_v37  ;;  %v1382_v28 = vadd.f32 %v1381_v11, %v1380_v57  ;;  %v1404_v27 = vadd.f32 %v1403_v55, %v1375_v1  ;;  %v1409_v63 = vrot.slane %v1376_v52, 4 }
 0x13d   : >> { %v1298_v47 = vadd.f32 %v1297_v34, %v1296_v53  ;;  %v1323_v3 = vmul.f32 1.442695, %v1280_v42  ;;  %v1393_v2 = vrot.slane %v1392_v30, 2  ;;  %v1415_v17 = vrot.slane %v1377_v4, 4 }
 0x13e   : >> { %v1315_v48 = vrot.slane %v1314_v45, 1  ;;  %v1319_v25 = vrot.slane %v1318_v26, 2  ;;  %v1387_v24 = vrot.slane %v1386_v49, 2  ;;  %v1405_v33 = vrot.slane %v1404_v27, 2 }
 0x13f   : >> { %v1394_v61 = vadd.f32 %v1393_v2, %v1392_v30  ;;  %v1399_v8 = vrot.slane %v1398_v18, 2  ;;  %v1410_v43 = vadd.f32 %v1409_v63, %v1376_v52  ;;  %v1416_v16 = vadd.f32 %v1415_v17, %v1377_v4  ;;  %v4452_v30 = vld [vmem:[%s3711_s27 + $0x3a0] sm:$0xff] }
 0x140   : >> { %v1304_v50 = vadd.f32 %v1303_v32, %v1302_v10  ;;  %v1325_v36 = vmul.f32 1.442695, %v1286_v56  ;;  %v1383_v59 = vrot.slane %v1382_v28, 1  ;;  %v1421_v54 = vrot.slane %v1378_v12, 4 }
 0x141   : >> { %v1310_v15 = vadd.f32 %v1309_v21, %v1308_v19  ;;  %v1327_v57 = vmul.f32 1.442695, %v1292_v29  ;;  %v1395_v1 = vrot.slane %v1394_v61, 1  ;;  %v1406_v11 = vadd.f32 %v1405_v33, %v1404_v27 }
 0x142   : >> { %v1316_v34 = vadd.f32 %v1315_v48, %v1314_v45  ;;  %v1320_v42 = vadd.f32 %v1319_v25, %v1318_v26  ;;  %v1329_v53 = vmul.f32 1.442695, %v1298_v47  ;;  %v1388_v55 = vadd.f32 %v1387_v24, %v1386_v49  ;;  %v4442_v26 = vld [vmem:[%s3711_s27 + $0x380] sm:$0xff] }
 0x143   : >> { %2883 = vpow2.f32 %v1323_v3  ;;  %v1400_v14 = vadd.f32 %v1399_v8, %v1398_v18  ;;  %v1411_v60 = vrot.slane %v1410_v43, 2  ;;  %v1417_v35 = vrot.slane %v1416_v16, 2  ;;  %v4457_v18 = vld [vmem:[%s3711_s27 + $0x3a8] sm:$0xff] }
 0x144   : >> { %2885 = vpow2.f32 %v1325_v36  ;;  %v1331_v52 = vmul.f32 1.442695, %v1304_v50  ;;  %v1384_v4 = vadd.f32 %v1383_v59, %v1382_v28  ;;  %v1422_v10 = vadd.f32 %v1421_v54, %v1378_v12  ;;  %5753 = vst [vmem:[#allocation46_spill] sm:$0xff] %v4457_v18 }
 0x145   : >> { %2887 = vpow2.f32 %v1327_v57  ;;  %v1333_v56 = vmul.f32 1.442695, %v1310_v15  ;;  %v1396_v19 = vadd.f32 %v1395_v1, %v1394_v61  ;;  %v1407_v29 = vrot.slane %v1406_v11, 1  ;;  %v4447_v15 = vld [vmem:[%s3711_s27 + $0x388] sm:$0xff]  ;;  %v4464_v61 = vld [vmem:[%s3711_s27 + $0x3c0] sm:$0xff] }
 0x146   : >> { %v1321_v32 = vrot.slane %v1320_v42, 1  ;;  %2889 = vpow2.f32 %v1329_v53  ;;  %v1335_v33 = vmul.f32 1.442695, %v1316_v34  ;;  %v1389_v47 = vrot.slane %v1388_v55, 1  ;;  %5752 = vst [vmem:[#allocation45_spill] sm:$0xff] %v4447_v15 }
 0x147   : >> { %v1401_v24 = vrot.slane %v1400_v14, 1  ;;  %v1412_v45 = vadd.f32 %v1411_v60, %v1410_v43  ;;  %v1418_v3 = vadd.f32 %v1417_v35, %v1416_v16  ;;  %v1475_v36 = vmul.f32 %v4442_v26, %v3951_v38 }
 0x148   : >> { %2891 = vpow2.f32 %v1331_v52  ;;  %v1423_v50 = vrot.slane %v1422_v10, 2  ;;  %v1427_v59 = vmul.f32 1.442695, %v1384_v4  ;;  %v1476_v54 = vmul.f32 %v4447_v15, %v3954_v5 }
 0x149   : >> { %2893 = vpow2.f32 %v1333_v56  ;;  %v1408_v49 = vadd.f32 %v1407_v29, %v1406_v11  ;;  %v1431_v21 = vmul.f32 1.442695, %v1396_v19  ;;  %v1477_v35 = vmul.f32 %v4452_v30, %v3957_v13 }
 0x14a   : >> { %v1322_v60 = vadd.f32 %v1321_v32, %v1320_v42  ;;  %2895 = vpow2.f32 %v1335_v33  ;;  %v1390_v38 = vadd.f32 %v1389_v47, %v1388_v55  ;;  %v1478_v12 = vmul.f32 %v4457_v18, %v3962_v41  ;;  %v4483_v33 = vld [vmem:[%s3711_s27 + $0x3e0] sm:$0xff] }
 0x14b   : >> { %v1402_v28 = vadd.f32 %v1401_v24, %v1400_v14  ;;  %v1413_v5 = vrot.slane %v1412_v45, 1  ;;  %v1419_v27 = vrot.slane %v1418_v3, 1  ;;  %v1483_v63 = vrot.slane %v1475_v36, 4  ;;  %v4471_v14 = vld [vmem:[%s3711_s27 + $0x3c8] sm:$0xff] }
 0x14c   : >> { %v1424_v2 = vadd.f32 %v1423_v50, %v1422_v10  ;;  %2897 = vpow2.f32 %v1427_v59  ;;  %v1489_v17 = vrot.slane %v1476_v54, 4  ;;  %v1495_v48 = vrot.slane %v1477_v35, 4  ;;  %5754 = vst [vmem:[#allocation47_spill] sm:$0xff] %v4471_v14 }
 0x14d   : >> { %v4461_v25 = vpop.eup %2883  ;;  %2899 = vpow2.f32 %v1431_v21  ;;  %v1435_v13 = vmul.f32 1.442695, %v1408_v49  ;;  %v1479_v8 = vmul.f32 %v4464_v61, %v3967_v9  ;;  %v1484_v43 = vadd.f32 %v1483_v63, %v1475_v36 }
 0x14e   : >> { %v4468_v41 = vpop.eup %2885  ;;  %v1480_v16 = vmul.f32 %v4471_v14, %v3972_v6  ;;  %v1490_v57 = vadd.f32 %v1489_v17, %v1476_v54  ;;  %v1496_v1 = vadd.f32 %v1495_v48, %v1477_v35  ;;  %v1501_v11 = vrot.slane %v1478_v12, 4  ;;  %v4503_v48 = vld [vmem:[%s3711_s27 + $0x3e8] sm:$0xff] }
 0x14f   : >> { %v4475_v34 = vpop.eup %2887  ;;  %2901 = vrcp.f32 %v4417_v58  ;;  %v1337_v42 = vmul.f32 1.442695, %v1322_v60  ;;  %v1420_v53 = vadd.f32 %v1419_v27, %v1418_v3  ;;  %v1485_v55 = vrot.slane %v1484_v43, 2  ;;  %5755 = vst [vmem:[#allocation48_spill] sm:$0xff] %v4503_v48 }
 0x150   : >> { %v4478_v9 = vpop.eup %2889  ;;  %v1414_v52 = vadd.f32 %v1413_v5, %v1412_v45  ;;  %v1425_v4 = vrot.slane %v1424_v2, 1  ;;  %v1429_v10 = vmul.f32 1.442695, %v1390_v38  ;;  %v1433_v56 = vmul.f32 1.442695, %v1402_v28 }
 0x151   : >> { %2903 = vpow2.f32 %v1435_v13  ;;  %v1486_v19 = vadd.f32 %v1485_v55, %v1484_v43  ;;  %v1491_v6 = vrot.slane %v1490_v57, 2  ;;  %v1497_v29 = vrot.slane %v1496_v1, 2 }
 0x152   : >> { %v4480_v32 = vpop.eup %2891  ;;  %v1481_v58 = vmul.f32 %v4483_v33, %v5724_v40  ;;  %v1502_v47 = vadd.f32 %v1501_v11, %v1478_v12  ;;  %v1507_v24 = vrot.slane %v1479_v8, 4  ;;  %v1513_v3 = vrot.slane %v1480_v16, 4 }
 0x153   : >> { %v4487_v36 = vpop.eup %2893  ;;  %2905 = vpow2.f32 %v1337_v42  ;;  %v1339_v45 = vadd.f32 %v4475_v34, %v4461_v25  ;;  %v1439_v50 = vmul.f32 1.442695, %v1420_v53  ;;  %v1492_v59 = vadd.f32 %v1491_v6, %v1490_v57 }
 0x154   : >> { %v4491_v54 = vpop.eup %2895  ;;  %v1240_v49 = vadd.f32 %v4434_v46, %v4404_v0  ;;  %v1342_v40 = vadd.f32 %v4478_v9, %v4468_v41  ;;  %v1426_v21 = vadd.f32 %v1425_v4, %v1424_v2  ;;  %2907 = vpow2.f32 %v1429_v10 }
 0x155   : >> { %2909 = vpow2.f32 %v1433_v56  ;;  %v1437_v35 = vmul.f32 1.442695, %v1414_v52  ;;  %v1487_v60 = vrot.slane %v1486_v19, 1  ;;  %v1498_v38 = vadd.f32 %v1497_v29, %v1496_v1 }
 0x156   : >> { %v4497_v12 = vpop.eup %2897  ;;  %v1503_v28 = vrot.slane %v1502_v47, 2  ;;  %v1508_v5 = vadd.f32 %v1507_v24, %v1479_v8  ;;  %v1514_v27 = vadd.f32 %v1513_v3, %v1480_v16  ;;  %v1519_v63 = vrot.slane %v1481_v58, 4 }
 0x157   : >> { %v4499_v17 = vpop.eup %2899  ;;  %v1340_v0 = vadd.f32 %v4480_v32, %v1339_v45  ;;  %2911 = vpow2.f32 %v1439_v50  ;;  %v1482_v2 = vmul.f32 %v4503_v48, %v3982_v37  ;;  %v1493_v13 = vrot.slane %v1492_v59, 1 }
 0x158   : >> { %v4509_v43 = vmul.f32 %v4368_v44, %v4232_v23  ;;  %2913 = vrcp.f32 %v1240_v49  ;;  %v1343_v8 = vadd.f32 %v4487_v36, %v1342_v40  ;;  %v1441_v16 = vmul.f32 1.442695, %v1426_v21 }
 0x159   : >> { %v4512_v57 = vpop.eup %2901  ;;  %2915 = vpow2.f32 %v1437_v35  ;;  %v1488_v1 = vadd.f32 %v1487_v60, %v1486_v19  ;;  %v1494_v11 = vadd.f32 %v1493_v13, %v1492_v59  ;;  %v1499_v42 = vrot.slane %v1498_v38, 1 }
 0x15a   : >> { %v1504_v53 = vadd.f32 %v1503_v28, %v1502_v47  ;;  %v1509_v55 = vrot.slane %v1508_v5, 2  ;;  %v1515_v52 = vrot.slane %v1514_v27, 2  ;;  %v1520_v4 = vadd.f32 %v1519_v63, %v1481_v58 }
 0x15b   : >> { %v4514_v37 = vpop.eup %2903  ;;  %v1341_v10 = vadd.f32 %v4491_v54, %v1340_v0  ;;  %v1443_v23 = vadd.f32 %v4499_v17, %v4497_v12  ;;  %v1500_v56 = vadd.f32 %v1499_v42, %v1498_v38  ;;  %v1525_v6 = vrot.slane %v1482_v2, 4 }
 0x15c   : >> { %v1505_v29 = vrot.slane %v1504_v53, 1  ;;  %v1510_v24 = vadd.f32 %v1509_v55, %v1508_v5  ;;  %v1516_v3 = vadd.f32 %v1515_v52, %v1514_v27  ;;  %v1521_v45 = vrot.slane %v1520_v4, 2 }
 0x15d   : >> { %v4519_v19 = vpop.eup %2905  ;;  %2917 = vpow2.f32 %v1441_v16  ;;  %v1526_v47 = vadd.f32 %v1525_v6, %v1482_v2  ;;  %v1531_v50 = vmul.f32 1.442695, %v1488_v1  ;;  %v1533_v59 = vmul.f32 1.442695, %v1494_v11 }
 0x15e   : >> { %v4521_v58 = vpop.eup %2907  ;;  %v1506_v49 = vadd.f32 %v1505_v29, %v1504_v53  ;;  %v1511_v40 = vrot.slane %v1510_v24, 1  ;;  %v1517_v21 = vrot.slane %v1516_v3, 1  ;;  %v1522_v35 = vadd.f32 %v1521_v45, %v1520_v4  ;;  %v5758_v45 = vld [vmem:[#allocation12_spill] sm:$0xff] }
 0x15f   : >> { %v4523_v60 = vpop.eup %2909  ;;  %2919 = vrcp.f32 %v1341_v10  ;;  %v1444_v38 = vadd.f32 %v4514_v37, %v1443_v23  ;;  %v1527_v28 = vrot.slane %v1526_v47, 2  ;;  %v1535_v5 = vmul.f32 1.442695, %v1500_v56 }
 0x160   : >> { %v1512_v27 = vadd.f32 %v1511_v40, %v1510_v24  ;;  %v1518_v63 = vadd.f32 %v1517_v21, %v1516_v3  ;;  %v1523_v0 = vrot.slane %v1522_v35, 1  ;;  %2921 = vpow2.f32 %v1531_v50 }
 0x161   : >> { %v4526_v2 = vpop.eup %2911  ;;  %v1344_v13 = vadd.f32 %v4519_v19, %v1343_v8  ;;  %v1528_v16 = vadd.f32 %v1527_v28, %v1526_v47  ;;  %2923 = vpow2.f32 %v1535_v5  ;;  %v1537_v1 = vmul.f32 1.442695, %v1506_v49  ;;  %v5762_v49 = vld [vmem:[#allocation38_spill] sm:$0xff]  ;;  %v4578_v5 = vld [vmem:[%s3711_s27 + $0x1c8] sm:$0xff] }
 0x162   : >> { %v2914_v11 = vpop.eup %2913  ;;  %v1524_v42 = vadd.f32 %v1523_v0, %v1522_v35  ;;  %2925 = vpow2.f32 %v1533_v59  ;;  %v1539_v53 = vmul.f32 1.442695, %v1512_v27  ;;  %v1541_v55 = vmul.f32 1.442695, %v1518_v63  ;;  %v4562_v59 = vld [vmem:[%s3711_s27 + $0x188] sm:$0xff]  ;;  %5766 = vst [vmem:[#allocation51_spill] sm:$0xff] %v4578_v5 }
 0x163   : >> { %v4529_v52 = vpop.eup %2915  ;;  %v1144_v4 = vmul.f32 %v4368_v44, %v4251_v7  ;;  %v1446_v10 = vadd.f32 %v4523_v60, %v4521_v58  ;;  %v1529_v8 = vrot.slane %v1528_v16, 1  ;;  %2927 = vpow2.f32 %v1537_v1  ;;  %v4543_v7 = vld [vmem:[%s3711_s27 + $0x180] sm:$0xff]  ;;  %v4582_v63 = vld [vmem:[%s3711_s27 + $0x1e8] sm:$0xff] }
 0x164   : >> { %v1146_v23 = vmul.f32 %v4368_v44, %v4277_v22  ;;  %v1445_v56 = vadd.f32 %v4526_v2, %v1444_v38  ;;  %2929 = vpow2.f32 %v1539_v53  ;;  %v1543_v6 = vmul.f32 1.442695, %v1524_v42  ;;  %5756 = vst [vmem:[#allocation49_spill] sm:$0xff] %v4543_v7  ;;  %v4550_v44 = vld [vmem:[%s3711_s27 + $0x1a0] sm:$0xff]  ;;  %v4573_v38 = vld [vmem:[%s3711_s27 + $0x1a8] sm:$0xff]  ;;  %5767 = vst [vmem:[#allocation52_spill] sm:$0xff] %v4582_v63 }
 0x165   : >> { %v4540_v29 = vadd.f32 %v4330_v39, %v4268_v51  ;;  %v1147_v24 = vmul.f32 %v4543_v7, %v4371_v62  ;;  %2931 = vrcp.f32 %v1344_v13  ;;  %v1530_v3 = vadd.f32 %v1529_v8, %v1528_v16  ;;  %5757 = vst [vmem:[#allocation50_spill] sm:$0xff] %v4550_v44  ;;  %v4555_v51 = vld [vmem:[%s3711_s27 + $0x1c0] sm:$0xff]  ;;  %v5760_v39 = vld [vmem:[#allocation33_spill] sm:$0xff]  ;;  %v5769_v42 = vld [vmem:[#allocation26_spill] sm:$0xff] }
 0x166   : >> { %v1058_v22 = vadd.f32 %v4333_v20, %v4271_v31  ;;  %v1149_v47 = vmul.f32 %v4550_v44, %v5758_v45  ;;  %5759 = vst [vmem:[#allocation12_spill] sm:$0xff] %v4555_v51  ;;  %v1151_v50 = vmul.f32 %v4555_v51, %v5760_v39  ;;  %2933 = vpow2.f32 %v1541_v55  ;;  %5761 = vst [vmem:[#allocation33_spill] sm:$0xff] %v4562_v59  ;;  %v4567_v31 = vld [vmem:[%s3711_s27 + $0x1e0] sm:$0xff]  ;;  %v5770_v55 = vld [vmem:[#allocation21_spill] sm:$0xff] }
 0x167   : >> { %v4559_v62 = vpop.eup %2917  ;;  %v1148_v40 = vmul.f32 %v4562_v59, %v5762_v49  ;;  %5763 = vst [vmem:[#allocation38_spill] sm:$0xff] %v4567_v31  ;;  %v5764_v20 = vld [vmem:[#allocation35_spill] sm:$0xff]  ;;  %v1447_v35 = vadd.f32 %v4529_v52, %v1446_v10  ;;  %2935 = vpow2.f32 %v1543_v6  ;;  %v1150_v28 = vmul.f32 %v4573_v38, %v4509_v43  ;;  %v5771_v6 = vld [vmem:[#allocation25_spill] sm:$0xff]  ;;  %v5780_v51 = vld [vmem:[#allocation28_spill] sm:$0xff] }
 0x168   : >> { %v1153_v21 = vmul.f32 %v4567_v31, %v5764_v20  ;;  %5765 = vst [vmem:[#allocation35_spill] sm:$0xff] %v4573_v38  ;;  %v1152_v27 = vmul.f32 %v4578_v5, %v1144_v4  ;;  %v1154_v0 = vmul.f32 %v4582_v63, %v1146_v23  ;;  %2937 = vrcp.f32 %v1445_v56  ;;  %v5768_v16 = vld [vmem:[#allocation23_spill] sm:$0xff]  ;;  %v5774_v56 = vld [vmem:[#allocation37_spill] sm:$0xff]  ;;  %v5777_v63 = vld [vmem:[#allocation18_spill] sm:$0xff] }
 0x169   : >> { %v2920_v13 = vpop.eup %2919  ;;  %v1155_v1 = vadd.f32 %v1147_v24, %v5768_v16  ;;  %v1243_v53 = vmul.f32 %v4512_v57, %v5769_v42  ;;  %v1245_v10 = vmul.f32 %v4512_v57, %v5770_v55  ;;  %v1545_v8 = vmul.f32 1.442695, %v1530_v3  ;;  %v5772_v45 = vld [vmem:[#allocation27_spill] sm:$0xff]  ;;  %v5775_v16 = vld [vmem:[#allocation17_spill] sm:$0xff]  ;;  %v5781_v38 = vld [vmem:[#allocation34_spill] sm:$0xff] }
 0x16a   : >> { %v4590_v43 = vpop.eup %2921  ;;  %v1157_v4 = vadd.f32 %v1149_v47, %v5771_v6  ;;  %v1244_v39 = vmul.f32 %v2914_v11, %v5772_v45  ;;  %v5773_v49 = vld [vmem:[#allocation31_spill] sm:$0xff]  ;;  %v1249_v24 = vmul.f32 %v4512_v57, %v5774_v56  ;;  %v1156_v42 = vadd.f32 %v1148_v40, %v5775_v16  ;;  %v5779_v45 = vld [vmem:[#allocation29_spill] sm:$0xff] }
 0x16b   : >> { %v1247_v23 = vmul.f32 %v4512_v57, %v5773_v49  ;;  %v4598_v20 = vpop.eup %2923  ;;  %v5776_v55 = vld [vmem:[#allocation19_spill] sm:$0xff]  ;;  %v1161_v31 = vadd.f32 %v1153_v21, %v5777_v63  ;;  %v1448_v47 = vadd.f32 %v4559_v62, %v1447_v35  ;;  %v1158_v5 = vadd.f32 %v1150_v28, %v5779_v45  ;;  %v3178_v28 = vld [vmem:[%s3711_s27 + $0x208] sm:$0xff] }
 0x16c   : >> { %v1159_v3 = vadd.f32 %v1151_v50, %v5776_v55  ;;  %v4604_v6 = vpop.eup %2925  ;;  %v1246_v49 = vmul.f32 %v2914_v11, %v5780_v51  ;;  %v1248_v59 = vmul.f32 %v2914_v11, %v5781_v38  ;;  %v1250_v57 = vmul.f32 %v2914_v11, %v4434_v46  ;;  %v4613_v40 = vld [vmem:[%s3711_s27 + $0x200] sm:$0xff]  ;;  %v5784_v55 = vld [vmem:[#allocation8_spill] sm:$0xff] }
 0x16d   : >> { %5778 = vst [vmem:[#allocation23_spill] sm:$0xff] %v4604_v6  ;;  %v4610_v56 = vpop.eup %2927  ;;  %5783 = vst [vmem:[#allocation21_spill] sm:$0xff] %v4613_v40  ;;  %v1251_v50 = vmul.f32 %v4613_v40, %v1243_v53  ;;  %v3177_v16 = vld [vmem:[%s3711_s27 + $0x220] sm:$0xff]  ;;  %2939 = vpow2.f32 %v1545_v8  ;;  %v1547_v35 = vadd.f32 %v4598_v20, %v4590_v43  ;;  %v1252_v51 = vmul.f32 %v3178_v28, %v1244_v39 }
 0x16e   : >> { %5782 = vst [vmem:[#allocation26_spill] sm:$0xff] %v4610_v56  ;;  %v1253_v21 = vmul.f32 %v3177_v16, %v1245_v10  ;;  %v4619_v63 = vpop.eup %2929  ;;  %v1255_v38 = vmul.f32 %v5784_v55, %v1247_v23  ;;  %v5785_v45 = vld [vmem:[#allocation11_spill] sm:$0xff]  ;;  %v1347_v11 = vmul.f32 %v2920_v13, %v4461_v25  ;;  %v1349_v7 = vmul.f32 %v2920_v13, %v4475_v34  ;;  %v5787_v55 = vld [vmem:[#allocation9_spill] sm:$0xff] }
 0x16f   : >> { %v1257_v46 = vmul.f32 %v5785_v45, %v1249_v24  ;;  %v2932_v44 = vpop.eup %2931  ;;  %v1351_v53 = vmul.f32 %v2920_v13, %v4480_v32  ;;  %2941 = vrcp.f32 %v1448_v47  ;;  %v1548_v10 = vadd.f32 %v4619_v63, %v1547_v35  ;;  %v5786_v25 = vld [vmem:[#allocation7_spill] sm:$0xff]  ;;  %v5788_v45 = vld [vmem:[#allocation10_spill] sm:$0xff] }
 0x170   : >> { %v4628_v8 = vpop.eup %2933  ;;  %v1160_v16 = vadd.f32 %v1152_v27, %v4540_v29  ;;  %v1162_v40 = vadd.f32 %v1154_v0, %v1058_v22  ;;  %v1353_v39 = vmul.f32 %v2920_v13, %v4491_v54  ;;  %v1550_v23 = vadd.f32 %v4610_v56, %v4604_v6  ;;  %v5789_v22 = vld [vmem:[#allocation13_spill] sm:$0xff]  ;;  %v5790_v54 = vld [vmem:[#allocation15_spill] sm:$0xff]  ;;  %v5791_v13 = vld [vmem:[#allocation20_spill] sm:$0xff] }
 0x171   : >> { %v2936_v24 = vpop.eup %2935  ;;  %v1254_v28 = vmul.f32 %v5786_v25, %v1246_v49  ;;  %v1256_v34 = vmul.f32 %v5787_v55, %v1248_v59  ;;  %v1258_v32 = vmul.f32 %v5788_v45, %v1250_v57  ;;  %v1259_v47 = vadd.f32 %v1251_v50, %v1155_v1  ;;  %v5792_v49 = vld [vmem:[#allocation24_spill] sm:$0xff] }
 0x172   : >> { %v2938_v48 = vpop.eup %2937  ;;  %v1261_v35 = vadd.f32 %v1253_v21, %v1157_v4  ;;  %v1263_v14 = vadd.f32 %v1255_v38, %v1159_v3  ;;  %v1265_v18 = vadd.f32 %v1257_v46, %v1161_v31  ;;  %v1549_v15 = vadd.f32 %v2936_v24, %v1548_v10  ;;  %v5793_v46 = vld [vmem:[#allocation14_spill] sm:$0xff] }
 0x173   : >> { %v1260_v29 = vadd.f32 %v1252_v51, %v1156_v42  ;;  %v1355_v27 = vmul.f32 %v5789_v22, %v1347_v11  ;;  %v1357_v0 = vmul.f32 %v5790_v54, %v1349_v7  ;;  %v1359_v56 = vmul.f32 %v5791_v13, %v1351_v53 }
 0x174   : >> { %v1348_v6 = vmul.f32 %v2932_v44, %v4468_v41  ;;  %v1361_v25 = vmul.f32 %v5792_v49, %v1353_v39  ;;  %v1551_v59 = vadd.f32 %v4628_v8, %v1550_v23  ;;  %2943 = vrcp.f32 %v1549_v15 }
 0x175   : >> { %v1350_v1 = vmul.f32 %v2932_v44, %v4478_v9  ;;  %v1352_v4 = vmul.f32 %v2932_v44, %v4487_v36  ;;  %v1354_v31 = vmul.f32 %v2932_v44, %v4519_v19  ;;  %v1451_v42 = vmul.f32 %v2938_v48, %v4497_v12  ;;  %v5794_v44 = vld [vmem:[#allocation16_spill] sm:$0xff] }
 0x176   : >> { %v1262_v3 = vadd.f32 %v1254_v28, %v1158_v5  ;;  %v1453_v7 = vmul.f32 %v2938_v48, %v4499_v17  ;;  %v1455_v57 = vmul.f32 %v2938_v48, %v4514_v37  ;;  %v1457_v41 = vmul.f32 %v2938_v48, %v4526_v2  ;;  %v5795_v5 = vld [vmem:[#allocation22_spill] sm:$0xff]  ;;  %v5797_v37 = vld [vmem:[#allocation32_spill] sm:$0xff]  ;;  %v5798_v48 = vld [vmem:[#allocation39_spill] sm:$0xff] }
 0x177   : >> { %v2940_v50 = vpop.eup %2939  ;;  %v1264_v21 = vadd.f32 %v1256_v34, %v1160_v16  ;;  %v1266_v51 = vadd.f32 %v1258_v32, %v1162_v40  ;;  %v1363_v38 = vadd.f32 %v1355_v27, %v1259_v47  ;;  %v1365_v15 = vadd.f32 %v1357_v0, %v1261_v35  ;;  %v5796_v17 = vld [vmem:[#allocation30_spill] sm:$0xff]  ;;  %v5799_v16 = vld [vmem:[#allocation41_spill] sm:$0xff]  ;;  %v5800_v28 = vld [vmem:[#allocation43_spill] sm:$0xff] }
 0x178   : >> { %v1356_v9 = vmul.f32 %v5793_v46, %v1348_v6  ;;  %v1367_v11 = vadd.f32 %v1359_v56, %v1263_v14  ;;  %v1369_v36 = vadd.f32 %v1361_v25, %v1265_v18  ;;  %v1552_v53 = vadd.f32 %v2940_v50, %v1551_v59  ;;  %v5801_v25 = vld [vmem:[#allocation36_spill] sm:$0xff] }
 0x179   : >> { %v2942_v19 = vpop.eup %2941  ;;  %v1358_v12 = vmul.f32 %v5794_v44, %v1350_v1  ;;  %v1360_v10 = vmul.f32 %v5795_v5, %v1352_v4  ;;  %v1362_v39 = vmul.f32 %v5796_v17, %v1354_v31  ;;  %v1459_v23 = vmul.f32 %v5797_v37, %v1451_v42  ;;  %v5802_v59 = vld [vmem:[#allocation40_spill] sm:$0xff]  ;;  %v5807_v44 = vld [vmem:[#allocation45_spill] sm:$0xff]  ;;  %v5808_v5 = vld [vmem:[#allocation46_spill] sm:$0xff] }
 0x17a   : >> { %v1461_v2 = vmul.f32 %v5798_v48, %v1453_v7  ;;  %v1463_v40 = vmul.f32 %v5799_v16, %v1455_v57  ;;  %v1465_v55 = vmul.f32 %v5800_v28, %v1457_v41  ;;  %2945 = vrcp.f32 %v1552_v53  ;;  %v5804_v4 = vld [vmem:[#allocation44_spill] sm:$0xff]  ;;  %v5809_v17 = vld [vmem:[#allocation47_spill] sm:$0xff] }
 0x17b   : >> { %v1452_v14 = vmul.f32 %v2942_v19, %v4521_v58  ;;  %v1454_v18 = vmul.f32 %v2942_v19, %v4523_v60  ;;  %v1456_v6 = vmul.f32 %v2942_v19, %v4529_v52  ;;  %v1458_v56 = vmul.f32 %v2942_v19, %v4559_v62 }
 0x17c   : >> { %v1364_v34 = vadd.f32 %v1356_v9, %v1260_v29  ;;  %v1366_v45 = vadd.f32 %v1358_v12, %v1262_v3  ;;  %v1368_v32 = vadd.f32 %v1360_v10, %v1264_v21  ;;  %v1370_v47 = vadd.f32 %v1362_v39, %v1266_v51  ;;  %v5803_v29 = vld [vmem:[#allocation42_spill] sm:$0xff] }
 0x17d   : >> { %v1467_v22 = vadd.f32 %v1459_v23, %v1363_v38  ;;  %v1469_v27 = vadd.f32 %v1461_v2, %v1365_v15  ;;  %v1471_v54 = vadd.f32 %v1463_v40, %v1367_v11  ;;  %v1473_v0 = vadd.f32 %v1465_v55, %v1369_v36 }
 0x17e   : >> { %v2944_v35 = vpop.eup %2943  ;;  %v1460_v52 = vmul.f32 %v5801_v25, %v1452_v14  ;;  %v1462_v62 = vmul.f32 %v5802_v59, %v1454_v18  ;;  %v1464_v1 = vmul.f32 %v5803_v29, %v1456_v6  ;;  %v1466_v31 = vmul.f32 %v5804_v4, %v1458_v56 }
 0x17f   : >> { %v1555_v13 = vmul.f32 %v2944_v35, %v4590_v43  ;;  %v1557_v49 = vmul.f32 %v2944_v35, %v4598_v20  ;;  %v1559_v58 = vmul.f32 %v2944_v35, %v4619_v63  ;;  %v1561_v60 = vmul.f32 %v2944_v35, %v2936_v24 }
 0x180   : >> { %v1468_v21 = vadd.f32 %v1460_v52, %v1364_v34  ;;  %v1470_v51 = vadd.f32 %v1462_v62, %v1366_v45  ;;  %v1472_v38 = vadd.f32 %v1464_v1, %v1368_v32  ;;  %v1474_v15 = vadd.f32 %v1466_v31, %v1370_v47 }
 0x181   : >> { %v1563_v42 = vmul.f32 %v4442_v26, %v1555_v13  ;;  %v1565_v3 = vmul.f32 %v4452_v30, %v1557_v49  ;;  %v1567_v7 = vmul.f32 %v4464_v61, %v1559_v58  ;;  %v1569_v43 = vmul.f32 %v4483_v33, %v1561_v60  ;;  %v5805_v26 = vld [vmem:[#allocation23_spill] sm:$0xff]  ;;  %v5806_v30 = vld [vmem:[#allocation26_spill] sm:$0xff] }
 0x183   : >> { %v4673_v20 = vadd.f32 %v1563_v42, %v1467_v22  ;;  %v4675_v63 = vadd.f32 %v1565_v3, %v1469_v27  ;;  %v4677_v24 = vadd.f32 %v1567_v7, %v1471_v54  ;;  %v4679_v57 = vadd.f32 %v1569_v43, %v1473_v0 }
 0x184   : >> { %v2946_v41 = vpop.eup %2945 }
 0x185   : >> { %v1556_v46 = vmul.f32 %v2946_v41, %v5805_v26  ;;  %v1558_v9 = vmul.f32 %v2946_v41, %v5806_v30  ;;  %v1560_v61 = vmul.f32 %v2946_v41, %v4628_v8  ;;  %v1562_v33 = vmul.f32 %v2946_v41, %v2940_v50  ;;  %v5810_v8 = vld [vmem:[#allocation48_spill] sm:$0xff] }
 0x186   : >> { %v1579_v11 = vmul.f32 %v4673_v20, %v4673_v20  ;;  %v1581_v36 = vmul.f32 %v4675_v63, %v4675_v63  ;;  %v1583_v53 = vmul.f32 %v4677_v24, %v4677_v24  ;;  %v1585_v19 = vmul.f32 %v4679_v57, %v4679_v57 }
 0x187   : >> { %v1564_v12 = vmul.f32 %v5807_v44, %v1556_v46  ;;  %v1566_v10 = vmul.f32 %v5808_v5, %v1558_v9  ;;  %v1568_v39 = vmul.f32 %v5809_v17, %v1560_v61  ;;  %v1570_v50 = vmul.f32 %v5810_v8, %v1562_v33 }
 0x188   : >> { %v1587_v37 = vrot.slane %v1579_v11, 4  ;;  %v1599_v23 = vrot.slane %v1581_v36, 4  ;;  %v1611_v48 = vrot.slane %v1583_v53, 4  ;;  %v1623_v2 = vrot.slane %v1585_v19, 4 }
 0x189   : >> { %v4696_v16 = vadd.f32 %v1564_v12, %v1468_v21  ;;  %v4698_v40 = vadd.f32 %v1566_v10, %v1470_v51  ;;  %v4700_v28 = vadd.f32 %v1568_v39, %v1472_v38  ;;  %v4702_v55 = vadd.f32 %v1570_v50, %v1474_v15 }
 0x18a   : >> { %v1588_v14 = vadd.f32 %v1587_v37, %v1579_v11  ;;  %v1600_v18 = vadd.f32 %v1599_v23, %v1581_v36  ;;  %v1612_v6 = vadd.f32 %v1611_v48, %v1583_v53  ;;  %v1624_v56 = vadd.f32 %v1623_v2, %v1585_v19 }
 0x18b   : >> { %v1580_v34 = vmul.f32 %v4696_v16, %v4696_v16  ;;  %v1582_v45 = vmul.f32 %v4698_v40, %v4698_v40  ;;  %v1584_v32 = vmul.f32 %v4700_v28, %v4700_v28  ;;  %v1586_v47 = vmul.f32 %v4702_v55, %v4702_v55 }
 0x18c   : >> { %v1589_v35 = vrot.slane %v1588_v14, 2  ;;  %v1601_v22 = vrot.slane %v1600_v18, 2  ;;  %v1613_v27 = vrot.slane %v1612_v6, 2  ;;  %v1625_v54 = vrot.slane %v1624_v56, 2 }
 0x18d   : >> { %v1593_v0 = vrot.slane %v1580_v34, 4  ;;  %v1605_v13 = vrot.slane %v1582_v45, 4  ;;  %v1617_v49 = vrot.slane %v1584_v32, 4  ;;  %v1629_v58 = vrot.slane %v1586_v47, 4 }
 0x18e   : >> { %v1590_v60 = vadd.f32 %v1589_v35, %v1588_v14  ;;  %v1602_v25 = vadd.f32 %v1601_v22, %v1600_v18  ;;  %v1614_v52 = vadd.f32 %v1613_v27, %v1612_v6  ;;  %v1626_v59 = vadd.f32 %v1625_v54, %v1624_v56 }
 0x18f   : >> { %v1594_v62 = vadd.f32 %v1593_v0, %v1580_v34  ;;  %v1606_v29 = vadd.f32 %v1605_v13, %v1582_v45  ;;  %v1618_v1 = vadd.f32 %v1617_v49, %v1584_v32  ;;  %v1630_v4 = vadd.f32 %v1629_v58, %v1586_v47  ;;  %v4722_v47 = vld [vmem:[%s3711_s27] sm:$0xff]  ;;  %v4741_v49 = vld [vmem:[%s3711_s27 + $0x8] sm:$0xff] }
 0x190   : >> { %v1591_v31 = vrot.slane %v1590_v60, 1  ;;  %v1603_v42 = vrot.slane %v1602_v25, 1  ;;  %v1615_v3 = vrot.slane %v1614_v52, 1  ;;  %v1627_v7 = vrot.slane %v1626_v59, 1 }
 0x191   : >> { %v1595_v43 = vrot.slane %v1594_v62, 2  ;;  %v1607_v41 = vrot.slane %v1606_v29, 2  ;;  %v1619_v21 = vrot.slane %v1618_v1, 2  ;;  %v1631_v51 = vrot.slane %v1630_v4, 2 }
 0x192   : >> { %v1592_v38 = vadd.f32 %v1591_v31, %v1590_v60  ;;  %v1604_v15 = vadd.f32 %v1603_v42, %v1602_v25  ;;  %v1616_v26 = vadd.f32 %v1615_v3, %v1614_v52  ;;  %v1628_v46 = vadd.f32 %v1627_v7, %v1626_v59  ;;  %v4746_v60 = vld [vmem:[%s3711_s27 + $0x40] sm:$0xff]  ;;  %v4751_v59 = vld [vmem:[%s3711_s27 + $0x28] sm:$0xff] }
 0x193   : >> { %v1596_v30 = vadd.f32 %v1595_v43, %v1594_v62  ;;  %v1608_v9 = vadd.f32 %v1607_v41, %v1606_v29  ;;  %v1620_v61 = vadd.f32 %v1619_v21, %v1618_v1  ;;  %v1632_v33 = vadd.f32 %v1631_v51, %v1630_v4  ;;  %v4759_v29 = vld [vmem:[%s3711_s27 + $0x48] sm:$0xff]  ;;  %v4767_v41 = vld [vmem:[%s3711_s27 + $0x60] sm:$0xff] }
 0x194   : >> { %v1635_v11 = vmax.f32 %v1592_v38, 1e-24  ;;  %v1637_v36 = vmax.f32 %v1604_v15, 1e-24  ;;  %v1639_v53 = vmax.f32 %v1616_v26, 1e-24 }
 0x195   : >> { %v1597_v19 = vrot.slane %v1596_v30, 1  ;;  %v1609_v44 = vrot.slane %v1608_v9, 1  ;;  %v1621_v12 = vrot.slane %v1620_v61, 1  ;;  %v1633_v5 = vrot.slane %v1632_v33, 1  ;;  %v4772_v15 = vld [vmem:[%s3711_s27 + $0x68] sm:$0xff] }
 0x196   : >> { %v1641_v10 = vmax.f32 %v1628_v46, 1e-24  ;;  %2947 = vrsqrt.f32 %v1635_v11 }
 0x197   : >> { %v1598_v17 = vadd.f32 %v1597_v19, %v1596_v30  ;;  %v1610_v39 = vadd.f32 %v1609_v44, %v1608_v9  ;;  %v1622_v8 = vadd.f32 %v1621_v12, %v1620_v61  ;;  %v1634_v50 = vadd.f32 %v1633_v5, %v1632_v33 }
 0x198   : >> { %2949 = vrsqrt.f32 %v1637_v36 }
 0x199   : >> { %v1636_v37 = vmax.f32 %v1598_v17, 1e-24  ;;  %v1638_v23 = vmax.f32 %v1610_v39, 1e-24  ;;  %v1640_v48 = vmax.f32 %v1622_v8, 1e-24  ;;  %2951 = vrsqrt.f32 %v1639_v53 }
 0x19a   : >> { %2953 = vrsqrt.f32 %v1641_v10  ;;  %v1642_v2 = vmax.f32 %v1634_v50, 1e-24 }
 0x19b   : >> { %2955 = vrsqrt.f32 %v1636_v37 }
 0x19c   : >> { %2957 = vrsqrt.f32 %v1638_v23  ;;  %v4777_v23 = vld [vmem:[%s3711_s27 + $0x80] sm:$0xff] }
 0x19d   : >> { %2959 = vrsqrt.f32 %v1640_v48 }
 0x19e   : >> { %2961 = vrsqrt.f32 %v1642_v2 }
 0x1a0   : >> { %v2948_v14 = vpop.eup %2947 }
 0x1a1   : >> { %v4713_v18 = vmul.f32 %v2948_v14, %v4673_v20  ;;  %v4727_v20 = vld [vmem:[%s3711_s27 + $0x20] sm:$0xff] }
 0x1a2   : >> { %v2950_v6 = vpop.eup %2949 }
 0x1a3   : >> { %5811 = vst [vmem:[#allocation25_spill] sm:$0xff] %v4713_v18  ;;  %v2952_v56 = vpop.eup %2951  ;;  %v4716_v34 = vmul.f32 %v2950_v6, %v4675_v63  ;;  %v1659_v35 = vmul.f32 %v4722_v47, %v4713_v18  ;;  %v1763_v48 = vmul.f32 %v4777_v23, %v4713_v18 }
 0x1a4   : >> { %v2954_v45 = vpop.eup %2953  ;;  %v4719_v32 = vmul.f32 %v2952_v56, %v4677_v24  ;;  %v4782_v56 = vld [vmem:[%s3711_s27 + $0x88] sm:$0xff] }
 0x1a5   : >> { %v2956_v22 = vpop.eup %2955  ;;  %v1661_v27 = vmul.f32 %v4727_v20, %v4716_v34  ;;  %v4756_v62 = vmul.f32 %v2954_v45, %v4679_v57  ;;  %5812 = vst [vmem:[#allocation27_spill] sm:$0xff] %v4782_v56 }
 0x1a6   : >> { %v2958_v54 = vpop.eup %2957  ;;  %v4732_v63 = vmul.f32 %v2956_v22, %v4696_v16  ;;  %v1663_v25 = vmul.f32 %v4746_v60, %v4719_v32  ;;  %v1667_v16 = vrot.slane %v1659_v35, 4  ;;  %v4787_v22 = vld [vmem:[%s3711_s27 + $0xa0] sm:$0xff] }
 0x1a7   : >> { %v2960_v0 = vpop.eup %2959  ;;  %v4735_v24 = vmul.f32 %v2958_v54, %v4698_v40  ;;  %v1665_v21 = vmul.f32 %v4767_v41, %v4756_v62 }
 0x1a8   : >> { %v4738_v13 = vmul.f32 %v2960_v0, %v4700_v28  ;;  %v1660_v58 = vmul.f32 %v4741_v49, %v4732_v63  ;;  %v2962_v52 = vpop.eup %2961  ;;  %v1679_v28 = vrot.slane %v1661_v27, 4  ;;  %v1668_v3 = vadd.f32 %v1667_v16, %v1659_v35 }
 0x1a9   : >> { %v1662_v40 = vmul.f32 %v4751_v59, %v4735_v24  ;;  %v4764_v42 = vmul.f32 %v2962_v52, %v4702_v55  ;;  %v1691_v7 = vrot.slane %v1663_v25, 4  ;;  %v1703_v33 = vrot.slane %v1665_v21, 4 }
 0x1aa   : >> { %v1664_v1 = vmul.f32 %v4759_v29, %v4738_v13  ;;  %v1673_v4 = vrot.slane %v1660_v58, 4  ;;  %v1680_v43 = vadd.f32 %v1679_v28, %v1661_v27  ;;  %v1669_v46 = vrot.slane %v1668_v3, 2 }
 0x1ab   : >> { %v1685_v31 = vrot.slane %v1662_v40, 4  ;;  %v1666_v26 = vmul.f32 %v4772_v15, %v4764_v42  ;;  %v1692_v30 = vadd.f32 %v1691_v7, %v1663_v25  ;;  %v1704_v10 = vadd.f32 %v1703_v33, %v1665_v21  ;;  %v4792_v25 = vld [vmem:[%s3711_s27 + $0xa8] sm:$0xff] }
 0x1ac   : >> { %v1674_v57 = vadd.f32 %v1673_v4, %v1660_v58  ;;  %v1697_v51 = vrot.slane %v1664_v1, 4  ;;  %v1681_v55 = vrot.slane %v1680_v43, 2  ;;  %v1670_v36 = vadd.f32 %v1669_v46, %v1668_v3  ;;  %5813 = vst [vmem:[#allocation31_spill] sm:$0xff] %v4792_v25  ;;  %v4802_v21 = vld [vmem:[%s3711_s27 + $0xc8] sm:$0xff] }
 0x1ad   : >> { %v1686_v38 = vadd.f32 %v1685_v31, %v1662_v40  ;;  %v1693_v53 = vrot.slane %v1692_v30, 2  ;;  %v1709_v19 = vrot.slane %v1666_v26, 4  ;;  %v1705_v6 = vrot.slane %v1704_v10, 2  ;;  %v4797_v40 = vld [vmem:[%s3711_s27 + $0xc0] sm:$0xff]  ;;  %5814 = vst [vmem:[#allocation37_spill] sm:$0xff] %v4802_v21 }
 0x1ae   : >> { %v1675_v9 = vrot.slane %v1674_v57, 2  ;;  %v1698_v61 = vadd.f32 %v1697_v51, %v1664_v1  ;;  %v1682_v44 = vadd.f32 %v1681_v55, %v1680_v43  ;;  %v1671_v39 = vrot.slane %v1670_v36, 1 }
 0x1af   : >> { %v1687_v11 = vrot.slane %v1686_v38, 2  ;;  %v1694_v8 = vadd.f32 %v1693_v53, %v1692_v30  ;;  %v1710_v50 = vadd.f32 %v1709_v19, %v1666_v26  ;;  %v1764_v45 = vmul.f32 %v4782_v56, %v4732_v63 }
 0x1b0   : >> { %v1676_v12 = vadd.f32 %v1675_v9, %v1674_v57  ;;  %v1699_v5 = vrot.slane %v1698_v61, 2  ;;  %v1683_v37 = vrot.slane %v1682_v44, 1  ;;  %v1765_v27 = vmul.f32 %v4787_v22, %v4716_v34  ;;  %v4807_v9 = vld [vmem:[%s3711_s27 + $0xe0] sm:$0xff] }
 0x1b1   : >> { %v1688_v17 = vadd.f32 %v1687_v11, %v1686_v38  ;;  %v1672_v54 = vadd.f32 %v1671_v39, %v1670_v36  ;;  %v1695_v0 = vrot.slane %v1694_v8, 1  ;;  %v1711_v58 = vrot.slane %v1710_v50, 2  ;;  %5815 = vst [vmem:[#allocation17_spill] sm:$0xff] %v4807_v9 }
 0x1b2   : >> { %v1677_v2 = vrot.slane %v1676_v12, 1  ;;  %v1700_v14 = vadd.f32 %v1699_v5, %v1698_v61  ;;  %v1766_v16 = vmul.f32 %v4792_v25, %v4735_v24  ;;  %v1684_v52 = vadd.f32 %v1683_v37, %v1682_v44  ;;  %v4812_v5 = vld [vmem:[%s3711_s27 + $0xe8] sm:$0xff] }
 0x1b3   : >> { %v1689_v35 = vrot.slane %v1688_v17, 1  ;;  %v1767_v28 = vmul.f32 %v4797_v40, %v4719_v32  ;;  %v1771_v1 = vrot.slane %v1763_v48, 4  ;;  %v1706_v3 = vadd.f32 %v1705_v6, %v1704_v10  ;;  %5816 = vst [vmem:[#allocation19_spill] sm:$0xff] %v4812_v5 }
 0x1b4   : >> { %v1678_v4 = vadd.f32 %v1677_v2, %v1676_v12  ;;  %v1701_v31 = vrot.slane %v1700_v14, 1  ;;  %v1777_v7 = vrot.slane %v1764_v45, 4  ;;  %v1768_v57 = vmul.f32 %v4802_v21, %v4738_v13 }
 0x1b5   : >> { %v1690_v43 = vadd.f32 %v1689_v35, %v1688_v17  ;;  %v1783_v51 = vrot.slane %v1765_v27, 4  ;;  %v1696_v38 = vadd.f32 %v1695_v0, %v1694_v8  ;;  %v1712_v26 = vadd.f32 %v1711_v58, %v1710_v50 }
 0x1b6   : >> { %v1715_v46 = vmul.f32 1.442695, %v1672_v54  ;;  %v1789_v30 = vrot.slane %v1766_v16, 4  ;;  %v1719_v55 = vmul.f32 1.442695, %v1684_v52  ;;  %v1769_v61 = vmul.f32 %v4807_v9, %v4756_v62  ;;  %v5826_v9 = vld [vmem:[#allocation21_spill] sm:$0xff] }
 0x1b7   : >> { %v1772_v33 = vadd.f32 %v1771_v1, %v1763_v48  ;;  %v1795_v11 = vrot.slane %v1767_v28, 4  ;;  %v1702_v36 = vadd.f32 %v1701_v31, %v1700_v14  ;;  %v1707_v53 = vrot.slane %v1706_v3, 1 }
 0x1b8   : >> { %v1717_v19 = vmul.f32 1.442695, %v1678_v4  ;;  %v1778_v44 = vadd.f32 %v1777_v7, %v1764_v45  ;;  %v1721_v12 = vmul.f32 1.442695, %v1690_v43  ;;  %v1770_v10 = vmul.f32 %v4812_v5, %v4764_v42 }
 0x1b9   : >> { %v1784_v17 = vadd.f32 %v1783_v51, %v1765_v27  ;;  %v1801_v39 = vrot.slane %v1768_v57, 4  ;;  %v1713_v8 = vrot.slane %v1712_v26, 1  ;;  %2963 = vpow2.f32 %v1715_v46 }
 0x1ba   : >> { %v1723_v50 = vmul.f32 1.442695, %v1696_v38  ;;  %v1790_v37 = vadd.f32 %v1789_v30, %v1766_v16  ;;  %2965 = vpow2.f32 %v1719_v55  ;;  %v1773_v2 = vrot.slane %v1772_v33, 2 }
 0x1bb   : >> { %v1796_v48 = vadd.f32 %v1795_v11, %v1767_v28  ;;  %v1807_v6 = vrot.slane %v1769_v61, 4  ;;  %2967 = vpow2.f32 %v1717_v19  ;;  %v1725_v14 = vmul.f32 1.442695, %v1702_v36 }
 0x1bc   : >> { %v1779_v35 = vrot.slane %v1778_v44, 2  ;;  %2969 = vpow2.f32 %v1721_v12  ;;  %v1785_v45 = vrot.slane %v1784_v17, 2  ;;  %v1802_v54 = vadd.f32 %v1801_v39, %v1768_v57 }
 0x1bd   : >> { %v1813_v0 = vrot.slane %v1770_v10, 4  ;;  %v1708_v58 = vadd.f32 %v1707_v53, %v1706_v3  ;;  %2971 = vpow2.f32 %v1723_v50  ;;  %v1791_v52 = vrot.slane %v1790_v37, 2 }
 0x1be   : >> { %v1714_v27 = vadd.f32 %v1713_v8, %v1712_v26  ;;  %v1774_v1 = vadd.f32 %v1773_v2, %v1772_v33  ;;  %v1797_v4 = vrot.slane %v1796_v48, 2  ;;  %v1808_v31 = vadd.f32 %v1807_v6, %v1769_v61 }
 0x1bf   : >> { %v1780_v7 = vadd.f32 %v1779_v35, %v1778_v44  ;;  %2973 = vpow2.f32 %v1725_v14  ;;  %v1786_v16 = vadd.f32 %v1785_v45, %v1784_v17  ;;  %v1803_v43 = vrot.slane %v1802_v54, 2  ;;  %v4823_v44 = vld [vmem:[%s3711_s27 + $0x100] sm:$0xff] }
 0x1c0   : >> { %v1814_v28 = vadd.f32 %v1813_v0, %v1770_v10  ;;  %v1727_v51 = vmul.f32 1.442695, %v1708_v58  ;;  %v1792_v38 = vadd.f32 %v1791_v52, %v1790_v37  ;;  %v1729_v46 = vmul.f32 1.442695, %v1714_v27  ;;  %5817 = vst [vmem:[#allocation18_spill] sm:$0xff] %v4823_v44  ;;  %v4846_v27 = vld [vmem:[%s3711_s27 + $0x128] sm:$0xff] }
 0x1c1   : >> { %v1775_v30 = vrot.slane %v1774_v1, 1  ;;  %v1798_v55 = vadd.f32 %v1797_v4, %v1796_v48  ;;  %v1809_v57 = vrot.slane %v1808_v31, 2  ;;  %v1781_v3 = vrot.slane %v1780_v7, 1  ;;  %v4834_v48 = vld [vmem:[%s3711_s27 + $0x120] sm:$0xff]  ;;  %5820 = vst [vmem:[#allocation34_spill] sm:$0xff] %v4846_v27 }
 0x1c2   : >> { %v1787_v26 = vrot.slane %v1786_v16, 1  ;;  %v1804_v61 = vadd.f32 %v1803_v43, %v1802_v54  ;;  %v1815_v33 = vrot.slane %v1814_v28, 2  ;;  %2975 = vpow2.f32 %v1727_v51  ;;  %5818 = vst [vmem:[#allocation29_spill] sm:$0xff] %v4834_v48  ;;  %v4839_v54 = vld [vmem:[%s3711_s27 + $0x108] sm:$0xff] }
 0x1c3   : >> { %v4816_v11 = vpop.eup %2963  ;;  %v1793_v19 = vrot.slane %v1792_v38, 1  ;;  %v1867_v12 = vmul.f32 %v4823_v44, %v4713_v18  ;;  %2977 = vpow2.f32 %v1729_v46  ;;  %v1776_v17 = vadd.f32 %v1775_v30, %v1774_v1  ;;  %5819 = vst [vmem:[#allocation28_spill] sm:$0xff] %v4839_v54  ;;  %v4854_v46 = vld [vmem:[%s3711_s27 + $0x140] sm:$0xff] }
 0x1c4   : >> { %v4818_v36 = vpop.eup %2965  ;;  %v1799_v39 = vrot.slane %v1798_v55, 1  ;;  %v1810_v8 = vadd.f32 %v1809_v57, %v1808_v31  ;;  %v1782_v2 = vadd.f32 %v1781_v3, %v1780_v7  ;;  %v1869_v6 = vmul.f32 %v4834_v48, %v4716_v34  ;;  %5821 = vst [vmem:[#allocation8_spill] sm:$0xff] %v4854_v46 }
 0x1c5   : >> { %v4820_v53 = vpop.eup %2967  ;;  %v1731_v37 = vadd.f32 %v4818_v36, %v4816_v11  ;;  %v1788_v14 = vadd.f32 %v1787_v26, %v1786_v16  ;;  %v1805_v35 = vrot.slane %v1804_v61, 1  ;;  %v1816_v45 = vadd.f32 %v1815_v33, %v1814_v28 }
 0x1c6   : >> { %v4827_v10 = vpop.eup %2969  ;;  %v1868_v0 = vmul.f32 %v4839_v54, %v4732_v63  ;;  %v1794_v52 = vadd.f32 %v1793_v19, %v1792_v38  ;;  %v1870_v1 = vmul.f32 %v4846_v27, %v4735_v24  ;;  %v1800_v31 = vadd.f32 %v1799_v39, %v1798_v55  ;;  %v4860_v39 = vld [vmem:[%s3711_s27 + $0x148] sm:$0xff] }
 0x1c7   : >> { %v4829_v50 = vpop.eup %2971  ;;  %v1734_v58 = vadd.f32 %v4827_v10, %v4820_v53  ;;  %v1811_v7 = vrot.slane %v1810_v8, 1  ;;  %v1819_v16 = vmul.f32 1.442695, %v1776_v17  ;;  %v1875_v43 = vrot.slane %v1867_v12, 4  ;;  %5822 = vst [vmem:[#allocation11_spill] sm:$0xff] %v4860_v39 }
 0x1c8   : >> { %v1732_v28 = vadd.f32 %v4829_v50, %v1731_v37  ;;  %v1821_v51 = vmul.f32 1.442695, %v1782_v2  ;;  %v1871_v38 = vmul.f32 %v4854_v46, %v4719_v32  ;;  %v1887_v30 = vrot.slane %v1869_v6, 4 }
 0x1c9   : >> { %v4850_v4 = vpop.eup %2973  ;;  %v1806_v57 = vadd.f32 %v1805_v35, %v1804_v61  ;;  %v1817_v3 = vrot.slane %v1816_v45, 1  ;;  %v1823_v26 = vmul.f32 1.442695, %v1788_v14  ;;  %v1881_v33 = vrot.slane %v1868_v0, 4  ;;  %v4867_v61 = vld [vmem:[%s3711_s27 + $0x160] sm:$0xff] }
 0x1ca   : >> { %v1735_v19 = vadd.f32 %v4850_v4, %v1734_v58  ;;  %v1825_v55 = vmul.f32 1.442695, %v1794_v52  ;;  %v1872_v17 = vmul.f32 %v4860_v39, %v4738_v13  ;;  %v1893_v37 = vrot.slane %v1870_v1, 4  ;;  %5823 = vst [vmem:[#allocation7_spill] sm:$0xff] %v4867_v61 }
 0x1cb   : >> { %v1812_v2 = vadd.f32 %v1811_v7, %v1810_v8  ;;  %2979 = vpow2.f32 %v1819_v16  ;;  %v1827_v27 = vmul.f32 1.442695, %v1800_v31  ;;  %v1876_v46 = vadd.f32 %v1875_v43, %v1867_v12  ;;  %v4874_v7 = vld [vmem:[%s3711_s27 + $0x168] sm:$0xff] }
 0x1cc   : >> { %v4864_v54 = vpop.eup %2975  ;;  %2981 = vpow2.f32 %v1821_v51  ;;  %v1873_v14 = vmul.f32 %v4867_v61, %v4756_v62  ;;  %v1888_v35 = vadd.f32 %v1887_v30, %v1869_v6  ;;  %v1899_v58 = vrot.slane %v1871_v38, 4  ;;  %5824 = vst [vmem:[#allocation9_spill] sm:$0xff] %v4874_v7 }
 0x1cd   : >> { %v4871_v52 = vpop.eup %2977  ;;  %v1818_v48 = vadd.f32 %v1817_v3, %v1816_v45  ;;  %2983 = vpow2.f32 %v1823_v26  ;;  %v1829_v39 = vmul.f32 1.442695, %v1806_v57  ;;  %v1882_v8 = vadd.f32 %v1881_v33, %v1868_v0 }
 0x1ce   : >> { %2985 = vpow2.f32 %v1825_v55  ;;  %v1874_v12 = vmul.f32 %v4874_v7, %v4764_v42  ;;  %v1894_v31 = vadd.f32 %v1893_v37, %v1870_v1  ;;  %v1905_v16 = vrot.slane %v1872_v17, 4 }
 0x1cf   : >> { %v1733_v43 = vadd.f32 %v4864_v54, %v1732_v28  ;;  %v1877_v51 = vrot.slane %v1876_v46, 2  ;;  %v1736_v6 = vadd.f32 %v4871_v52, %v1735_v19  ;;  %v1889_v30 = vrot.slane %v1888_v35, 2 }
 0x1d0   : >> { %v1900_v61 = vadd.f32 %v1899_v58, %v1871_v38  ;;  %v1911_v44 = vrot.slane %v1873_v14, 4  ;;  %2987 = vpow2.f32 %v1827_v27  ;;  %v1831_v45 = vmul.f32 1.442695, %v1812_v2 }
 0x1d1   : >> { %v1833_v57 = vmul.f32 1.442695, %v1818_v48  ;;  %v1883_v0 = vrot.slane %v1882_v8, 2  ;;  %2989 = vpow2.f32 %v1829_v39  ;;  %v1895_v3 = vrot.slane %v1894_v31, 2 }
 0x1d2   : >> { %v1906_v26 = vadd.f32 %v1905_v16, %v1872_v17  ;;  %v1917_v33 = vrot.slane %v1874_v12, 4  ;;  %2991 = vrcp.f32 %v1733_v43  ;;  %v1878_v55 = vadd.f32 %v1877_v51, %v1876_v46 }
 0x1d3   : >> { %2993 = vrcp.f32 %v1736_v6  ;;  %v1890_v1 = vadd.f32 %v1889_v30, %v1888_v35  ;;  %v1901_v37 = vrot.slane %v1900_v61, 2  ;;  %v1912_v28 = vadd.f32 %v1911_v44, %v1873_v14 }
 0x1d4   : >> { %2995 = vpow2.f32 %v1831_v45  ;;  %v1884_v19 = vadd.f32 %v1883_v0, %v1882_v8  ;;  %v1896_v27 = vadd.f32 %v1895_v3, %v1894_v31  ;;  %v1907_v48 = vrot.slane %v1906_v26, 2 }
 0x1d5   : >> { %v4880_v7 = vpop.eup %2979  ;;  %2997 = vpow2.f32 %v1833_v57  ;;  %v1918_v2 = vadd.f32 %v1917_v33, %v1874_v12  ;;  %v1879_v17 = vrot.slane %v1878_v55, 1  ;;  %v1891_v46 = vrot.slane %v1890_v1, 1 }
 0x1d6   : >> { %v4882_v38 = vpop.eup %2981  ;;  %v1902_v16 = vadd.f32 %v1901_v37, %v1900_v61  ;;  %v1913_v35 = vrot.slane %v1912_v28, 2  ;;  %v1885_v43 = vrot.slane %v1884_v19, 1  ;;  %v1897_v44 = vrot.slane %v1896_v27, 1 }
 0x1d7   : >> { %v4884_v39 = vpop.eup %2983  ;;  %v1908_v14 = vadd.f32 %v1907_v48, %v1906_v26  ;;  %v1919_v51 = vrot.slane %v1918_v2, 2  ;;  %v1880_v31 = vadd.f32 %v1879_v17, %v1878_v55  ;;  %v1892_v45 = vadd.f32 %v1891_v46, %v1890_v1  ;;  %v5825_v26 = vld [vmem:[#allocation49_spill] sm:$0xff]  ;;  %v3203_v46 = vld [vmem:[%s3711_s27 + $0x280] sm:$0xff] }
 0x1d8   : >> { %v4886_v58 = vpop.eup %2985  ;;  %v1835_v8 = vadd.f32 %v4884_v39, %v4880_v7  ;;  %v1903_v57 = vrot.slane %v1902_v16, 1  ;;  %v1914_v61 = vadd.f32 %v1913_v35, %v1912_v28  ;;  %v1886_v3 = vadd.f32 %v1885_v43, %v1884_v19 }
 0x1d9   : >> { %v1838_v12 = vadd.f32 %v4886_v58, %v4882_v38  ;;  %v1971_v33 = vmul.f32 %v5825_v26, %v4713_v18  ;;  %v1898_v48 = vadd.f32 %v1897_v44, %v1896_v27  ;;  %v1909_v5 = vrot.slane %v1908_v14, 1 }
 0x1da   : >> { %v4888_v6 = vpop.eup %2987  ;;  %v1920_v21 = vadd.f32 %v1919_v51, %v1918_v2  ;;  %v4900_v25 = vmul.f32 %v5826_v9, %v4713_v18  ;;  %v1923_v28 = vmul.f32 1.442695, %v1880_v31  ;;  %v4908_v19 = vmul.f32 %v3203_v46, %v4713_v18  ;;  %v5828_v46 = vld [vmem:[#allocation50_spill] sm:$0xff] }
 0x1db   : >> { %v4894_v30 = vpop.eup %2989  ;;  %v1836_v17 = vadd.f32 %v4888_v6, %v1835_v8  ;;  %v1904_v2 = vadd.f32 %v1903_v57, %v1902_v16  ;;  %v1915_v43 = vrot.slane %v1914_v61, 1  ;;  %v1927_v44 = vmul.f32 1.442695, %v1892_v45  ;;  %v5831_v57 = vld [vmem:[#allocation12_spill] sm:$0xff] }
 0x1dc   : >> { %v2992_v0 = vpop.eup %2991  ;;  %v1839_v1 = vadd.f32 %v4894_v30, %v1838_v12  ;;  %5827 = vst [vmem:[#allocation10_spill] sm:$0xff] %v4908_v19  ;;  %v1925_v26 = vmul.f32 1.442695, %v1886_v3  ;;  %v1910_v12 = vadd.f32 %v1909_v5, %v1908_v14  ;;  %v1921_v31 = vrot.slane %v1920_v21, 1  ;;  %v5830_v5 = vld [vmem:[#allocation35_spill] sm:$0xff] }
 0x1dd   : >> { %v2994_v37 = vpop.eup %2993  ;;  %v1739_v27 = vmul.f32 %v2992_v0, %v4816_v11  ;;  %v1741_v9 = vmul.f32 %v2992_v0, %v4818_v36  ;;  %v1743_v51 = vmul.f32 %v2992_v0, %v4829_v50  ;;  %v1745_v8 = vmul.f32 %v2992_v0, %v4864_v54  ;;  %v5829_v50 = vld [vmem:[#allocation33_spill] sm:$0xff] }
 0x1de   : >> { %v4902_v55 = vpop.eup %2995  ;;  %v1929_v56 = vmul.f32 1.442695, %v1898_v48  ;;  %v1973_v18 = vmul.f32 %v5828_v46, %v4716_v34  ;;  %v1740_v19 = vmul.f32 %v2994_v37, %v4820_v53  ;;  %2999 = vpow2.f32 %v1923_v28 }
 0x1df   : >> { %v4910_v35 = vpop.eup %2997  ;;  %v1837_v11 = vadd.f32 %v4902_v55, %v1836_v17  ;;  %v1916_v45 = vadd.f32 %v1915_v43, %v1914_v61  ;;  %3001 = vpow2.f32 %v1927_v44  ;;  %v1931_v36 = vmul.f32 1.442695, %v1904_v2  ;;  %v5832_v43 = vld [vmem:[#allocation51_spill] sm:$0xff] }
 0x1e0   : >> { %v1840_v16 = vadd.f32 %v4910_v35, %v1839_v1  ;;  %v1972_v54 = vmul.f32 %v5829_v50, %v4732_v63  ;;  %3003 = vpow2.f32 %v1925_v26  ;;  %v1974_v14 = vmul.f32 %v5830_v5, %v4735_v24 }
 0x1e1   : >> { %v1975_v0 = vmul.f32 %v5831_v57, %v4719_v32  ;;  %v1979_v3 = vrot.slane %v1971_v33, 4  ;;  %v1922_v53 = vadd.f32 %v1921_v31, %v1920_v21  ;;  %3005 = vpow2.f32 %v1929_v56 }
 0x1e2   : >> { %v1933_v48 = vmul.f32 1.442695, %v1910_v12  ;;  %v1991_v17 = vrot.slane %v1973_v18, 4  ;;  %v1742_v1 = vmul.f32 %v2994_v37, %v4827_v10  ;;  %v1744_v61 = vmul.f32 %v2994_v37, %v4850_v4  ;;  %v5833_v12 = vld [vmem:[#allocation38_spill] sm:$0xff] }
 0x1e3   : >> { %v1746_v28 = vmul.f32 %v2994_v37, %v4871_v52  ;;  %3007 = vrcp.f32 %v1837_v11  ;;  %v1935_v2 = vmul.f32 1.442695, %v1916_v45  ;;  %v1976_v44 = vmul.f32 %v5832_v43, %v4738_v13 }
 0x1e4   : >> { %3009 = vpow2.f32 %v1931_v36  ;;  %v1985_v26 = vrot.slane %v1972_v54, 4  ;;  %v1980_v46 = vadd.f32 %v1979_v3, %v1971_v33  ;;  %v1997_v50 = vrot.slane %v1974_v14, 4  ;;  %v3206_v3 = vld [vmem:[%s3877_s28 + $0x40] sm:$0xff] }
 0x1e5   : >> { %3011 = vrcp.f32 %v1840_v16  ;;  %v2003_v21 = vrot.slane %v1975_v0, 4  ;;  %v1937_v56 = vmul.f32 1.442695, %v1922_v53  ;;  %v1977_v10 = vmul.f32 %v5833_v12, %v4756_v62 }
 0x1e6   : >> { %3013 = vpow2.f32 %v1933_v48  ;;  %v1992_v31 = vadd.f32 %v1991_v17, %v1973_v18  ;;  %v1747_v4 = vmul.f32 %v4722_v47, %v1739_v27  ;;  %v1749_v52 = vmul.f32 %v4727_v20, %v1741_v9  ;;  %v3207_v48 = vld [vmem:[%s3877_s28 + $0x60] sm:$0xff] }
 0x1e7   : >> { %v1751_v37 = vmul.f32 %v4746_v60, %v1743_v51  ;;  %v1753_v11 = vmul.f32 %v4767_v41, %v1745_v8  ;;  %v1748_v45 = vmul.f32 %v4741_v49, %v1740_v19  ;;  %3015 = vpow2.f32 %v1935_v2  ;;  %v5834_v60 = vld [vmem:[#allocation52_spill] sm:$0xff] }
 0x1e8   : >> { %v1986_v33 = vadd.f32 %v1985_v26, %v1972_v54  ;;  %v2009_v16 = vrot.slane %v1976_v44, 4  ;;  %v4939_v36 = vpop.eup %2999  ;;  %v1750_v5 = vmul.f32 %v4751_v59, %v1742_v1  ;;  %v1981_v18 = vrot.slane %v1980_v46, 2  ;;  %v3204_v59 = vld [vmem:[%s3877_s28] sm:$0xff] }
 0x1e9   : >> { %v1998_v47 = vadd.f32 %v1997_v50, %v1974_v14  ;;  %v2004_v27 = vadd.f32 %v2003_v21, %v1975_v0  ;;  %v4942_v20 = vpop.eup %3001  ;;  %3017 = vpow2.f32 %v1937_v56  ;;  %v1978_v49 = vmul.f32 %v5834_v60, %v4764_v42  ;;  %v3205_v14 = vld [vmem:[%s3877_s28 + $0x20] sm:$0xff]  ;;  %v3208_v50 = vld [vmem:[%s3877_s28 + $0x8] sm:$0xff] }
 0x1ea   : >> { %v1993_v41 = vrot.slane %v1992_v31, 2  ;;  %v2015_v19 = vrot.slane %v1977_v10, 4  ;;  %v4946_v9 = vpop.eup %3003  ;;  %v1752_v51 = vmul.f32 %v4759_v29, %v1744_v61  ;;  %v1754_v8 = vmul.f32 %v4772_v15, %v1746_v28  ;;  %v3211_v60 = vld [vmem:[%s3877_s28 + $0x68] sm:$0xff] }
 0x1eb   : >> { %v4951_v54 = vadd.f32 %v3204_v59, %v1747_v4  ;;  %v4954_v57 = vadd.f32 %v3205_v14, %v1749_v52  ;;  %v4956_v0 = vpop.eup %3005  ;;  %v4959_v53 = vadd.f32 %v3206_v3, %v1751_v37  ;;  %v4962_v17 = vadd.f32 %v3207_v48, %v1753_v11  ;;  %v3209_v37 = vld [vmem:[%s3877_s28 + $0x28] sm:$0xff] }
 0x1ec   : >> { %v1987_v1 = vrot.slane %v1986_v33, 2  ;;  %v2010_v29 = vadd.f32 %v2009_v16, %v1976_v44  ;;  %v1939_v61 = vadd.f32 %v4942_v20, %v4939_v36  ;;  %v1982_v28 = vadd.f32 %v1981_v18, %v1980_v46  ;;  %v3210_v44 = vld [vmem:[%s3877_s28 + $0x48] sm:$0xff] }
 0x1ed   : >> { %v3008_v15 = vpop.eup %3007  ;;  %v1999_v2 = vrot.slane %v1998_v47, 2  ;;  %v2005_v43 = vrot.slane %v2004_v27, 2  ;;  %v4969_v21 = vadd.f32 %v3208_v50, %v1748_v45  ;;  %v1994_v56 = vadd.f32 %v1993_v41, %v1992_v31 }
 0x1ee   : >> { %v4966_v26 = vpop.eup %3009  ;;  %v2016_v12 = vadd.f32 %v2015_v19, %v1977_v10  ;;  %v2021_v4 = vrot.slane %v1978_v49, 4  ;;  %v4972_v11 = vadd.f32 %v3209_v37, %v1750_v5  ;;  %v4975_v16 = vadd.f32 %v3210_v44, %v1752_v51 }
 0x1ef   : >> { %v3012_v52 = vpop.eup %3011  ;;  %v4978_v59 = vadd.f32 %v3211_v60, %v1754_v8  ;;  %v1942_v46 = vadd.f32 %v4956_v0, %v4946_v9  ;;  %v1843_v45 = vmul.f32 %v3008_v15, %v4880_v7  ;;  %v1845_v10 = vmul.f32 %v3008_v15, %v4884_v39 }
 0x1f0   : >> { %v4982_v18 = vpop.eup %3013  ;;  %v1988_v31 = vadd.f32 %v1987_v1, %v1986_v33  ;;  %v2011_v41 = vrot.slane %v2010_v29, 2  ;;  %v1940_v5 = vadd.f32 %v4966_v26, %v1939_v61  ;;  %v1983_v19 = vrot.slane %v1982_v28, 1 }
 0x1f1   : >> { %v2000_v14 = vadd.f32 %v1999_v2, %v1998_v47  ;;  %v2006_v51 = vadd.f32 %v2005_v43, %v2004_v27  ;;  %v4987_v3 = vpop.eup %3015  ;;  %v1847_v8 = vmul.f32 %v3008_v15, %v4888_v6  ;;  %v1995_v48 = vrot.slane %v1994_v56, 1 }
 0x1f2   : >> { %v2017_v50 = vrot.slane %v2016_v12, 2  ;;  %v2022_v37 = vadd.f32 %v2021_v4, %v1978_v49  ;;  %v1844_v44 = vmul.f32 %v3012_v52, %v4882_v38  ;;  %v1846_v7 = vmul.f32 %v3012_v52, %v4886_v58 }
 0x1f3   : >> { %v1849_v39 = vmul.f32 %v3008_v15, %v4902_v55  ;;  %v1943_v33 = vadd.f32 %v4982_v18, %v1942_v46  ;;  %v4994_v1 = vpop.eup %3017  ;;  %v1848_v47 = vmul.f32 %v3012_v52, %v4894_v30  ;;  %v1850_v27 = vmul.f32 %v3012_v52, %v4910_v35  ;;  %v5000_v55 = vld [vmem:[%s3711_s27 + $0x208] sm:$0xff] }
 0x1f4   : >> { %v1989_v61 = vrot.slane %v1988_v31, 1  ;;  %v2012_v6 = vadd.f32 %v2011_v41, %v2010_v29  ;;  %v1941_v49 = vadd.f32 %v4987_v3, %v1940_v5  ;;  %v1984_v2 = vadd.f32 %v1983_v19, %v1982_v28  ;;  %5835 = vst [vmem:[#allocation13_spill] sm:$0xff] %v5000_v55  ;;  %v5009_v41 = vld [vmem:[%s3711_s27 + $0x220] sm:$0xff] }
 0x1f5   : >> { %v2001_v38 = vrot.slane %v2000_v14, 1  ;;  %v2007_v43 = vrot.slane %v2006_v51, 1  ;;  %v1996_v4 = vadd.f32 %v1995_v48, %v1994_v56  ;;  %v2018_v58 = vadd.f32 %v2017_v50, %v2016_v12  ;;  %5836 = vst [vmem:[#allocation15_spill] sm:$0xff] %v5009_v41 }
 0x1f6   : >> { %v2023_v60 = vrot.slane %v2022_v37, 2  ;;  %v2076_v15 = vmul.f32 %v5000_v55, %v4732_v63  ;;  %v1851_v30 = vmul.f32 %v4777_v23, %v1843_v45  ;;  %v1853_v35 = vmul.f32 %v4787_v22, %v1845_v10 }
 0x1f7   : >> { %v1855_v29 = vmul.f32 %v4797_v40, %v1847_v8  ;;  %v1944_v52 = vadd.f32 %v4994_v1, %v1943_v33  ;;  %v1990_v46 = vadd.f32 %v1989_v61, %v1988_v31  ;;  %v2013_v28 = vrot.slane %v2012_v6, 1  ;;  %v5837_v8 = vld [vmem:[#allocation27_spill] sm:$0xff]  ;;  %v5839_v33 = vld [vmem:[#allocation17_spill] sm:$0xff] }
 0x1f8   : >> { %v2077_v56 = vmul.f32 %v5009_v41, %v4716_v34  ;;  %v2083_v12 = vrot.slane %v4900_v25, 4  ;;  %3019 = vrcp.f32 %v1941_v49  ;;  %v2002_v5 = vadd.f32 %v2001_v38, %v2000_v14  ;;  %v5838_v31 = vld [vmem:[#allocation31_spill] sm:$0xff] }
 0x1f9   : >> { %v2008_v19 = vadd.f32 %v2007_v43, %v2006_v51  ;;  %v2027_v23 = vmul.f32 1.442695, %v1984_v2  ;;  %v2019_v45 = vrot.slane %v2018_v58, 1  ;;  %v2024_v22 = vadd.f32 %v2023_v60, %v2022_v37  ;;  %v5018_v41 = vld [vmem:[%s3711_s27 + $0x240] sm:$0xff]  ;;  %v5841_v43 = vld [vmem:[#allocation37_spill] sm:$0xff] }
 0x1fa   : >> { %v2031_v10 = vmul.f32 1.442695, %v1996_v4  ;;  %v2089_v40 = vrot.slane %v2076_v15, 4  ;;  %v1852_v48 = vmul.f32 %v5837_v8, %v1844_v44  ;;  %v1854_v50 = vmul.f32 %v5838_v31, %v1846_v7  ;;  %5840 = vst [vmem:[#allocation20_spill] sm:$0xff] %v5018_v41  ;;  %v5842_v60 = vld [vmem:[#allocation19_spill] sm:$0xff]  ;;  %v5029_v8 = vld [vmem:[%s3711_s27 + $0x228] sm:$0xff] }
 0x1fb   : >> { %v1857_v61 = vmul.f32 %v5839_v33, %v1849_v39  ;;  %3021 = vrcp.f32 %v1944_v52  ;;  %v2029_v55 = vmul.f32 1.442695, %v1990_v46  ;;  %v2079_v14 = vmul.f32 %v5018_v41, %v4719_v32  ;;  %5843 = vst [vmem:[#allocation24_spill] sm:$0xff] %v5029_v8 }
 0x1fc   : >> { %v2084_v51 = vadd.f32 %v2083_v12, %v4900_v25  ;;  %v2095_v49 = vrot.slane %v2077_v56, 4  ;;  %v2014_v37 = vadd.f32 %v2013_v28, %v2012_v6  ;;  %3023 = vpow2.f32 %v2027_v23 }
 0x1fd   : >> { %v2033_v2 = vmul.f32 1.442695, %v2002_v5  ;;  %v2035_v38 = vmul.f32 1.442695, %v2008_v19  ;;  %v2020_v44 = vadd.f32 %v2019_v45, %v2018_v58  ;;  %v2025_v7 = vrot.slane %v2024_v22, 1  ;;  %v5053_v45 = vld [vmem:[%s3711_s27 + $0x268] sm:$0xff] }
 0x1fe   : >> { %3025 = vpow2.f32 %v2031_v10  ;;  %v2090_v39 = vadd.f32 %v2089_v40, %v2076_v15  ;;  %v1856_v4 = vmul.f32 %v5841_v43, %v1848_v47  ;;  %v1858_v52 = vmul.f32 %v5842_v60, %v1850_v27  ;;  %v5037_v27 = vld [vmem:[%s3711_s27 + $0x248] sm:$0xff]  ;;  %5846 = vst [vmem:[#allocation22_spill] sm:$0xff] %v5053_v45 }
 0x1ff   : >> { %v5026_v46 = vadd.f32 %v1851_v30, %v4951_v54  ;;  %v2078_v25 = vmul.f32 %v5029_v8, %v4735_v24  ;;  %3027 = vpow2.f32 %v2029_v55  ;;  %v2085_v6 = vrot.slane %v2084_v51, 2  ;;  %5844 = vst [vmem:[#allocation14_spill] sm:$0xff] %v5037_v27 }
 0x200   : >> { %v2096_v58 = vadd.f32 %v2095_v49, %v2077_v56  ;;  %v2107_v28 = vrot.slane %v2079_v14, 4  ;;  %v5034_v15 = vadd.f32 %v1853_v35, %v4954_v57  ;;  %3029 = vpow2.f32 %v2033_v2  ;;  %v5048_v57 = vld [vmem:[%s3711_s27 + $0x260] sm:$0xff] }
 0x201   : >> { %v2037_v47 = vmul.f32 1.442695, %v2014_v37  ;;  %v2080_v54 = vmul.f32 %v5037_v27, %v4738_v13  ;;  %v2026_v30 = vadd.f32 %v2025_v7, %v2024_v22  ;;  %3031 = vpow2.f32 %v2035_v38  ;;  %5845 = vst [vmem:[#allocation16_spill] sm:$0xff] %v5048_v57  ;;  %v5142_v27 = vld [vmem:[%s3711_s27 + $0x2c8] sm:$0xff] }
 0x202   : >> { %v2039_v12 = vmul.f32 1.442695, %v2020_v44  ;;  %v2091_v5 = vrot.slane %v2090_v39, 2  ;;  %v3020_v55 = vpop.eup %3019  ;;  %v5042_v19 = vadd.f32 %v1855_v29, %v4959_v53  ;;  %v5045_v56 = vadd.f32 %v1857_v61, %v4962_v17  ;;  %5865 = vst [vmem:[#allocation45_spill] sm:$0xff] %v5142_v27 }
 0x203   : >> { %v2081_v35 = vmul.f32 %v5048_v57, %v4756_v62  ;;  %v2101_v23 = vrot.slane %v2078_v25, 4  ;;  %v2082_v22 = vmul.f32 %v5053_v45, %v4764_v42  ;;  %v2086_v10 = vadd.f32 %v2085_v6, %v2084_v51 }
 0x204   : >> { %v2097_v40 = vrot.slane %v2096_v58, 2  ;;  %v2108_v31 = vadd.f32 %v2107_v28, %v2079_v14  ;;  %v5058_v53 = vadd.f32 %v1852_v48, %v4969_v21  ;;  %v5061_v17 = vadd.f32 %v1854_v50, %v4972_v11 }
 0x205   : >> { %v3022_v33 = vpop.eup %3021  ;;  %3033 = vpow2.f32 %v2037_v47  ;;  %v2113_v29 = vrot.slane %v2080_v54, 4  ;;  %v5064_v61 = vadd.f32 %v1856_v4, %v4975_v16  ;;  %v2041_v49 = vmul.f32 1.442695, %v2026_v30 }
 0x206   : >> { %3035 = vpow2.f32 %v2039_v12  ;;  %v2092_v37 = vadd.f32 %v2091_v5, %v2090_v39  ;;  %v5066_v2 = vpop.eup %3023  ;;  %v5069_v51 = vadd.f32 %v1858_v52, %v4978_v59  ;;  %v1947_v14 = vmul.f32 %v3020_v55, %v4939_v36  ;;  %v5852_v5 = vld [vmem:[#allocation29_spill] sm:$0xff] }
 0x207   : >> { %v2102_v21 = vadd.f32 %v2101_v23, %v2078_v25  ;;  %v2119_v48 = vrot.slane %v2081_v35, 4  ;;  %v2087_v11 = vrot.slane %v2086_v10, 1  ;;  %v2098_v50 = vadd.f32 %v2097_v40, %v2096_v58  ;;  %v5853_v23 = vld [vmem:[#allocation28_spill] sm:$0xff] }
 0x208   : >> { %v5072_v38 = vpop.eup %3025  ;;  %v2109_v44 = vrot.slane %v2108_v31, 2  ;;  %v2125_v7 = vrot.slane %v2082_v22, 4  ;;  %v1949_v16 = vmul.f32 %v3020_v55, %v4942_v20  ;;  %v1951_v43 = vmul.f32 %v3020_v55, %v4966_v26 }
 0x209   : >> { %5847 = vst [vmem:[#allocation30_spill] sm:$0xff] %v5072_v38  ;;  %v1953_v39 = vmul.f32 %v3020_v55, %v4987_v3  ;;  %v2114_v4 = vadd.f32 %v2113_v29, %v2080_v54  ;;  %v5077_v60 = vpop.eup %3027  ;;  %v1948_v59 = vmul.f32 %v3022_v33, %v4946_v9  ;;  %v1950_v36 = vmul.f32 %v3022_v33, %v4956_v0  ;;  %v5851_v0 = vld [vmem:[#allocation18_spill] sm:$0xff] }
 0x20a   : >> { %5848 = vst [vmem:[#allocation32_spill] sm:$0xff] %v5077_v60  ;;  %3037 = vpow2.f32 %v2041_v49  ;;  %v2093_v52 = vrot.slane %v2092_v37, 1  ;;  %v5081_v25 = vpop.eup %3029  ;;  %v1952_v6 = vmul.f32 %v3022_v33, %v4982_v18  ;;  %v2043_v20 = vadd.f32 %v5072_v38, %v5066_v2 }
 0x20b   : >> { %5849 = vst [vmem:[#allocation39_spill] sm:$0xff] %v5081_v25  ;;  %v2103_v58 = vrot.slane %v2102_v21, 2  ;;  %v2120_v26 = vadd.f32 %v2119_v48, %v2081_v35  ;;  %v5086_v28 = vpop.eup %3031  ;;  %v2088_v3 = vadd.f32 %v2087_v11, %v2086_v10  ;;  %v2099_v47 = vrot.slane %v2098_v50, 1  ;;  %v5854_v35 = vld [vmem:[#allocation8_spill] sm:$0xff]  ;;  %v5855_v10 = vld [vmem:[#allocation7_spill] sm:$0xff] }
 0x20c   : >> { %5850 = vst [vmem:[#allocation41_spill] sm:$0xff] %v5086_v28  ;;  %v2110_v54 = vadd.f32 %v2109_v44, %v2108_v31  ;;  %v2126_v30 = vadd.f32 %v2125_v7, %v2082_v22  ;;  %v5089_v9 = vmul.f32 %v3022_v33, %v4994_v1  ;;  %v5092_v12 = vmul.f32 %v5851_v0, %v1947_v14  ;;  %v5860_v0 = vld [vmem:[#allocation10_spill] sm:$0xff] }
 0x20d   : >> { %v5095_v55 = vmul.f32 %v5852_v5, %v1949_v16  ;;  %v2115_v18 = vrot.slane %v2114_v4, 2  ;;  %v5098_v40 = vmul.f32 %v5853_v23, %v1948_v59  ;;  %v5101_v29 = vmul.f32 %v5854_v35, %v1951_v43 }
 0x20e   : >> { %v5104_v31 = vmul.f32 %v5855_v10, %v1953_v39  ;;  %v2094_v22 = vadd.f32 %v2093_v52, %v2092_v37  ;;  %v2044_v33 = vadd.f32 %v5086_v28, %v2043_v20  ;;  %v2046_v49 = vadd.f32 %v5081_v25, %v5077_v60  ;;  %v5858_v39 = vld [vmem:[#allocation34_spill] sm:$0xff]  ;;  %v5117_v52 = vld [vmem:[%s3711_s27 + $0x288] sm:$0xff] }
 0x20f   : >> { %v5106_v1 = vpop.eup %3033  ;;  %v2104_v14 = vadd.f32 %v2103_v58, %v2102_v21  ;;  %v2121_v48 = vrot.slane %v2120_v26, 2  ;;  %v2100_v44 = vadd.f32 %v2099_v47, %v2098_v50  ;;  %v2111_v7 = vrot.slane %v2110_v54, 1  ;;  %5859 = vst [vmem:[#allocation40_spill] sm:$0xff] %v5117_v52  ;;  %v5123_v58 = vld [vmem:[%s3711_s27 + $0x2a0] sm:$0xff]  ;;  %v5128_v47 = vld [vmem:[%s3711_s27 + $0x2a8] sm:$0xff] }
 0x210   : >> { %5856 = vst [vmem:[#allocation43_spill] sm:$0xff] %v5106_v1  ;;  %v5111_v11 = vpop.eup %3035  ;;  %v2127_v16 = vrot.slane %v2126_v30, 2  ;;  %v2131_v43 = vmul.f32 1.442695, %v2088_v3  ;;  %v5114_v37 = vmul.f32 %v5858_v39, %v1950_v36  ;;  %v2116_v59 = vadd.f32 %v2115_v18, %v2114_v4  ;;  %5861 = vst [vmem:[#allocation42_spill] sm:$0xff] %v5123_v58  ;;  %v5133_v4 = vld [vmem:[%s3711_s27 + $0x2c0] sm:$0xff] }
 0x211   : >> { %5857 = vst [vmem:[#allocation36_spill] sm:$0xff] %v5111_v11  ;;  %v2180_v20 = vmul.f32 %v5117_v52, %v4732_v63  ;;  %v2187_v5 = vrot.slane %v5860_v0, 4  ;;  %v2133_v21 = vmul.f32 1.442695, %v2094_v22  ;;  %v2181_v50 = vmul.f32 %v5123_v58, %v4716_v34  ;;  %5862 = vst [vmem:[#allocation44_spill] sm:$0xff] %v5128_v47 }
 0x212   : >> { %v2182_v36 = vmul.f32 %v5128_v47, %v4735_v24  ;;  %5863 = vst [vmem:[#allocation23_spill] sm:$0xff] %v5133_v4  ;;  %v2183_v3 = vmul.f32 %v5133_v4, %v4719_v32  ;;  %v2045_v18 = vadd.f32 %v5111_v11, %v2044_v33  ;;  %v2047_v23 = vadd.f32 %v5106_v1, %v2046_v49 }
 0x213   : >> { %v2105_v35 = vrot.slane %v2104_v14, 1  ;;  %v2122_v10 = vadd.f32 %v2121_v48, %v2120_v26  ;;  %v2112_v39 = vadd.f32 %v2111_v7, %v2110_v54  ;;  %v2128_v52 = vadd.f32 %v2127_v16, %v2126_v30  ;;  %v5866_v48 = vld [vmem:[#allocation11_spill] sm:$0xff] }
 0x214   : >> { %v5139_v22 = vpop.eup %3037  ;;  %3039 = vpow2.f32 %v2131_v43  ;;  %v2135_v58 = vmul.f32 1.442695, %v2100_v44  ;;  %v2117_v45 = vrot.slane %v2116_v59, 1  ;;  %v2184_v47 = vmul.f32 %v5142_v27, %v4738_v13  ;;  %v5152_v27 = vld [vmem:[%s3711_s27 + $0x2e0] sm:$0xff] }
 0x215   : >> { %5864 = vst [vmem:[#allocation26_spill] sm:$0xff] %v5139_v22  ;;  %v2188_v4 = vadd.f32 %v2187_v5, %v5860_v0  ;;  %v2193_v8 = vrot.slane %v2180_v20, 4  ;;  %3041 = vpow2.f32 %v2133_v21  ;;  %v2199_v33 = vrot.slane %v2181_v50, 4  ;;  %5867 = vst [vmem:[#allocation46_spill] sm:$0xff] %v5152_v27 }
 0x216   : >> { %v2205_v49 = vrot.slane %v2182_v36, 4  ;;  %v2211_v26 = vrot.slane %v2183_v3, 4  ;;  %v5148_v57 = vmul.f32 %v5866_v48, %v1952_v6  ;;  %v2048_v54 = vadd.f32 %v5139_v22, %v2047_v23 }
 0x217   : >> { %3043 = vrcp.f32 %v2045_v18  ;;  %v2123_v30 = vrot.slane %v2122_v10, 1  ;;  %v2106_v44 = vadd.f32 %v2105_v35, %v2104_v14  ;;  %v2129_v7 = vrot.slane %v2128_v52, 1  ;;  %v5868_v18 = vld [vmem:[#allocation9_spill] sm:$0xff] }
 0x218   : >> { %3045 = vpow2.f32 %v2135_v58  ;;  %v2139_v16 = vmul.f32 1.442695, %v2112_v39  ;;  %v2118_v43 = vadd.f32 %v2117_v45, %v2116_v59  ;;  %v2189_v0 = vrot.slane %v2188_v4, 2  ;;  %v5161_v58 = vld [vmem:[%s3711_s27 + $0x2e8] sm:$0xff] }
 0x219   : >> { %v2194_v5 = vadd.f32 %v2193_v8, %v2180_v20  ;;  %v2217_v21 = vrot.slane %v2184_v47, 4  ;;  %v2185_v41 = vmul.f32 %v5152_v27, %v4756_v62  ;;  %v2200_v6 = vadd.f32 %v2199_v33, %v2181_v50  ;;  %5869 = vst [vmem:[#allocation47_spill] sm:$0xff] %v5161_v58 }
 0x21a   : >> { %v2206_v48 = vadd.f32 %v2205_v49, %v2182_v36  ;;  %v2212_v1 = vadd.f32 %v2211_v26, %v2183_v3  ;;  %v5158_v23 = vmul.f32 %v5868_v18, %v5089_v9  ;;  %3047 = vrcp.f32 %v2048_v54 }
 0x21b   : >> { %v2124_v14 = vadd.f32 %v2123_v30, %v2122_v10  ;;  %v2186_v8 = vmul.f32 %v5161_v58, %v4764_v42  ;;  %v5167_v45 = vadd.f32 %v5092_v12, %v5026_v46  ;;  %v2130_v59 = vadd.f32 %v2129_v7, %v2128_v52  ;;  %v5172_v30 = vld [vmem:[%s3711_s27 + $0x300] sm:$0xff]  ;;  %v5873_v46 = vld [vmem:[#allocation25_spill] sm:$0xff]  ;;  %v5177_v52 = vld [vmem:[%s3711_s27 + $0x308] sm:$0xff] }
 0x21c   : >> { %v2137_v20 = vmul.f32 1.442695, %v2106_v44  ;;  %3049 = vpow2.f32 %v2139_v16  ;;  %v2141_v50 = vmul.f32 1.442695, %v2118_v43  ;;  %v2190_v36 = vadd.f32 %v2189_v0, %v2188_v4  ;;  %5872 = vst [vmem:[#allocation21_spill] sm:$0xff] %v5172_v30  ;;  %5874 = vst [vmem:[#allocation50_spill] sm:$0xff] %v5177_v52 }
 0x21d   : >> { %5870 = vst [vmem:[#allocation48_spill] sm:$0xff] %v5167_v45  ;;  %v2195_v9 = vrot.slane %v2194_v5, 2  ;;  %v2218_v3 = vadd.f32 %v2217_v21, %v2184_v47  ;;  %v2201_v10 = vrot.slane %v2200_v6, 2  ;;  %v2207_v39 = vrot.slane %v2206_v48, 2  ;;  %v5188_v16 = vld [vmem:[%s3711_s27 + $0x320] sm:$0xff] }
 0x21e   : >> { %v5169_v35 = vpop.eup %3039  ;;  %v2213_v33 = vrot.slane %v2212_v1, 2  ;;  %v2223_v49 = vrot.slane %v2185_v41, 4  ;;  %v2143_v26 = vmul.f32 1.442695, %v2124_v14  ;;  %v2229_v54 = vrot.slane %v2186_v8, 4  ;;  %5876 = vst [vmem:[#allocation35_spill] sm:$0xff] %v5188_v16 }
 0x21f   : >> { %5871 = vst [vmem:[#allocation49_spill] sm:$0xff] %v5169_v35  ;;  %v2283_v12 = vmul.f32 %v5172_v30, %v5873_v46  ;;  %v2284_v4 = vmul.f32 %v5177_v52, %v4732_v63  ;;  %v5181_v47 = vpop.eup %3041  ;;  %v5185_v44 = vadd.f32 %v5095_v55, %v5034_v15  ;;  %3051 = vpow2.f32 %v2137_v20 }
 0x220   : >> { %v2145_v7 = vmul.f32 1.442695, %v2130_v59  ;;  %v2285_v43 = vmul.f32 %v5188_v16, %v4716_v34  ;;  %3053 = vpow2.f32 %v2141_v50  ;;  %v2191_v21 = vrot.slane %v2190_v36, 1  ;;  %v5202_v50 = vld [vmem:[%s3711_s27 + $0x340] sm:$0xff] }
 0x221   : >> { %5875 = vst [vmem:[#allocation33_spill] sm:$0xff] %v5185_v44  ;;  %v5192_v0 = vpop.eup %3043  ;;  %v2196_v18 = vadd.f32 %v2195_v9, %v2194_v5  ;;  %v2219_v14 = vrot.slane %v2218_v3, 2  ;;  %v2202_v15 = vadd.f32 %v2201_v10, %v2200_v6  ;;  %v2208_v55 = vadd.f32 %v2207_v39, %v2206_v48  ;;  %v5197_v44 = vld [vmem:[%s3711_s27 + $0x328] sm:$0xff]  ;;  %5880 = vst [vmem:[#allocation52_spill] sm:$0xff] %v5202_v50 }
 0x222   : >> { %5877 = vst [vmem:[#allocation12_spill] sm:$0xff] %v5192_v0  ;;  %v5194_v52 = vpop.eup %3045  ;;  %v2214_v20 = vadd.f32 %v2213_v33, %v2212_v1  ;;  %v2224_v59 = vadd.f32 %v2223_v49, %v2185_v41  ;;  %3055 = vpow2.f32 %v2143_v26  ;;  %v2230_v30 = vadd.f32 %v2229_v54, %v2186_v8  ;;  %5879 = vst [vmem:[#allocation38_spill] sm:$0xff] %v5197_v44  ;;  %v5207_v9 = vld [vmem:[%s3711_s27 + $0x348] sm:$0xff] }
 0x223   : >> { %5878 = vst [vmem:[#allocation51_spill] sm:$0xff] %v5194_v52  ;;  %v2291_v58 = vrot.slane %v2283_v12, 4  ;;  %v2297_v27 = vrot.slane %v2284_v4, 4  ;;  %v2286_v16 = vmul.f32 %v5197_v44, %v4735_v24  ;;  %v2287_v5 = vmul.f32 %v5202_v50, %v4719_v32  ;;  %5881 = vst [vmem:[#allocation27_spill] sm:$0xff] %v5207_v9 }
 0x224   : >> { %v2288_v1 = vmul.f32 %v5207_v9, %v4738_v13  ;;  %v2303_v41 = vrot.slane %v2285_v43, 4  ;;  %v5211_v6 = vpop.eup %3047  ;;  %v2147_v48 = vadd.f32 %v5194_v52, %v5169_v35  ;;  %v2192_v8 = vadd.f32 %v2191_v21, %v2190_v36 }
 0x225   : >> { %5882 = vst [vmem:[#allocation31_spill] sm:$0xff] %v5211_v6  ;;  %v2197_v10 = vrot.slane %v2196_v18, 1  ;;  %v2220_v39 = vadd.f32 %v2219_v14, %v2218_v3  ;;  %v2203_v49 = vrot.slane %v2202_v15, 1  ;;  %v2209_v26 = vrot.slane %v2208_v55, 1 }
 0x226   : >> { %v5215_v33 = vpop.eup %3049  ;;  %v2215_v54 = vrot.slane %v2214_v20, 1  ;;  %v2225_v44 = vrot.slane %v2224_v59, 2  ;;  %3057 = vpow2.f32 %v2145_v7  ;;  %v2231_v50 = vrot.slane %v2230_v30, 2 }
 0x227   : >> { %5883 = vst [vmem:[#allocation17_spill] sm:$0xff] %v5215_v33  ;;  %v2292_v45 = vadd.f32 %v2291_v58, %v2283_v12  ;;  %v2298_v22 = vadd.f32 %v2297_v27, %v2284_v4  ;;  %v2304_v9 = vadd.f32 %v2303_v41, %v2285_v43  ;;  %v2309_v25 = vrot.slane %v2286_v16, 4  ;;  %v5223_v27 = vld [vmem:[%s3711_s27 + $0x360] sm:$0xff] }
 0x228   : >> { %v2315_v11 = vrot.slane %v2287_v5, 4  ;;  %v2321_v6 = vrot.slane %v2288_v1, 4  ;;  %v2148_v52 = vadd.f32 %v5215_v33, %v2147_v48  ;;  %v2198_v36 = vadd.f32 %v2197_v10, %v2196_v18  ;;  %5884 = vst [vmem:[#allocation37_spill] sm:$0xff] %v5223_v27 }
 0x229   : >> { %v2221_v21 = vrot.slane %v2220_v39, 1  ;;  %v2235_v3 = vmul.f32 1.442695, %v2192_v8  ;;  %v5218_v14 = vpop.eup %3051  ;;  %v2204_v35 = vadd.f32 %v2203_v49, %v2202_v15  ;;  %v2210_v60 = vadd.f32 %v2209_v26, %v2208_v55  ;;  %v5230_v26 = vld [vmem:[%s3711_s27 + $0x368] sm:$0xff] }
 0x22a   : >> { %v2216_v28 = vadd.f32 %v2215_v54, %v2214_v20  ;;  %v2226_v38 = vadd.f32 %v2225_v44, %v2224_v59  ;;  %v5220_v7 = vpop.eup %3053  ;;  %v2232_v58 = vadd.f32 %v2231_v50, %v2230_v30  ;;  %v2289_v12 = vmul.f32 %v5223_v27, %v4756_v62  ;;  %5885 = vst [vmem:[#allocation19_spill] sm:$0xff] %v5230_v26 }
 0x22b   : >> { %v2293_v4 = vrot.slane %v2292_v45, 2  ;;  %v2299_v43 = vrot.slane %v2298_v22, 2  ;;  %v2305_v18 = vrot.slane %v2304_v9, 2  ;;  %v2310_v41 = vadd.f32 %v2309_v25, %v2286_v16 }
 0x22c   : >> { %v2316_v48 = vadd.f32 %v2315_v11, %v2287_v5  ;;  %v2322_v8 = vadd.f32 %v2321_v6, %v2288_v1  ;;  %v5227_v10 = vpop.eup %3055  ;;  %v2222_v15 = vadd.f32 %v2221_v21, %v2220_v39  ;;  %3059 = vpow2.f32 %v2235_v3 }
 0x22d   : >> { %v2237_v44 = vmul.f32 1.442695, %v2198_v36  ;;  %v2294_v55 = vadd.f32 %v2293_v4, %v2292_v45  ;;  %v2239_v20 = vmul.f32 1.442695, %v2204_v35  ;;  %v2300_v30 = vadd.f32 %v2299_v43, %v2298_v22 }
 0x22e   : >> { %v2311_v59 = vrot.slane %v2310_v41, 2  ;;  %v2317_v50 = vrot.slane %v2316_v48, 2  ;;  %v2227_v49 = vrot.slane %v2226_v38, 1  ;;  %v2290_v54 = vmul.f32 %v5230_v26, %v4764_v42 }
 0x22f   : >> { %v2306_v27 = vadd.f32 %v2305_v18, %v2304_v9  ;;  %v2327_v25 = vrot.slane %v2289_v12, 4  ;;  %v2233_v11 = vrot.slane %v2232_v58, 1  ;;  %v2241_v16 = vmul.f32 1.442695, %v2210_v60 }
 0x230   : >> { %v2312_v5 = vadd.f32 %v2311_v59, %v2310_v41  ;;  %v2323_v1 = vrot.slane %v2322_v8, 2  ;;  %v5234_v6 = vpop.eup %3057  ;;  %v2149_v45 = vadd.f32 %v5227_v10, %v2148_v52  ;;  %3061 = vpow2.f32 %v2237_v44 }
 0x231   : >> { %v2295_v22 = vrot.slane %v2294_v55, 1  ;;  %v2318_v35 = vadd.f32 %v2317_v50, %v2316_v48  ;;  %3063 = vpow2.f32 %v2239_v20  ;;  %v2243_v39 = vmul.f32 1.442695, %v2216_v28 }
 0x232   : >> { %v2245_v36 = vmul.f32 1.442695, %v2222_v15  ;;  %v2301_v21 = vrot.slane %v2300_v30, 1  ;;  %v2228_v3 = vadd.f32 %v2227_v49, %v2226_v38  ;;  %v2307_v4 = vrot.slane %v2306_v27, 1  ;;  %v5250_v49 = vld [vmem:[%s3711_s27 + $0x380] sm:$0xff] }
 0x233   : >> { %v2328_v43 = vadd.f32 %v2327_v25, %v2289_v12  ;;  %v2333_v9 = vrot.slane %v2290_v54, 4  ;;  %v2234_v18 = vadd.f32 %v2233_v11, %v2232_v58  ;;  %3065 = vpow2.f32 %v2241_v16  ;;  %v5261_v11 = vld [vmem:[%s3711_s27 + $0x388] sm:$0xff] }
 0x234   : >> { %v2313_v60 = vrot.slane %v2312_v5, 1  ;;  %v2324_v41 = vadd.f32 %v2323_v1, %v2322_v8  ;;  %v2296_v59 = vadd.f32 %v2295_v22, %v2294_v55  ;;  %v2319_v26 = vrot.slane %v2318_v35, 1 }
 0x235   : >> { %v2329_v33 = vrot.slane %v2328_v43, 2  ;;  %v2334_v0 = vadd.f32 %v2333_v9, %v2290_v54  ;;  %v5239_v52 = vadd.f32 %v5101_v29, %v5042_v19  ;;  %v5243_v28 = vadd.f32 %v5104_v31, %v5045_v56 }
 0x236   : >> { %3067 = vpow2.f32 %v2243_v39  ;;  %v2302_v38 = vadd.f32 %v2301_v21, %v2300_v30  ;;  %v5245_v12 = vpop.eup %3059  ;;  %v2247_v58 = vmul.f32 1.442695, %v2228_v3  ;;  %v2308_v48 = vadd.f32 %v2307_v4, %v2306_v27  ;;  %v5284_v39 = vld [vmem:[%s3711_s27 + $0x3a8] sm:$0xff] }
 0x237   : >> { %v2330_v8 = vadd.f32 %v2329_v33, %v2328_v43  ;;  %v2335_v15 = vrot.slane %v2334_v0, 2  ;;  %3069 = vrcp.f32 %v2149_v45  ;;  %v2249_v44 = vmul.f32 1.442695, %v2234_v18  ;;  %5886 = vst [vmem:[#allocation18_spill] sm:$0xff] %v5284_v39 }
 0x238   : >> { %v2314_v55 = vadd.f32 %v2313_v60, %v2312_v5  ;;  %v2325_v20 = vrot.slane %v2324_v41, 1  ;;  %v2150_v19 = vadd.f32 %v5218_v14, %v5181_v47  ;;  %3071 = vpow2.f32 %v2245_v36  ;;  %v5311_v60 = vld [vmem:[%s3711_s27 + $0x3c8] sm:$0xff] }
 0x239   : >> { %v2320_v56 = vadd.f32 %v2319_v26, %v2318_v35  ;;  %v2339_v29 = vmul.f32 1.442695, %v2296_v59  ;;  %v2331_v31 = vrot.slane %v2330_v8, 1  ;;  %v2336_v30 = vadd.f32 %v2335_v15, %v2334_v0  ;;  %5887 = vst [vmem:[#allocation29_spill] sm:$0xff] %v5311_v60 }
 0x23a   : >> { %v2341_v50 = vmul.f32 1.442695, %v2302_v38  ;;  %v2387_v33 = vmul.f32 %v5250_v49, %v5873_v46  ;;  %v5254_v27 = vpop.eup %3061  ;;  %v5258_v54 = vadd.f32 %v5098_v40, %v5058_v53  ;;  %3073 = vpow2.f32 %v2247_v58  ;;  %v5318_v58 = vld [vmem:[%s3711_s27 + $0x3e0] sm:$0xff] }
 0x23b   : >> { %v2343_v25 = vmul.f32 1.442695, %v2308_v48  ;;  %v2388_v26 = vmul.f32 %v5261_v11, %v4732_v63  ;;  %v5265_v0 = vpop.eup %3063  ;;  %v5269_v16 = vadd.f32 %v5114_v37, %v5061_v17  ;;  %3075 = vpow2.f32 %v2249_v44  ;;  %v5279_v37 = vld [vmem:[%s3711_s27 + $0x3a0] sm:$0xff] }
 0x23c   : >> { %v2326_v46 = vadd.f32 %v2325_v20, %v2324_v41  ;;  %v2345_v5 = vmul.f32 1.442695, %v2314_v55  ;;  %v5273_v53 = vadd.f32 %v5148_v57, %v5064_v61  ;;  %v2151_v40 = vadd.f32 %v5220_v7, %v2150_v19  ;;  %v5324_v55 = vld [vmem:[%s3711_s27 + $0x3e8] sm:$0xff] }
 0x23d   : >> { %3077 = vpow2.f32 %v2339_v29  ;;  %v2347_v1 = vmul.f32 1.442695, %v2320_v56  ;;  %v5276_v63 = vpop.eup %3065  ;;  %v2332_v45 = vadd.f32 %v2331_v31, %v2330_v8  ;;  %v2337_v22 = vrot.slane %v2336_v30, 1  ;;  %5888 = vst [vmem:[#allocation28_spill] sm:$0xff] %v5324_v55 }
 0x23e   : >> { %3079 = vpow2.f32 %v2341_v50  ;;  %v2395_v17 = vrot.slane %v2387_v33, 4  ;;  %v2389_v35 = vmul.f32 %v5279_v37, %v4716_v34  ;;  %v2390_v57 = vmul.f32 %v5284_v39, %v4735_v24  ;;  %v5304_v24 = vld [vmem:[%s3711_s27 + $0x3c0] sm:$0xff] }
 0x23f   : >> { %3081 = vpow2.f32 %v2343_v25  ;;  %v2401_v61 = vrot.slane %v2388_v26, 4  ;;  %v5292_v21 = vadd.f32 %v5158_v23, %v5069_v51  ;;  %v2251_v3 = vadd.f32 %v5265_v0, %v5245_v12 }
 0x240   : >> { %v5288_v36 = vpop.eup %3067  ;;  %3083 = vpow2.f32 %v2345_v5  ;;  %v2349_v4 = vmul.f32 1.442695, %v2326_v46  ;;  %v5297_v34 = vadd.f32 %v5234_v6, %v2151_v40  ;;  %v5301_v43 = vadd.f32 %v5276_v63, %v5254_v27 }
 0x241   : >> { %3085 = vpow2.f32 %v2347_v1  ;;  %v2391_v51 = vmul.f32 %v5304_v24, %v4719_v32  ;;  %v5308_v23 = vpop.eup %3069  ;;  %v2338_v9 = vadd.f32 %v2337_v22, %v2336_v30  ;;  %v2351_v18 = vmul.f32 1.442695, %v2332_v45 }
 0x242   : >> { %v2392_v41 = vmul.f32 %v5311_v60, %v4738_v13  ;;  %v2396_v59 = vadd.f32 %v2395_v17, %v2387_v33  ;;  %v5315_v38 = vpop.eup %3071  ;;  %v2393_v48 = vmul.f32 %v5318_v58, %v4756_v62  ;;  %v2402_v8 = vadd.f32 %v2401_v61, %v2388_v26 }
 0x243   : >> { %v2407_v15 = vrot.slane %v2389_v35, 4  ;;  %v2413_v32 = vrot.slane %v2390_v57, 4  ;;  %v2252_v44 = vadd.f32 %v5288_v36, %v2251_v3  ;;  %3087 = vpow2.f32 %v2349_v4 }
 0x244   : >> { %v2394_v20 = vmul.f32 %v5324_v55, %v4764_v42  ;;  %v2397_v13 = vrot.slane %v2396_v59, 2  ;;  %v5328_v19 = vpop.eup %3073  ;;  %3089 = vpow2.f32 %v2351_v18  ;;  %v2403_v56 = vrot.slane %v2402_v8, 2 }
 0x245   : >> { %v2408_v29 = vadd.f32 %v2407_v15, %v2389_v35  ;;  %v2414_v31 = vadd.f32 %v2413_v32, %v2390_v57  ;;  %v5330_v30 = vpop.eup %3075  ;;  %v2353_v62 = vmul.f32 1.442695, %v2338_v9  ;;  %v2419_v33 = vrot.slane %v2391_v51, 4 }
 0x246   : >> { %v2398_v50 = vadd.f32 %v2397_v13, %v2396_v59  ;;  %v2425_v25 = vrot.slane %v2392_v41, 4  ;;  %v2404_v46 = vadd.f32 %v2403_v56, %v2402_v8  ;;  %v2431_v1 = vrot.slane %v2393_v48, 4 }
 0x247   : >> { %v5332_v26 = vpop.eup %3077  ;;  %v2409_v5 = vrot.slane %v2408_v29, 2  ;;  %v2415_v40 = vrot.slane %v2414_v31, 2  ;;  %v2420_v22 = vadd.f32 %v2419_v33, %v2391_v51  ;;  %v2437_v61 = vrot.slane %v2394_v20, 4 }
 0x248   : >> { %v5334_v42 = vpop.eup %3079  ;;  %v2399_v45 = vrot.slane %v2398_v50, 1  ;;  %v2426_v17 = vadd.f32 %v2425_v25, %v2392_v41  ;;  %v2405_v57 = vrot.slane %v2404_v46, 1  ;;  %v2432_v9 = vadd.f32 %v2431_v1, %v2393_v48 }
 0x249   : >> { %v5336_v35 = vpop.eup %3081  ;;  %v2410_v3 = vadd.f32 %v2409_v5, %v2408_v29  ;;  %v2416_v4 = vadd.f32 %v2415_v40, %v2414_v31  ;;  %v2421_v15 = vrot.slane %v2420_v22, 2  ;;  %v2438_v32 = vadd.f32 %v2437_v61, %v2394_v20 }
 0x24a   : >> { %v5338_v18 = vpop.eup %3083  ;;  %v2400_v59 = vadd.f32 %v2399_v45, %v2398_v50  ;;  %v2427_v8 = vrot.slane %v2426_v17, 2  ;;  %3091 = vpow2.f32 %v2353_v62  ;;  %v2433_v51 = vrot.slane %v2432_v9, 2 }
 0x24b   : >> { %v5340_v13 = vpop.eup %3085  ;;  %v2411_v56 = vrot.slane %v2410_v3, 1  ;;  %v2417_v55 = vrot.slane %v2416_v4, 1  ;;  %v2406_v41 = vadd.f32 %v2405_v57, %v2404_v46  ;;  %v2422_v33 = vadd.f32 %v2421_v15, %v2420_v22 }
 0x24c   : >> { %v2428_v25 = vadd.f32 %v2427_v8, %v2426_v17  ;;  %v2439_v60 = vrot.slane %v2438_v32, 2  ;;  %v2434_v31 = vadd.f32 %v2433_v51, %v2432_v9  ;;  %v2443_v48 = vmul.f32 1.442695, %v2400_v59  ;;  %v5889_v59 = vld [vmem:[#allocation12_spill] sm:$0xff] }
 0x24d   : >> { %v2412_v39 = vadd.f32 %v2411_v56, %v2410_v3  ;;  %v2418_v29 = vadd.f32 %v2417_v55, %v2416_v4  ;;  %v5342_v5 = vpop.eup %3087  ;;  %3093 = vrcp.f32 %v5297_v34  ;;  %v2423_v50 = vrot.slane %v2422_v33, 1 }
 0x24e   : >> { %v2429_v20 = vrot.slane %v2428_v25, 1  ;;  %v2440_v40 = vadd.f32 %v2439_v60, %v2438_v32  ;;  %v5345_v1 = vpop.eup %3089  ;;  %v2253_v62 = vadd.f32 %v5328_v19, %v2252_v44  ;;  %v2355_v46 = vadd.f32 %v5336_v35, %v5332_v26  ;;  %v5890_v32 = vld [vmem:[#allocation30_spill] sm:$0xff] }
 0x24f   : >> { %v2435_v45 = vrot.slane %v2434_v31, 1  ;;  %v2447_v22 = vmul.f32 1.442695, %v2412_v39  ;;  %v2424_v17 = vadd.f32 %v2423_v50, %v2422_v33  ;;  %v2445_v57 = vmul.f32 1.442695, %v2406_v41 }
 0x250   : >> { %v2430_v55 = vadd.f32 %v2429_v20, %v2428_v25  ;;  %v2441_v61 = vrot.slane %v2440_v40, 1  ;;  %v2255_v3 = vadd.f32 %v5315_v38, %v5301_v43  ;;  %3095 = vpow2.f32 %v2443_v48  ;;  %v5891_v43 = vld [vmem:[#allocation41_spill] sm:$0xff]  ;;  %v5892_v25 = vld [vmem:[#allocation32_spill] sm:$0xff]  ;;  %v5895_v20 = vld [vmem:[#allocation39_spill] sm:$0xff] }
 0x251   : >> { %v2436_v34 = vadd.f32 %v2435_v45, %v2434_v31  ;;  %v2449_v4 = vmul.f32 1.442695, %v2418_v29  ;;  %v2358_v60 = vadd.f32 %v5338_v18, %v5334_v42  ;;  %3097 = vpow2.f32 %v2447_v22  ;;  %v5893_v29 = vld [vmem:[#allocation31_spill] sm:$0xff] }
 0x252   : >> { %v2442_v9 = vadd.f32 %v2441_v61, %v2440_v40  ;;  %v2451_v44 = vmul.f32 1.442695, %v2424_v17  ;;  %v2051_v15 = vmul.f32 %v5889_v59, %v5066_v2  ;;  %3099 = vrcp.f32 %v2253_v62  ;;  %v5894_v2 = vld [vmem:[#allocation36_spill] sm:$0xff]  ;;  %v5896_v45 = vld [vmem:[#allocation43_spill] sm:$0xff]  ;;  %v5897_v17 = vld [vmem:[#allocation26_spill] sm:$0xff] }
 0x253   : >> { %v2356_v39 = vadd.f32 %v5340_v13, %v2355_v46  ;;  %v2453_v8 = vmul.f32 1.442695, %v2430_v55  ;;  %v2053_v56 = vmul.f32 %v5889_v59, %v5890_v32  ;;  %v2055_v51 = vmul.f32 %v5889_v59, %v5891_v43  ;;  %v3244_v32 = vld [vmem:[%s3711_s27 + $0x1c0] sm:$0xff] }
 0x254   : >> { %3101 = vpow2.f32 %v2445_v57  ;;  %v2455_v41 = vmul.f32 1.442695, %v2436_v34  ;;  %v5361_v33 = vpop.eup %3091  ;;  %v2052_v31 = vmul.f32 %v5893_v29, %v5892_v25  ;;  %v2057_v48 = vmul.f32 %v5889_v59, %v5894_v2  ;;  %v3246_v43 = vld [vmem:[%s3711_s27 + $0x1e0] sm:$0xff]  ;;  %v5898_v2 = vld [vmem:[#allocation49_spill] sm:$0xff] }
 0x255   : >> { %v2256_v50 = vadd.f32 %v5330_v30, %v2255_v3  ;;  %3103 = vpow2.f32 %v2449_v4  ;;  %v2054_v40 = vmul.f32 %v5893_v29, %v5895_v20  ;;  %v2359_v62 = vadd.f32 %v5342_v5, %v2358_v60  ;;  %v3242_v3 = vld [vmem:[%s3711_s27 + $0x180] sm:$0xff] }
 0x256   : >> { %3105 = vpow2.f32 %v2451_v44  ;;  %v2457_v46 = vmul.f32 1.442695, %v2442_v9  ;;  %v2056_v22 = vmul.f32 %v5893_v29, %v5896_v45  ;;  %v2058_v55 = vmul.f32 %v5893_v29, %v5897_v17  ;;  %v3243_v4 = vld [vmem:[%s3711_s27 + $0x1a0] sm:$0xff]  ;;  %v3245_v9 = vld [vmem:[%s3711_s27 + $0x188] sm:$0xff] }
 0x257   : >> { %v2357_v61 = vadd.f32 %v5345_v1, %v2356_v39  ;;  %3107 = vpow2.f32 %v2453_v8  ;;  %v3094_v57 = vpop.eup %3093  ;;  %v2059_v34 = vmul.f32 %v3242_v3, %v2051_v15  ;;  %v2061_v59 = vmul.f32 %v3243_v4, %v2053_v56  ;;  %v5899_v39 = vld [vmem:[#allocation51_spill] sm:$0xff]  ;;  %v5900_v15 = vld [vmem:[#allocation17_spill] sm:$0xff]  ;;  %v3248_v45 = vld [vmem:[%s3711_s27 + $0x1c8] sm:$0xff] }
 0x258   : >> { %v2063_v60 = vmul.f32 %v3244_v32, %v2055_v51  ;;  %3109 = vpow2.f32 %v2455_v41  ;;  %v2060_v44 = vmul.f32 %v3245_v9, %v2052_v31  ;;  %v2065_v25 = vmul.f32 %v3246_v43, %v2057_v48  ;;  %v3247_v41 = vld [vmem:[%s3711_s27 + $0x1a8] sm:$0xff]  ;;  %v5902_v43 = vld [vmem:[#allocation33_spill] sm:$0xff] }
 0x259   : >> { %v2155_v29 = vmul.f32 %v5308_v23, %v5898_v2  ;;  %3111 = vrcp.f32 %v2256_v50  ;;  %v2157_v8 = vmul.f32 %v5308_v23, %v5899_v39  ;;  %v2159_v20 = vmul.f32 %v5308_v23, %v5900_v15  ;;  %v3249_v3 = vld [vmem:[%s3711_s27 + $0x1e8] sm:$0xff] }
 0x25a   : >> { %v2360_v56 = vadd.f32 %v5361_v33, %v2359_v62  ;;  %3113 = vpow2.f32 %v2457_v46  ;;  %v5388_v51 = vpop.eup %3095  ;;  %v2062_v31 = vmul.f32 %v3247_v41, %v2054_v40  ;;  %v2064_v48 = vmul.f32 %v3248_v45, %v2056_v22  ;;  %v5901_v32 = vld [vmem:[#allocation48_spill] sm:$0xff] }
 0x25b   : >> { %v2161_v17 = vmul.f32 %v5308_v23, %v5227_v10  ;;  %3115 = vrcp.f32 %v2357_v61  ;;  %v5394_v50 = vpop.eup %3097  ;;  %v2066_v4 = vmul.f32 %v3249_v3, %v2058_v55  ;;  %v2067_v9 = vadd.f32 %v2059_v34, %v5901_v32  ;;  %v3250_v61 = vld [vmem:[%s3711_s27 + $0x200] sm:$0xff]  ;;  %v5904_v34 = vld [vmem:[#allocation20_spill] sm:$0xff] }
 0x25c   : >> { %v2069_v62 = vadd.f32 %v2061_v59, %v5902_v43  ;;  %v2156_v46 = vmul.f32 %v3094_v57, %v5181_v47  ;;  %v3100_v2 = vpop.eup %3099  ;;  %v2071_v40 = vadd.f32 %v2063_v60, %v5239_v52  ;;  %v2158_v39 = vmul.f32 %v3094_v57, %v5218_v14  ;;  %v5903_v55 = vld [vmem:[#allocation15_spill] sm:$0xff]  ;;  %v5905_v52 = vld [vmem:[#allocation16_spill] sm:$0xff] }
 0x25d   : >> { %v2160_v22 = vmul.f32 %v3094_v57, %v5220_v7  ;;  %v2162_v10 = vmul.f32 %v3094_v57, %v5234_v6  ;;  %v2163_v15 = vmul.f32 %v3250_v61, %v2155_v29  ;;  %v2165_v41 = vmul.f32 %v5903_v55, %v2157_v8  ;;  %v5906_v29 = vld [vmem:[#allocation13_spill] sm:$0xff]  ;;  %v5909_v61 = vld [vmem:[#allocation22_spill] sm:$0xff] }
 0x25e   : >> { %v5404_v23 = vpop.eup %3101  ;;  %v2167_v45 = vmul.f32 %v5904_v34, %v2159_v20  ;;  %3117 = vrcp.f32 %v2360_v56  ;;  %v2073_v47 = vadd.f32 %v2065_v25, %v5243_v28  ;;  %v2169_v60 = vmul.f32 %v5905_v52, %v2161_v17  ;;  %v5907_v28 = vld [vmem:[#allocation24_spill] sm:$0xff]  ;;  %v5908_v17 = vld [vmem:[#allocation14_spill] sm:$0xff] }
 0x25f   : >> { %v5409_v59 = vpop.eup %3103  ;;  %v2459_v14 = vadd.f32 %v5394_v50, %v5388_v51  ;;  %v2068_v6 = vadd.f32 %v2060_v44, %v5258_v54  ;;  %v2070_v57 = vadd.f32 %v2062_v31, %v5269_v16  ;;  %v2164_v8 = vmul.f32 %v5906_v29, %v2156_v46 }
 0x260   : >> { %v5415_v7 = vpop.eup %3105  ;;  %v2072_v20 = vadd.f32 %v2064_v48, %v5273_v53  ;;  %v2074_v56 = vadd.f32 %v2066_v4, %v5292_v21  ;;  %v2166_v25 = vmul.f32 %v5907_v28, %v2158_v39  ;;  %v2168_v32 = vmul.f32 %v5908_v17, %v2160_v22 }
 0x261   : >> { %v5420_v3 = vpop.eup %3107  ;;  %v2170_v55 = vmul.f32 %v5909_v61, %v2162_v10  ;;  %v2171_v34 = vadd.f32 %v2163_v15, %v2067_v9  ;;  %v2173_v54 = vadd.f32 %v2165_v41, %v2069_v62  ;;  %v2175_v44 = vadd.f32 %v2167_v45, %v2071_v40 }
 0x262   : >> { %v5426_v43 = vpop.eup %3109  ;;  %v2177_v31 = vadd.f32 %v2169_v60, %v2073_v47  ;;  %v2259_v46 = vmul.f32 %v3100_v2, %v5245_v12  ;;  %v2460_v52 = vadd.f32 %v5415_v7, %v2459_v14  ;;  %v2462_v53 = vadd.f32 %v5409_v59, %v5404_v23  ;;  %v3251_v60 = vld [vmem:[%s3711_s27 + $0x280] sm:$0xff]  ;;  %v5910_v14 = vld [vmem:[#allocation42_spill] sm:$0xff] }
 0x263   : >> { %v3112_v16 = vpop.eup %3111  ;;  %v2172_v48 = vadd.f32 %v2164_v8, %v2068_v6  ;;  %v2261_v4 = vmul.f32 %v3100_v2, %v5265_v0  ;;  %v2263_v39 = vmul.f32 %v3100_v2, %v5288_v36  ;;  %v2265_v9 = vmul.f32 %v3100_v2, %v5328_v19  ;;  %v5912_v8 = vld [vmem:[#allocation46_spill] sm:$0xff] }
 0x264   : >> { %v5433_v21 = vpop.eup %3113  ;;  %v2174_v40 = vadd.f32 %v2166_v25, %v2070_v57  ;;  %v2176_v22 = vadd.f32 %v2168_v32, %v2072_v20  ;;  %v2461_v12 = vadd.f32 %v5426_v43, %v2460_v52  ;;  %v2463_v10 = vadd.f32 %v5420_v3, %v2462_v53  ;;  %v5911_v57 = vld [vmem:[#allocation23_spill] sm:$0xff]  ;;  %v5914_v25 = vld [vmem:[#allocation44_spill] sm:$0xff]  ;;  %v5915_v32 = vld [vmem:[#allocation45_spill] sm:$0xff] }
 0x265   : >> { %v3116_v62 = vpop.eup %3115  ;;  %v2260_v15 = vmul.f32 %v3112_v16, %v5254_v27  ;;  %v2262_v41 = vmul.f32 %v3112_v16, %v5276_v63  ;;  %v2264_v45 = vmul.f32 %v3112_v16, %v5315_v38  ;;  %v2266_v47 = vmul.f32 %v3112_v16, %v5330_v30 }
 0x266   : >> { %v2178_v0 = vadd.f32 %v2170_v55, %v2074_v56  ;;  %v2267_v36 = vmul.f32 %v3251_v60, %v2259_v46  ;;  %v2464_v19 = vadd.f32 %v5433_v21, %v2463_v10  ;;  %3119 = vrcp.f32 %v2461_v12  ;;  %v5913_v56 = vld [vmem:[#allocation40_spill] sm:$0xff]  ;;  %v5916_v55 = vld [vmem:[#allocation47_spill] sm:$0xff] }
 0x267   : >> { %v2269_v6 = vmul.f32 %v5910_v14, %v2261_v4  ;;  %v2271_v29 = vmul.f32 %v5911_v57, %v2263_v39  ;;  %v2273_v20 = vmul.f32 %v5912_v8, %v2265_v9  ;;  %v2363_v27 = vmul.f32 %v3116_v62, %v5332_v26  ;;  %v5917_v39 = vld [vmem:[#allocation21_spill] sm:$0xff]  ;;  %v5919_v10 = vld [vmem:[#allocation52_spill] sm:$0xff]  ;;  %v5922_v14 = vld [vmem:[#allocation38_spill] sm:$0xff] }
 0x268   : >> { %v3118_v2 = vpop.eup %3117  ;;  %v2365_v63 = vmul.f32 %v3116_v62, %v5336_v35  ;;  %v2367_v38 = vmul.f32 %v3116_v62, %v5340_v13  ;;  %v2369_v30 = vmul.f32 %v3116_v62, %v5345_v1  ;;  %3121 = vrcp.f32 %v2464_v19  ;;  %v5918_v62 = vld [vmem:[#allocation35_spill] sm:$0xff]  ;;  %v5921_v19 = vld [vmem:[#allocation50_spill] sm:$0xff] }
 0x269   : >> { %v2268_v28 = vmul.f32 %v5913_v56, %v2260_v15  ;;  %v2270_v17 = vmul.f32 %v5914_v25, %v2262_v41  ;;  %v2272_v61 = vmul.f32 %v5915_v32, %v2264_v45  ;;  %v2274_v16 = vmul.f32 %v5916_v55, %v2266_v47  ;;  %v5920_v41 = vld [vmem:[#allocation37_spill] sm:$0xff]  ;;  %v5925_v32 = vld [vmem:[#allocation18_spill] sm:$0xff] }
 0x26a   : >> { %v2364_v46 = vmul.f32 %v3118_v2, %v5334_v42  ;;  %v2366_v52 = vmul.f32 %v3118_v2, %v5338_v18  ;;  %v2368_v26 = vmul.f32 %v3118_v2, %v5342_v5  ;;  %v2370_v35 = vmul.f32 %v3118_v2, %v5361_v33  ;;  %v5926_v55 = vld [vmem:[#allocation29_spill] sm:$0xff] }
 0x26b   : >> { %v2275_v13 = vadd.f32 %v2267_v36, %v2171_v34  ;;  %v2277_v53 = vadd.f32 %v2269_v6, %v2173_v54  ;;  %v2279_v1 = vadd.f32 %v2271_v29, %v2175_v44  ;;  %v2281_v4 = vadd.f32 %v2273_v20, %v2177_v31  ;;  %v5923_v34 = vld [vmem:[#allocation27_spill] sm:$0xff] }
 0x26c   : >> { %v2371_v9 = vmul.f32 %v5917_v39, %v2363_v27  ;;  %v2373_v12 = vmul.f32 %v5918_v62, %v2365_v63  ;;  %v2375_v15 = vmul.f32 %v5919_v10, %v2367_v38  ;;  %v2377_v45 = vmul.f32 %v5920_v41, %v2369_v30  ;;  %v5924_v44 = vld [vmem:[#allocation19_spill] sm:$0xff] }
 0x26d   : >> { %v2276_v47 = vadd.f32 %v2268_v28, %v2172_v48  ;;  %v2278_v42 = vadd.f32 %v2270_v17, %v2174_v40  ;;  %v2280_v60 = vadd.f32 %v2272_v61, %v2176_v22  ;;  %v2282_v18 = vadd.f32 %v2274_v16, %v2178_v0  ;;  %v5927_v16 = vld [vmem:[#allocation28_spill] sm:$0xff] }
 0x26e   : >> { %v2372_v5 = vmul.f32 %v5921_v19, %v2364_v46  ;;  %v2374_v33 = vmul.f32 %v5922_v14, %v2366_v52  ;;  %v2376_v54 = vmul.f32 %v5923_v34, %v2368_v26  ;;  %v2378_v31 = vmul.f32 %v5924_v44, %v2370_v35 }
 0x26f   : >> { %v2379_v2 = vadd.f32 %v2371_v9, %v2275_v13  ;;  %v2381_v6 = vadd.f32 %v2373_v12, %v2277_v53  ;;  %v2383_v57 = vadd.f32 %v2375_v15, %v2279_v1  ;;  %v2385_v29 = vadd.f32 %v2377_v45, %v2281_v4 }
 0x270   : >> { %v3120_v36 = vpop.eup %3119  ;;  %v2380_v20 = vadd.f32 %v2372_v5, %v2276_v47  ;;  %v2382_v27 = vadd.f32 %v2374_v33, %v2278_v42  ;;  %v2384_v63 = vadd.f32 %v2376_v54, %v2280_v60  ;;  %v2386_v38 = vadd.f32 %v2378_v31, %v2282_v18 }
 0x271   : >> { %v2467_v8 = vmul.f32 %v3120_v36, %v5388_v51  ;;  %v2469_v48 = vmul.f32 %v3120_v36, %v5394_v50  ;;  %v2471_v40 = vmul.f32 %v3120_v36, %v5415_v7  ;;  %v2473_v22 = vmul.f32 %v3120_v36, %v5426_v43 }
 0x272   : >> { %v3122_v0 = vpop.eup %3121 }
 0x273   : >> { %v2468_v30 = vmul.f32 %v3122_v0, %v5404_v23  ;;  %v2470_v56 = vmul.f32 %v3122_v0, %v5409_v59  ;;  %v2472_v28 = vmul.f32 %v3122_v0, %v5420_v3  ;;  %v2474_v51 = vmul.f32 %v3122_v0, %v5433_v21 }
 0x274   : >> { %v2475_v50 = vmul.f32 %v5250_v49, %v2467_v8  ;;  %v2477_v7 = vmul.f32 %v5279_v37, %v2469_v48  ;;  %v2479_v43 = vmul.f32 %v5304_v24, %v2471_v40  ;;  %v2481_v25 = vmul.f32 %v5318_v58, %v2473_v22 }
 0x275   : >> { %v2476_v17 = vmul.f32 %v5261_v11, %v2468_v30  ;;  %v2478_v61 = vmul.f32 %v5925_v32, %v2470_v56  ;;  %v2480_v23 = vmul.f32 %v5926_v55, %v2472_v28  ;;  %v2482_v59 = vmul.f32 %v5927_v16, %v2474_v51  ;;  %493 = sbr.rel (!%p491_p13) target bundleno = 110 (0x6e), region = 139 }
 0x276   : >> { %v2483_v3 = vadd.f32 %v2475_v50, %v2379_v2  ;;  %v2485_v46 = vadd.f32 %v2477_v7, %v2381_v6  ;;  %v2487_v21 = vadd.f32 %v2479_v43, %v2383_v57  ;;  %v2489_v52 = vadd.f32 %v2481_v25, %v2385_v29 }
 0x277   : >> { %v2484_v49 = vadd.f32 %v2476_v17, %v2380_v20  ;;  %v2486_v26 = vadd.f32 %v2478_v61, %v2382_v27  ;;  %v2488_v37 = vadd.f32 %v2480_v23, %v2384_v63  ;;  %v2490_v35 = vadd.f32 %v2482_v59, %v2386_v38 }
 0x278   : >> { %2493 = vst [vmem:[%s2492_s29] sm:$0xff] %v2483_v3  ;;  %2495 = vst [vmem:[%s2492_s29 + $0x20] sm:$0xff] %v2485_v46 }
 0x279   : >> { %2497 = vst [vmem:[%s2492_s29 + $0x40] sm:$0xff] %v2487_v21  ;;  %2499 = vst [vmem:[%s2492_s29 + $0x60] sm:$0xff] %v2489_v52 }
 0x27a   : >> { %2494 = vst [vmem:[%s2492_s29 + $0x8] sm:$0xff] %v2484_v49  ;;  %2496 = vst [vmem:[%s2492_s29 + $0x28] sm:$0xff] %v2486_v26 }
 0x27b   : >> { %2498 = vst [vmem:[%s2492_s29 + $0x48] sm:$0xff] %v2488_v37  ;;  %2500 = vst [vmem:[%s2492_s29 + $0x68] sm:$0xff] %v2490_v35 }
 0x27c   : > { %3265 = shalt.err (!%p3262_p7)
}
 0x27d   : > { %s3266_s19 = scalar_lea.hbm %s5495_s5, 2048  ;;  %s3270_s24 = scalar_lea.hbm %s5544_s2, 4096 }
 0x27e   : > { %p3267_p10 = scmp.ne.s32.totalorder %s5495_s5, %s3266_s19  ;;  %p3271_p13 = scmp.lt.u32.totalorder %s5495_s5, %s5544_s2 }
 0x27f   : > { %p3272_p0 = scmp.lt.u32.totalorder %s3270_s24, %s3266_s19  ;;  %p3274_p2 = scmp.lt.u32.totalorder %s3266_s19, %s5495_s5 }
 0x280   : > { %p3268_p11 = pnand %p3267_p10, %p3385_p6 }
 0x281   : > { %p3273_p1 = por %p3272_p0, %p3271_p13 }
 0x282   : > { %p3269_p12 = pneg %p3268_p11 }
 0x283   : > { %p3275_p3 = por %p3274_p2, %p3273_p1 }
 0x285   : > { %p3276_p4 = pnand %p3275_p3, %p3269_p12 }
 0x287   : > { %3279 = shalt.err (!%p3276_p4)
}
 0x288   : > { %s3325_s27 = smov 512   ;;  %s3326_s28 = smov 1024  }
 0x289   : > { %s3327_s29 = smov 32  }
 0x28a   : > { %2721 = dma.vmem_to_hbm [thread:$0]  (%p3385_p6), %s5498_s6, 2048, %s5495_s5, %s2502_s7, %s3325_s27, %s3326_s28, %s3327_s29  }
 0x28b PF: > { %s2530_s30 = sand.u32 1, %s3306_s9   ;;  %p2724_p5 = pnand %p2635_p9, %p3389_p8 }
 0x28c   : > { %s2531_s3 = scalar_lea.sflag [#allocation5], %s2530_s30 }
 0x28d   : > { %3301 = dma.done.wait (!%p2724_p5), %s2531_s3, 2048  }
 0x28e   : > { %3303 = vsyncadd (!%p2724_p5), %s2531_s3, 4294965248  ;;  %p12_p7 = scmp.ge.s32.totalorder %s3366_s15, 4   ;;  %s5928_s9 = smov %s3310_s10 }
 0x28f   : > { %s5929_s10 = smov %s3314_s11  ;;  %s5930_s11 = smov %s3379_s18 }
 0x290   : > { %s5931_s12 = smov %s3366_s15  ;;  %14 = sbr.rel (!%p12_p7) target bundleno = 3 (0x3), region = 150 }
 0x297   :  { %2536 = vsyncpa [#allocation5], 1 }
 0x298   :  { %2538 = vsyncpa [#allocation5 + $0x1], 1 }

</bundles_post_ra>
